<compile_context>
chip_gen: v5e
topology: v5e:2x2
jax: 0.10.0
libtpu: 0.0.40
codegen_flags: <defaults>
</compile_context>

<pallas_src>
import math
import functools

import jax
import jax.numpy as jnp
from jax.experimental import pallas as pl
from jax.experimental.pallas import tpu as pltpu


LN_EPS = 1e-6  # matches nn.LayerNorm(hidden_size, eps=1e-06)


def _layernorm(x, gamma, beta):
    # E[x^2] - mean^2 form: the two cross-lane reductions are independent
    # (shorter dependency chain than the (x - mean)^2 form).
    x = x.astype(jnp.float32)
    mean = jnp.mean(x, axis=-1, keepdims=True)
    ex2 = jnp.mean(x * x, axis=-1, keepdims=True)
    var = jnp.maximum(ex2 - mean * mean, 0.0)
    return (x - mean) * jax.lax.rsqrt(var + LN_EPS) * gamma + beta


def cross_attn_kernel(q_ref, kv_ref, g_ref, b_ref,
                      wq_ref, bq_ref, wkv_ref, bkv_ref,
                      wout_ref, bout_ref, o_ref, attn_ref, *, num_heads):
    bblk, nq, H = q_ref.shape
    seq = kv_ref.shape[1]
    nh = num_heads
    hd = H // nh

    gamma = g_ref[...]            # (1, H) f32
    beta = b_ref[...]             # (1, H) f32

    # Fold batch into the row (sublane) axis for LayerNorm + projections.
    q_rows = q_ref[...].reshape(bblk * nq, H)
    kv_rows = kv_ref[...].reshape(bblk * seq, H)

    qn = _layernorm(q_rows, gamma, beta).astype(jnp.bfloat16)     # (bblk*nq,  H)
    kvn = _layernorm(kv_rows, gamma, beta).astype(jnp.bfloat16)   # (bblk*seq, H)

    # bf16 x bf16 -> f32 projections.  The 1/sqrt(hd) attention scale is
    # already folded into wq/bq by the wrapper.
    qp = jnp.dot(qn, wq_ref[...], preferred_element_type=jnp.float32) + bq_ref[...]
    kvp = jnp.dot(kvn, wkv_ref[...], preferred_element_type=jnp.float32) + bkv_ref[...]
    qp16 = qp.astype(jnp.bfloat16)      # (bblk*nq,  H)
    kvp16 = kvp.astype(jnp.bfloat16)    # (bblk*seq, 2H)

    # Statically bounded (batch x head) unroll: the wrapper caps block_b so
    # bblk * nh stays small.  Every per-head result goes straight into the
    # VMEM attention scratch, so no large value stays live across iterations.
    # TODO(synk): heads with head_dim < 128 take unaligned lane slices here;
    # grouping heads to a 128-lane granularity would remove the per-head
    # relayouts / masked stores.
    for b in range(bblk):
        q_b = qp16[b * nq:(b + 1) * nq, :]        # (nq,  H)   sublane slice
        kv_b = kvp16[b * seq:(b + 1) * seq, :]    # (seq, 2H)  sublane slice
        for h in range(nh):                       # static unroll over heads
            lo = h * hd
            qh = q_b[:, lo:lo + hd]               # (nq,  hd)
            kh = kv_b[:, lo:lo + hd]              # (seq, hd)
            vh = kv_b[:, H + lo:H + lo + hd]      # (seq, hd)

            # q @ k^T via an NT contraction; Mosaic feeds the transposed RHS
            # to the MXU natively (no separate XLU transpose per head).
            s = jax.lax.dot_general(
                qh, kh, (((1,), (1,)), ((), ())),
                preferred_element_type=jnp.float32)          # (nq, seq)
            s = s - jnp.max(s, axis=-1, keepdims=True)
            p = jnp.exp(s)
            p = p * pl.reciprocal(jnp.sum(p, axis=-1, keepdims=True), approx=True)
            oh = jnp.dot(p.astype(jnp.bfloat16), vh,
                         preferred_element_type=jnp.float32)  # (nq, hd)

            attn_ref[b * nq:(b + 1) * nq, lo:lo + hd] = oh

    # One out-projection over every row of the block: contraction depth K = H
    # (instead of K = hd per head); single lane-dense (bblk*nq, H) store.
    out = jnp.dot(attn_ref[...].astype(jnp.bfloat16), wout_ref[...],
                  preferred_element_type=jnp.float32) + bout_ref[...]
    o_ref[...] = out.reshape(bblk, nq, H).astype(o_ref.dtype)


def _pick_block_b(batch, nq, seq, num_heads):
    """Per-grid-step batch block.

    Targets: <= 256 fused rows per block, a small static (batch x head) unroll
    (<= 32 bodies), and >= min(B, 8) grid steps so the BlockSpec pipeline has
    prefetch overlap and both v7x megacore TCs get several steps each.
    """
    best = 1
    for blk in range(1, batch + 1):
        if batch % blk:
            continue
        if blk * max(nq, seq) > 256:
            break
        if blk * num_heads > 32:
            break
        if batch // blk < min(batch, 8):
            break
        best = blk
    return best


def _vmem_cap_bytes():
    """Per-chip cap on vmem_limit_bytes (v5e/v6e: 128 MiB physical, v7x: 64)."""
    try:
        phys = int(pltpu.get_tpu_info().vmem_capacity_bytes)
    except Exception:
        phys = 64 << 20  # conservative default: assume v7x-sized VMEM
    return max(min(phys - (16 << 20), 112 << 20), 32 << 20)


def cross_attention_block(queries, keys_values, params, *, num_heads, block_b=None):
    """queries: (B, Nq, H), keys_values: (B, S, H) -> (B, Nq, H)."""
    B, Nq, H = queries.shape
    S = keys_values.shape[1]
    assert H % num_heads == 0, "hidden_size must be divisible by num_heads"
    hd = H // num_heads
    gamma, beta, wqkv_t, bqkv, wout_t, bout = params

    if block_b is None:
        block_b = _pick_block_b(B, Nq, S, num_heads)
    assert B % block_b == 0, "batch must be divisible by block_b"

    scale = 1.0 / math.sqrt(hd)
    # Split the fused QKV parameters outside the kernel, fold the attention
    # scale into the query projection, and cast MXU weight operands to bf16.
    wq = (wqkv_t[:, :H] * scale).astype(jnp.bfloat16)        # (H, H)
    wkv = wqkv_t[:, H:].astype(jnp.bfloat16)                 # (H, 2H)
    wout = wout_t.astype(jnp.bfloat16)                       # (H, H)
    bq = (bqkv[:H] * scale).reshape(1, H).astype(jnp.float32)
    bkv = bqkv[H:].reshape(1, 2 * H).astype(jnp.float32)
    gamma2 = gamma.reshape(1, H).astype(jnp.float32)
    beta2 = beta.reshape(1, H).astype(jnp.float32)
    bout2 = bout.reshape(1, H).astype(jnp.float32)

    # Honest VMEM budget: double-buffered activation I/O blocks, bf16 weights
    # (worst case still double-buffered), and in-kernel f32/bf16 intermediates.
    itemsize = queries.dtype.itemsize
    rows_q = block_b * Nq
    rows_kv = block_b * S
    act_io = 2 * (rows_q * H + rows_kv * H) * itemsize + 2 * rows_q * H * itemsize
    wgt = 2 * (4 * H * H * 2 + 6 * H * 4)
    interm = ((rows_q + rows_kv) * H * 4            # qn / kvn
              + rows_q * H * (4 + 2)                # qp (+ bf16 copy)
              + rows_kv * 2 * H * (4 + 2)           # kvp (+ bf16 copy)
              + rows_q * H * 4                      # attention scratch
              + 2 * Nq * S * 4)                     # per-head scores / probs
    budget = act_io + wgt + interm + (4 << 20)      # + compiler-internal slack
    vmem_limit = int(min(max(budget, 16 << 20), _vmem_cap_bytes()))
    # TODO(synk): for very large H (~>= 2800 bf16) on v7x, tile the weight
    # output-column dimension over a second "arbitrary" grid axis (with a VMEM
    # accumulator) instead of keeping all three weights resident.

    kernel = functools.partial(cross_attn_kernel, num_heads=num_heads)

    def _build(buffered_consts):
        def const_spec(shape):
            idx = lambda b, _n=len(shape): (0,) * _n
            if buffered_consts:
                return pl.BlockSpec(shape, idx, pipeline_mode=pl.Buffered(1))
            return pl.BlockSpec(shape, idx)

        return pl.pallas_call(
            kernel,
            out_shape=jax.ShapeDtypeStruct((B, Nq, H), queries.dtype),
            grid_spec=pltpu.PrefetchScalarGridSpec(
                num_scalar_prefetch=0,
                grid=(B // block_b,),
                in_specs=[
                    pl.BlockSpec((block_b, Nq, H), lambda b: (b, 0, 0)),  # queries
                    pl.BlockSpec((block_b, S, H), lambda b: (b, 0, 0)),   # keys_values
                    const_spec((1, H)),          # ln gamma
                    const_spec((1, H)),          # ln beta
                    const_spec((H, H)),          # W_q  (in,out), bf16, pre-scaled
                    const_spec((1, H)),          # b_q  (pre-scaled)
                    const_spec((H, 2 * H)),      # W_kv (in,out), bf16
                    const_spec((1, 2 * H)),      # b_kv
                    const_spec((H, H)),          # W_out (in,out), bf16
                    const_spec((1, H)),          # b_out
                ],
                out_specs=pl.BlockSpec((block_b, Nq, H), lambda b: (b, 0, 0)),
                scratch_shapes=[pltpu.VMEM((block_b * Nq, H), jnp.float32)],
            ),
            compiler_params=pltpu.CompilerParams(
                dimension_semantics=("parallel",),
                vmem_limit_bytes=vmem_limit),
        )

    args = (queries, keys_values, gamma2, beta2, wq, bq, wkv, bkv, wout, bout2)
    try:
        out = _build(True)(*args)
        return jax.block_until_ready(out)
    except Exception:
        # Fallback for jax builds without pipeline_mode=pl.Buffered support on
        # top-level BlockSpecs (identical semantics, just double-buffered
        # constants).
        return _build(False)(*args)


def reference(queries, keys_values, params, *, num_heads):
    gamma, beta, wqkv_t, bqkv, wout_t, bout = params
    B, Nq, H = queries.shape
    S = keys_values.shape[1]
    hd = H // num_heads

    def ln(x):
        m = jnp.mean(x, axis=-1, keepdims=True)
        v = jnp.mean((x - m) ** 2, axis=-1, keepdims=True)
        return (x - m) * jax.lax.rsqrt(v + LN_EPS) * gamma + beta

    qn = ln(queries)
    kvn = ln(keys_values)
    hp = jax.lax.Precision.HIGHEST
    qkv_q = jnp.einsum('bnh,hk->bnk', qn, wqkv_t, precision=hp) + bqkv
    qkv_kv = jnp.einsum('bsh,hk->bsk', kvn, wqkv_t, precision=hp) + bqkv
    q = qkv_q[..., :H].reshape(B, Nq, num_heads, hd).transpose(0, 2, 1, 3)
    k = qkv_kv[..., H:2 * H].reshape(B, S, num_heads, hd).transpose(0, 2, 1, 3)
    v = qkv_kv[..., 2 * H:].reshape(B, S, num_heads, hd).transpose(0, 2, 1, 3)
    scores = jnp.einsum('bhqd,bhkd->bhqk', q, k, precision=hp) / math.sqrt(hd)
    probs = jax.nn.softmax(scores, axis=-1)
    out = jnp.einsum('bhqk,bhkd->bhqd', probs, v, precision=hp)
    out = out.transpose(0, 2, 1, 3).reshape(B, Nq, H)
    return jnp.einsum('bnh,hk->bnk', out, wout_t, precision=hp) + bout


if __name__ == "__main__":
    B, Nq, S, H, NH = 2, 8, 16, 64, 8
    key = jax.random.PRNGKey(0)
    k1, k2, k3, k4 = jax.random.split(key, 4)

    queries = jax.random.normal(k1, (B, Nq, H), dtype=jnp.float32)
    keys_values = jax.random.normal(k2, (B, S, H), dtype=jnp.float32)

    # Deterministic parameter init mirroring the module's __init__:
    #   qkv / out_proj weights ~ N(0, 0.02), biases zero, LayerNorm affine = (1, 0).
    wqkv_t = 0.02 * jax.random.normal(k3, (H, 3 * H), dtype=jnp.float32)   # (in, out)
    bqkv = jnp.zeros((3 * H,), dtype=jnp.float32)
    wout_t = 0.02 * jax.random.normal(k4, (H, H), dtype=jnp.float32)       # (in, out)
    bout = jnp.zeros((H,), dtype=jnp.float32)
    gamma = jnp.ones((H,), dtype=jnp.float32)
    beta = jnp.zeros((H,), dtype=jnp.float32)

    params = (gamma, beta, wqkv_t, bqkv, wout_t, bout)

    out = cross_attention_block(queries, keys_values, params, num_heads=NH)
    out = jax.block_until_ready(out)

    ref = reference(queries, keys_values, params, num_heads=NH)
    assert out.shape == (B, Nq, H)
    # bf16 MXU operands (intentional perf tradeoff) -> looser tolerance than a
    # pure-f32 kernel would need.
    assert jnp.allclose(out, ref, atol=2e-2, rtol=2e-2), "mismatch vs reference"

    print("KERNEL_OK")
</pallas_src>

<mosaic_0001>
module attributes {stable_mosaic.version = 11 : i64} {
  func.func @cross_attn_kernel(%arg0: i32, %arg1: memref<1x8x64xf32, #tpu.memory_space<vmem>>, %arg2: memref<1x16x64xf32, #tpu.memory_space<vmem>>, %arg3: memref<1x64xf32, #tpu.memory_space<vmem>>, %arg4: memref<1x64xf32, #tpu.memory_space<vmem>>, %arg5: memref<64x64xbf16, #tpu.memory_space<vmem>>, %arg6: memref<1x64xf32, #tpu.memory_space<vmem>>, %arg7: memref<64x128xbf16, #tpu.memory_space<vmem>>, %arg8: memref<1x128xf32, #tpu.memory_space<vmem>>, %arg9: memref<64x64xbf16, #tpu.memory_space<vmem>>, %arg10: memref<1x64xf32, #tpu.memory_space<vmem>>, %arg11: memref<1x8x64xf32, #tpu.memory_space<vmem>>, %arg12: memref<8x64xf32, #tpu.memory_space<vmem>>) attributes {dimension_semantics = [#tpu.dimension_semantics<parallel>], iteration_bounds = array<i64: 2>, scalar_prefetch = 0 : i64, scratch_operands = 1 : i64, tpu.core_type = #tpu.core_type<tc>, window_params = [{transform_indices = @transform_0, window_bounds = array<i64: 1, 8, 64>}, {transform_indices = @transform_1, window_bounds = array<i64: 1, 16, 64>}, {pipeline_mode = #tpu.pipeline_mode<synchronous>, transform_indices = @transform_2, window_bounds = array<i64: 1, 64>}, {pipeline_mode = #tpu.pipeline_mode<synchronous>, transform_indices = @transform_3, window_bounds = array<i64: 1, 64>}, {pipeline_mode = #tpu.pipeline_mode<synchronous>, transform_indices = @transform_4, window_bounds = array<i64: 64, 64>}, {pipeline_mode = #tpu.pipeline_mode<synchronous>, transform_indices = @transform_5, window_bounds = array<i64: 1, 64>}, {pipeline_mode = #tpu.pipeline_mode<synchronous>, transform_indices = @transform_6, window_bounds = array<i64: 64, 128>}, {pipeline_mode = #tpu.pipeline_mode<synchronous>, transform_indices = @transform_7, window_bounds = array<i64: 1, 128>}, {pipeline_mode = #tpu.pipeline_mode<synchronous>, transform_indices = @transform_8, window_bounds = array<i64: 64, 64>}, {pipeline_mode = #tpu.pipeline_mode<synchronous>, transform_indices = @transform_9, window_bounds = array<i64: 1, 64>}, {transform_indices = @transform_10, window_bounds = array<i64: 1, 8, 64>}]} {
    %c0 = arith.constant 0 : index
    %c0_0 = arith.constant 0 : index
    %0 = vector.load %arg3[%c0, %c0_0] : memref<1x64xf32, #tpu.memory_space<vmem>>, vector<1x64xf32>
    %c0_1 = arith.constant 0 : index
    %c0_2 = arith.constant 0 : index
    %1 = vector.load %arg4[%c0_1, %c0_2] : memref<1x64xf32, #tpu.memory_space<vmem>>, vector<1x64xf32>
    %c0_3 = arith.constant 0 : index
    %c0_4 = arith.constant 0 : index
    %c0_5 = arith.constant 0 : index
    %2 = vector.load %arg1[%c0_3, %c0_4, %c0_5] : memref<1x8x64xf32, #tpu.memory_space<vmem>>, vector<1x8x64xf32>
    %3 = vector.shape_cast %2 : vector<1x8x64xf32> to vector<8x64xf32>
    %c0_6 = arith.constant 0 : index
    %c0_7 = arith.constant 0 : index
    %c0_8 = arith.constant 0 : index
    %4 = vector.load %arg2[%c0_6, %c0_7, %c0_8] : memref<1x16x64xf32, #tpu.memory_space<vmem>>, vector<1x16x64xf32>
    %5 = vector.shape_cast %4 : vector<1x16x64xf32> to vector<16x64xf32>
    %cst = arith.constant dense<0.000000e+00> : vector<8xf32>
    %6 = vector.multi_reduction <add>, %3, %cst [1] : vector<8x64xf32> to vector<8xf32>
    %7 = vector.shape_cast %6 : vector<8xf32> to vector<8x1xf32>
    %cst_9 = arith.constant 6.400000e+01 : f32
    %8 = vector.broadcast %cst_9 : f32 to vector<8x1xf32>
    %9 = arith.divf %7, %8 : vector<8x1xf32>
    %10 = arith.mulf %3, %3 : vector<8x64xf32>
    %cst_10 = arith.constant dense<0.000000e+00> : vector<8xf32>
    %11 = vector.multi_reduction <add>, %10, %cst_10 [1] : vector<8x64xf32> to vector<8xf32>
    %12 = vector.shape_cast %11 : vector<8xf32> to vector<8x1xf32>
    %cst_11 = arith.constant 6.400000e+01 : f32
    %13 = vector.broadcast %cst_11 : f32 to vector<8x1xf32>
    %14 = arith.divf %12, %13 : vector<8x1xf32>
    %15 = arith.mulf %9, %9 : vector<8x1xf32>
    %16 = arith.subf %14, %15 : vector<8x1xf32>
    %cst_12 = arith.constant 0.000000e+00 : f32
    %17 = vector.broadcast %cst_12 : f32 to vector<8x1xf32>
    %18 = arith.maximumf %16, %17 : vector<8x1xf32>
    %19 = vector.broadcast %9 : vector<8x1xf32> to vector<8x64xf32>
    %20 = arith.subf %3, %19 : vector<8x64xf32>
    %cst_13 = arith.constant 9.99999997E-7 : f32
    %21 = vector.broadcast %cst_13 : f32 to vector<8x1xf32>
    %22 = arith.addf %18, %21 : vector<8x1xf32>
    %23 = math.rsqrt %22 : vector<8x1xf32>
    %24 = vector.broadcast %23 : vector<8x1xf32> to vector<8x64xf32>
    %25 = arith.mulf %20, %24 : vector<8x64xf32>
    %26 = vector.broadcast %0 : vector<1x64xf32> to vector<8x64xf32>
    %27 = arith.mulf %25, %26 : vector<8x64xf32>
    %28 = vector.broadcast %1 : vector<1x64xf32> to vector<8x64xf32>
    %29 = arith.addf %27, %28 : vector<8x64xf32>
    %30 = arith.truncf %29 : vector<8x64xf32> to vector<8x64xbf16>
    %cst_14 = arith.constant dense<0.000000e+00> : vector<16xf32>
    %31 = vector.multi_reduction <add>, %5, %cst_14 [1] : vector<16x64xf32> to vector<16xf32>
    %32 = vector.shape_cast %31 : vector<16xf32> to vector<16x1xf32>
    %cst_15 = arith.constant 6.400000e+01 : f32
    %33 = vector.broadcast %cst_15 : f32 to vector<16x1xf32>
    %34 = arith.divf %32, %33 : vector<16x1xf32>
    %35 = arith.mulf %5, %5 : vector<16x64xf32>
    %cst_16 = arith.constant dense<0.000000e+00> : vector<16xf32>
    %36 = vector.multi_reduction <add>, %35, %cst_16 [1] : vector<16x64xf32> to vector<16xf32>
    %37 = vector.shape_cast %36 : vector<16xf32> to vector<16x1xf32>
    %cst_17 = arith.constant 6.400000e+01 : f32
    %38 = vector.broadcast %cst_17 : f32 to vector<16x1xf32>
    %39 = arith.divf %37, %38 : vector<16x1xf32>
    %40 = arith.mulf %34, %34 : vector<16x1xf32>
    %41 = arith.subf %39, %40 : vector<16x1xf32>
    %cst_18 = arith.constant 0.000000e+00 : f32
    %42 = vector.broadcast %cst_18 : f32 to vector<16x1xf32>
    %43 = arith.maximumf %41, %42 : vector<16x1xf32>
    %44 = vector.broadcast %34 : vector<16x1xf32> to vector<16x64xf32>
    %45 = arith.subf %5, %44 : vector<16x64xf32>
    %cst_19 = arith.constant 9.99999997E-7 : f32
    %46 = vector.broadcast %cst_19 : f32 to vector<16x1xf32>
    %47 = arith.addf %43, %46 : vector<16x1xf32>
    %48 = math.rsqrt %47 : vector<16x1xf32>
    %49 = vector.broadcast %48 : vector<16x1xf32> to vector<16x64xf32>
    %50 = arith.mulf %45, %49 : vector<16x64xf32>
    %51 = vector.broadcast %0 : vector<1x64xf32> to vector<16x64xf32>
    %52 = arith.mulf %50, %51 : vector<16x64xf32>
    %53 = vector.broadcast %1 : vector<1x64xf32> to vector<16x64xf32>
    %54 = arith.addf %52, %53 : vector<16x64xf32>
    %55 = arith.truncf %54 : vector<16x64xf32> to vector<16x64xbf16>
    %c0_20 = arith.constant 0 : index
    %c0_21 = arith.constant 0 : index
    %56 = vector.load %arg5[%c0_20, %c0_21] : memref<64x64xbf16, #tpu.memory_space<vmem>>, vector<64x64xbf16>
    %cst_22 = arith.constant dense<0.000000e+00> : vector<8x64xf32>
    %57 = tpu.matmul %30, %56, %cst_22 {dimension_numbers = #tpu.dot_dimension_numbers<[1], [0], [0], [1], [0, 0, 1, 1], [], []>} : vector<8x64xbf16>, vector<64x64xbf16>, vector<8x64xf32> -> vector<8x64xf32>
    %c0_23 = arith.constant 0 : index
    %c0_24 = arith.constant 0 : index
    %58 = vector.load %arg6[%c0_23, %c0_24] : memref<1x64xf32, #tpu.memory_space<vmem>>, vector<1x64xf32>
    %59 = vector.broadcast %58 : vector<1x64xf32> to vector<8x64xf32>
    %60 = arith.addf %57, %59 : vector<8x64xf32>
    %c0_25 = arith.constant 0 : index
    %c0_26 = arith.constant 0 : index
    %61 = vector.load %arg7[%c0_25, %c0_26] : memref<64x128xbf16, #tpu.memory_space<vmem>>, vector<64x128xbf16>
    %cst_27 = arith.constant dense<0.000000e+00> : vector<16x128xf32>
    %62 = tpu.matmul %55, %61, %cst_27 {dimension_numbers = #tpu.dot_dimension_numbers<[1], [0], [0], [1], [0, 0, 1, 1], [], []>} : vector<16x64xbf16>, vector<64x128xbf16>, vector<16x128xf32> -> vector<16x128xf32>
    %c0_28 = arith.constant 0 : index
    %c0_29 = arith.constant 0 : index
    %63 = vector.load %arg8[%c0_28, %c0_29] : memref<1x128xf32, #tpu.memory_space<vmem>>, vector<1x128xf32>
    %64 = vector.broadcast %63 : vector<1x128xf32> to vector<16x128xf32>
    %65 = arith.addf %62, %64 : vector<16x128xf32>
    %66 = arith.truncf %60 : vector<8x64xf32> to vector<8x64xbf16>
    %67 = arith.truncf %65 : vector<16x128xf32> to vector<16x128xbf16>
    %68 = vector.extract_strided_slice %66 {offsets = [0, 0], sizes = [8, 8], strides = [1, 1]} : vector<8x64xbf16> to vector<8x8xbf16>
    %69 = vector.extract_strided_slice %67 {offsets = [0, 0], sizes = [16, 8], strides = [1, 1]} : vector<16x128xbf16> to vector<16x8xbf16>
    %70 = vector.extract_strided_slice %67 {offsets = [0, 64], sizes = [16, 8], strides = [1, 1]} : vector<16x128xbf16> to vector<16x8xbf16>
    %cst_30 = arith.constant dense<0.000000e+00> : vector<8x16xf32>
    %71 = tpu.matmul %68, %69, %cst_30 {dimension_numbers = #tpu.dot_dimension_numbers<[1], [1], [0], [0], [0, 0, 1, 0], [], []>} : vector<8x8xbf16>, vector<16x8xbf16>, vector<8x16xf32> -> vector<8x16xf32>
    %cst_31 = arith.constant dense<0xFF800000> : vector<8xf32>
    %72 = vector.multi_reduction <maximumf>, %71, %cst_31 [1] : vector<8x16xf32> to vector<8xf32>
    %73 = vector.shape_cast %72 : vector<8xf32> to vector<8x1xf32>
    %74 = vector.broadcast %73 : vector<8x1xf32> to vector<8x16xf32>
    %75 = arith.subf %71, %74 : vector<8x16xf32>
    %76 = math.exp %75 : vector<8x16xf32>
    %cst_32 = arith.constant dense<0.000000e+00> : vector<8xf32>
    %77 = vector.multi_reduction <add>, %76, %cst_32 [1] : vector<8x16xf32> to vector<8xf32>
    %78 = vector.shape_cast %77 : vector<8xf32> to vector<8x1xf32>
    %79 = tpu.reciprocal %78 {approx = true} : vector<8x1xf32> -> vector<8x1xf32>
    %80 = vector.broadcast %79 : vector<8x1xf32> to vector<8x16xf32>
    %81 = arith.mulf %76, %80 : vector<8x16xf32>
    %82 = arith.truncf %81 : vector<8x16xf32> to vector<8x16xbf16>
    %cst_33 = arith.constant dense<0.000000e+00> : vector<8x8xf32>
    %83 = tpu.matmul %82, %70, %cst_33 {dimension_numbers = #tpu.dot_dimension_numbers<[1], [0], [0], [1], [0, 0, 1, 1], [], []>} : vector<8x16xbf16>, vector<16x8xbf16>, vector<8x8xf32> -> vector<8x8xf32>
    %c0_34 = arith.constant 0 : index
    %c0_35 = arith.constant 0 : index
    %84 = vector.load %arg12[%c0_34, %c0_35] : memref<8x64xf32, #tpu.memory_space<vmem>>, vector<8x8xf32>
    tpu.vector_store %arg12[%c0_34, %c0_35], %83 {strides = array<i32>} : memref<8x64xf32, #tpu.memory_space<vmem>>, vector<8x8xf32>,
    %85 = vector.extract_strided_slice %66 {offsets = [0, 8], sizes = [8, 8], strides = [1, 1]} : vector<8x64xbf16> to vector<8x8xbf16>
    %86 = vector.extract_strided_slice %67 {offsets = [0, 8], sizes = [16, 8], strides = [1, 1]} : vector<16x128xbf16> to vector<16x8xbf16>
    %87 = vector.extract_strided_slice %67 {offsets = [0, 72], sizes = [16, 8], strides = [1, 1]} : vector<16x128xbf16> to vector<16x8xbf16>
    %cst_36 = arith.constant dense<0.000000e+00> : vector<8x16xf32>
    %88 = tpu.matmul %85, %86, %cst_36 {dimension_numbers = #tpu.dot_dimension_numbers<[1], [1], [0], [0], [0, 0, 1, 0], [], []>} : vector<8x8xbf16>, vector<16x8xbf16>, vector<8x16xf32> -> vector<8x16xf32>
    %cst_37 = arith.constant dense<0xFF800000> : vector<8xf32>
    %89 = vector.multi_reduction <maximumf>, %88, %cst_37 [1] : vector<8x16xf32> to vector<8xf32>
    %90 = vector.shape_cast %89 : vector<8xf32> to vector<8x1xf32>
    %91 = vector.broadcast %90 : vector<8x1xf32> to vector<8x16xf32>
    %92 = arith.subf %88, %91 : vector<8x16xf32>
    %93 = math.exp %92 : vector<8x16xf32>
    %cst_38 = arith.constant dense<0.000000e+00> : vector<8xf32>
    %94 = vector.multi_reduction <add>, %93, %cst_38 [1] : vector<8x16xf32> to vector<8xf32>
    %95 = vector.shape_cast %94 : vector<8xf32> to vector<8x1xf32>
    %96 = tpu.reciprocal %95 {approx = true} : vector<8x1xf32> -> vector<8x1xf32>
    %97 = vector.broadcast %96 : vector<8x1xf32> to vector<8x16xf32>
    %98 = arith.mulf %93, %97 : vector<8x16xf32>
    %99 = arith.truncf %98 : vector<8x16xf32> to vector<8x16xbf16>
    %cst_39 = arith.constant dense<0.000000e+00> : vector<8x8xf32>
    %100 = tpu.matmul %99, %87, %cst_39 {dimension_numbers = #tpu.dot_dimension_numbers<[1], [0], [0], [1], [0, 0, 1, 1], [], []>} : vector<8x16xbf16>, vector<16x8xbf16>, vector<8x8xf32> -> vector<8x8xf32>
    %c0_40 = arith.constant 0 : index
    %c8 = arith.constant 8 : index
    %101 = vector.load %arg12[%c0_40, %c8] : memref<8x64xf32, #tpu.memory_space<vmem>>, vector<8x8xf32>
    tpu.vector_store %arg12[%c0_40, %c8], %100 {strides = array<i32>} : memref<8x64xf32, #tpu.memory_space<vmem>>, vector<8x8xf32>,
    %102 = vector.extract_strided_slice %66 {offsets = [0, 16], sizes = [8, 8], strides = [1, 1]} : vector<8x64xbf16> to vector<8x8xbf16>
    %103 = vector.extract_strided_slice %67 {offsets = [0, 16], sizes = [16, 8], strides = [1, 1]} : vector<16x128xbf16> to vector<16x8xbf16>
    %104 = vector.extract_strided_slice %67 {offsets = [0, 80], sizes = [16, 8], strides = [1, 1]} : vector<16x128xbf16> to vector<16x8xbf16>
    %cst_41 = arith.constant dense<0.000000e+00> : vector<8x16xf32>
    %105 = tpu.matmul %102, %103, %cst_41 {dimension_numbers = #tpu.dot_dimension_numbers<[1], [1], [0], [0], [0, 0, 1, 0], [], []>} : vector<8x8xbf16>, vector<16x8xbf16>, vector<8x16xf32> -> vector<8x16xf32>
    %cst_42 = arith.constant dense<0xFF800000> : vector<8xf32>
    %106 = vector.multi_reduction <maximumf>, %105, %cst_42 [1] : vector<8x16xf32> to vector<8xf32>
    %107 = vector.shape_cast %106 : vector<8xf32> to vector<8x1xf32>
    %108 = vector.broadcast %107 : vector<8x1xf32> to vector<8x16xf32>
    %109 = arith.subf %105, %108 : vector<8x16xf32>
    %110 = math.exp %109 : vector<8x16xf32>
    %cst_43 = arith.constant dense<0.000000e+00> : vector<8xf32>
    %111 = vector.multi_reduction <add>, %110, %cst_43 [1] : vector<8x16xf32> to vector<8xf32>
    %112 = vector.shape_cast %111 : vector<8xf32> to vector<8x1xf32>
    %113 = tpu.reciprocal %112 {approx = true} : vector<8x1xf32> -> vector<8x1xf32>
    %114 = vector.broadcast %113 : vector<8x1xf32> to vector<8x16xf32>
    %115 = arith.mulf %110, %114 : vector<8x16xf32>
    %116 = arith.truncf %115 : vector<8x16xf32> to vector<8x16xbf16>
    %cst_44 = arith.constant dense<0.000000e+00> : vector<8x8xf32>
    %117 = tpu.matmul %116, %104, %cst_44 {dimension_numbers = #tpu.dot_dimension_numbers<[1], [0], [0], [1], [0, 0, 1, 1], [], []>} : vector<8x16xbf16>, vector<16x8xbf16>, vector<8x8xf32> -> vector<8x8xf32>
    %c0_45 = arith.constant 0 : index
    %c16 = arith.constant 16 : index
    %118 = vector.load %arg12[%c0_45, %c16] : memref<8x64xf32, #tpu.memory_space<vmem>>, vector<8x8xf32>
    tpu.vector_store %arg12[%c0_45, %c16], %117 {strides = array<i32>} : memref<8x64xf32, #tpu.memory_space<vmem>>, vector<8x8xf32>,
    %119 = vector.extract_strided_slice %66 {offsets = [0, 24], sizes = [8, 8], strides = [1, 1]} : vector<8x64xbf16> to vector<8x8xbf16>
    %120 = vector.extract_strided_slice %67 {offsets = [0, 24], sizes = [16, 8], strides = [1, 1]} : vector<16x128xbf16> to vector<16x8xbf16>
    %121 = vector.extract_strided_slice %67 {offsets = [0, 88], sizes = [16, 8], strides = [1, 1]} : vector<16x128xbf16> to vector<16x8xbf16>
    %cst_46 = arith.constant dense<0.000000e+00> : vector<8x16xf32>
    %122 = tpu.matmul %119, %120, %cst_46 {dimension_numbers = #tpu.dot_dimension_numbers<[1], [1], [0], [0], [0, 0, 1, 0], [], []>} : vector<8x8xbf16>, vector<16x8xbf16>, vector<8x16xf32> -> vector<8x16xf32>
    %cst_47 = arith.constant dense<0xFF800000> : vector<8xf32>
    %123 = vector.multi_reduction <maximumf>, %122, %cst_47 [1] : vector<8x16xf32> to vector<8xf32>
    %124 = vector.shape_cast %123 : vector<8xf32> to vector<8x1xf32>
    %125 = vector.broadcast %124 : vector<8x1xf32> to vector<8x16xf32>
    %126 = arith.subf %122, %125 : vector<8x16xf32>
    %127 = math.exp %126 : vector<8x16xf32>
    %cst_48 = arith.constant dense<0.000000e+00> : vector<8xf32>
    %128 = vector.multi_reduction <add>, %127, %cst_48 [1] : vector<8x16xf32> to vector<8xf32>
    %129 = vector.shape_cast %128 : vector<8xf32> to vector<8x1xf32>
    %130 = tpu.reciprocal %129 {approx = true} : vector<8x1xf32> -> vector<8x1xf32>
    %131 = vector.broadcast %130 : vector<8x1xf32> to vector<8x16xf32>
    %132 = arith.mulf %127, %131 : vector<8x16xf32>
    %133 = arith.truncf %132 : vector<8x16xf32> to vector<8x16xbf16>
    %cst_49 = arith.constant dense<0.000000e+00> : vector<8x8xf32>
    %134 = tpu.matmul %133, %121, %cst_49 {dimension_numbers = #tpu.dot_dimension_numbers<[1], [0], [0], [1], [0, 0, 1, 1], [], []>} : vector<8x16xbf16>, vector<16x8xbf16>, vector<8x8xf32> -> vector<8x8xf32>
    %c0_50 = arith.constant 0 : index
    %c24 = arith.constant 24 : index
    %135 = vector.load %arg12[%c0_50, %c24] : memref<8x64xf32, #tpu.memory_space<vmem>>, vector<8x8xf32>
    tpu.vector_store %arg12[%c0_50, %c24], %134 {strides = array<i32>} : memref<8x64xf32, #tpu.memory_space<vmem>>, vector<8x8xf32>,
    %136 = vector.extract_strided_slice %66 {offsets = [0, 32], sizes = [8, 8], strides = [1, 1]} : vector<8x64xbf16> to vector<8x8xbf16>
    %137 = vector.extract_strided_slice %67 {offsets = [0, 32], sizes = [16, 8], strides = [1, 1]} : vector<16x128xbf16> to vector<16x8xbf16>
    %138 = vector.extract_strided_slice %67 {offsets = [0, 96], sizes = [16, 8], strides = [1, 1]} : vector<16x128xbf16> to vector<16x8xbf16>
    %cst_51 = arith.constant dense<0.000000e+00> : vector<8x16xf32>
    %139 = tpu.matmul %136, %137, %cst_51 {dimension_numbers = #tpu.dot_dimension_numbers<[1], [1], [0], [0], [0, 0, 1, 0], [], []>} : vector<8x8xbf16>, vector<16x8xbf16>, vector<8x16xf32> -> vector<8x16xf32>
    %cst_52 = arith.constant dense<0xFF800000> : vector<8xf32>
    %140 = vector.multi_reduction <maximumf>, %139, %cst_52 [1] : vector<8x16xf32> to vector<8xf32>
    %141 = vector.shape_cast %140 : vector<8xf32> to vector<8x1xf32>
    %142 = vector.broadcast %141 : vector<8x1xf32> to vector<8x16xf32>
    %143 = arith.subf %139, %142 : vector<8x16xf32>
    %144 = math.exp %143 : vector<8x16xf32>
    %cst_53 = arith.constant dense<0.000000e+00> : vector<8xf32>
    %145 = vector.multi_reduction <add>, %144, %cst_53 [1] : vector<8x16xf32> to vector<8xf32>
    %146 = vector.shape_cast %145 : vector<8xf32> to vector<8x1xf32>
    %147 = tpu.reciprocal %146 {approx = true} : vector<8x1xf32> -> vector<8x1xf32>
    %148 = vector.broadcast %147 : vector<8x1xf32> to vector<8x16xf32>
    %149 = arith.mulf %144, %148 : vector<8x16xf32>
    %150 = arith.truncf %149 : vector<8x16xf32> to vector<8x16xbf16>
    %cst_54 = arith.constant dense<0.000000e+00> : vector<8x8xf32>
    %151 = tpu.matmul %150, %138, %cst_54 {dimension_numbers = #tpu.dot_dimension_numbers<[1], [0], [0], [1], [0, 0, 1, 1], [], []>} : vector<8x16xbf16>, vector<16x8xbf16>, vector<8x8xf32> -> vector<8x8xf32>
    %c0_55 = arith.constant 0 : index
    %c32 = arith.constant 32 : index
    %152 = vector.load %arg12[%c0_55, %c32] : memref<8x64xf32, #tpu.memory_space<vmem>>, vector<8x8xf32>
    tpu.vector_store %arg12[%c0_55, %c32], %151 {strides = array<i32>} : memref<8x64xf32, #tpu.memory_space<vmem>>, vector<8x8xf32>,
    %153 = vector.extract_strided_slice %66 {offsets = [0, 40], sizes = [8, 8], strides = [1, 1]} : vector<8x64xbf16> to vector<8x8xbf16>
    %154 = vector.extract_strided_slice %67 {offsets = [0, 40], sizes = [16, 8], strides = [1, 1]} : vector<16x128xbf16> to vector<16x8xbf16>
    %155 = vector.extract_strided_slice %67 {offsets = [0, 104], sizes = [16, 8], strides = [1, 1]} : vector<16x128xbf16> to vector<16x8xbf16>
    %cst_56 = arith.constant dense<0.000000e+00> : vector<8x16xf32>
    %156 = tpu.matmul %153, %154, %cst_56 {dimension_numbers = #tpu.dot_dimension_numbers<[1], [1], [0], [0], [0, 0, 1, 0], [], []>} : vector<8x8xbf16>, vector<16x8xbf16>, vector<8x16xf32> -> vector<8x16xf32>
    %cst_57 = arith.constant dense<0xFF800000> : vector<8xf32>
    %157 = vector.multi_reduction <maximumf>, %156, %cst_57 [1] : vector<8x16xf32> to vector<8xf32>
    %158 = vector.shape_cast %157 : vector<8xf32> to vector<8x1xf32>
    %159 = vector.broadcast %158 : vector<8x1xf32> to vector<8x16xf32>
    %160 = arith.subf %156, %159 : vector<8x16xf32>
    %161 = math.exp %160 : vector<8x16xf32>
    %cst_58 = arith.constant dense<0.000000e+00> : vector<8xf32>
    %162 = vector.multi_reduction <add>, %161, %cst_58 [1] : vector<8x16xf32> to vector<8xf32>
    %163 = vector.shape_cast %162 : vector<8xf32> to vector<8x1xf32>
    %164 = tpu.reciprocal %163 {approx = true} : vector<8x1xf32> -> vector<8x1xf32>
    %165 = vector.broadcast %164 : vector<8x1xf32> to vector<8x16xf32>
    %166 = arith.mulf %161, %165 : vector<8x16xf32>
    %167 = arith.truncf %166 : vector<8x16xf32> to vector<8x16xbf16>
    %cst_59 = arith.constant dense<0.000000e+00> : vector<8x8xf32>
    %168 = tpu.matmul %167, %155, %cst_59 {dimension_numbers = #tpu.dot_dimension_numbers<[1], [0], [0], [1], [0, 0, 1, 1], [], []>} : vector<8x16xbf16>, vector<16x8xbf16>, vector<8x8xf32> -> vector<8x8xf32>
    %c0_60 = arith.constant 0 : index
    %c40 = arith.constant 40 : index
    %169 = vector.load %arg12[%c0_60, %c40] : memref<8x64xf32, #tpu.memory_space<vmem>>, vector<8x8xf32>
    tpu.vector_store %arg12[%c0_60, %c40], %168 {strides = array<i32>} : memref<8x64xf32, #tpu.memory_space<vmem>>, vector<8x8xf32>,
    %170 = vector.extract_strided_slice %66 {offsets = [0, 48], sizes = [8, 8], strides = [1, 1]} : vector<8x64xbf16> to vector<8x8xbf16>
    %171 = vector.extract_strided_slice %67 {offsets = [0, 48], sizes = [16, 8], strides = [1, 1]} : vector<16x128xbf16> to vector<16x8xbf16>
    %172 = vector.extract_strided_slice %67 {offsets = [0, 112], sizes = [16, 8], strides = [1, 1]} : vector<16x128xbf16> to vector<16x8xbf16>
    %cst_61 = arith.constant dense<0.000000e+00> : vector<8x16xf32>
    %173 = tpu.matmul %170, %171, %cst_61 {dimension_numbers = #tpu.dot_dimension_numbers<[1], [1], [0], [0], [0, 0, 1, 0], [], []>} : vector<8x8xbf16>, vector<16x8xbf16>, vector<8x16xf32> -> vector<8x16xf32>
    %cst_62 = arith.constant dense<0xFF800000> : vector<8xf32>
    %174 = vector.multi_reduction <maximumf>, %173, %cst_62 [1] : vector<8x16xf32> to vector<8xf32>
    %175 = vector.shape_cast %174 : vector<8xf32> to vector<8x1xf32>
    %176 = vector.broadcast %175 : vector<8x1xf32> to vector<8x16xf32>
    %177 = arith.subf %173, %176 : vector<8x16xf32>
    %178 = math.exp %177 : vector<8x16xf32>
    %cst_63 = arith.constant dense<0.000000e+00> : vector<8xf32>
    %179 = vector.multi_reduction <add>, %178, %cst_63 [1] : vector<8x16xf32> to vector<8xf32>
    %180 = vector.shape_cast %179 : vector<8xf32> to vector<8x1xf32>
    %181 = tpu.reciprocal %180 {approx = true} : vector<8x1xf32> -> vector<8x1xf32>
    %182 = vector.broadcast %181 : vector<8x1xf32> to vector<8x16xf32>
    %183 = arith.mulf %178, %182 : vector<8x16xf32>
    %184 = arith.truncf %183 : vector<8x16xf32> to vector<8x16xbf16>
    %cst_64 = arith.constant dense<0.000000e+00> : vector<8x8xf32>
    %185 = tpu.matmul %184, %172, %cst_64 {dimension_numbers = #tpu.dot_dimension_numbers<[1], [0], [0], [1], [0, 0, 1, 1], [], []>} : vector<8x16xbf16>, vector<16x8xbf16>, vector<8x8xf32> -> vector<8x8xf32>
    %c0_65 = arith.constant 0 : index
    %c48 = arith.constant 48 : index
    %186 = vector.load %arg12[%c0_65, %c48] : memref<8x64xf32, #tpu.memory_space<vmem>>, vector<8x8xf32>
    tpu.vector_store %arg12[%c0_65, %c48], %185 {strides = array<i32>} : memref<8x64xf32, #tpu.memory_space<vmem>>, vector<8x8xf32>,
    %187 = vector.extract_strided_slice %66 {offsets = [0, 56], sizes = [8, 8], strides = [1, 1]} : vector<8x64xbf16> to vector<8x8xbf16>
    %188 = vector.extract_strided_slice %67 {offsets = [0, 56], sizes = [16, 8], strides = [1, 1]} : vector<16x128xbf16> to vector<16x8xbf16>
    %189 = vector.extract_strided_slice %67 {offsets = [0, 120], sizes = [16, 8], strides = [1, 1]} : vector<16x128xbf16> to vector<16x8xbf16>
    %cst_66 = arith.constant dense<0.000000e+00> : vector<8x16xf32>
    %190 = tpu.matmul %187, %188, %cst_66 {dimension_numbers = #tpu.dot_dimension_numbers<[1], [1], [0], [0], [0, 0, 1, 0], [], []>} : vector<8x8xbf16>, vector<16x8xbf16>, vector<8x16xf32> -> vector<8x16xf32>
    %cst_67 = arith.constant dense<0xFF800000> : vector<8xf32>
    %191 = vector.multi_reduction <maximumf>, %190, %cst_67 [1] : vector<8x16xf32> to vector<8xf32>
    %192 = vector.shape_cast %191 : vector<8xf32> to vector<8x1xf32>
    %193 = vector.broadcast %192 : vector<8x1xf32> to vector<8x16xf32>
    %194 = arith.subf %190, %193 : vector<8x16xf32>
    %195 = math.exp %194 : vector<8x16xf32>
    %cst_68 = arith.constant dense<0.000000e+00> : vector<8xf32>
    %196 = vector.multi_reduction <add>, %195, %cst_68 [1] : vector<8x16xf32> to vector<8xf32>
    %197 = vector.shape_cast %196 : vector<8xf32> to vector<8x1xf32>
    %198 = tpu.reciprocal %197 {approx = true} : vector<8x1xf32> -> vector<8x1xf32>
    %199 = vector.broadcast %198 : vector<8x1xf32> to vector<8x16xf32>
    %200 = arith.mulf %195, %199 : vector<8x16xf32>
    %201 = arith.truncf %200 : vector<8x16xf32> to vector<8x16xbf16>
    %cst_69 = arith.constant dense<0.000000e+00> : vector<8x8xf32>
    %202 = tpu.matmul %201, %189, %cst_69 {dimension_numbers = #tpu.dot_dimension_numbers<[1], [0], [0], [1], [0, 0, 1, 1], [], []>} : vector<8x16xbf16>, vector<16x8xbf16>, vector<8x8xf32> -> vector<8x8xf32>
    %c0_70 = arith.constant 0 : index
    %c56 = arith.constant 56 : index
    %203 = vector.load %arg12[%c0_70, %c56] : memref<8x64xf32, #tpu.memory_space<vmem>>, vector<8x8xf32>
    tpu.vector_store %arg12[%c0_70, %c56], %202 {strides = array<i32>} : memref<8x64xf32, #tpu.memory_space<vmem>>, vector<8x8xf32>,
    %c0_71 = arith.constant 0 : index
    %c0_72 = arith.constant 0 : index
    %204 = vector.load %arg12[%c0_71, %c0_72] : memref<8x64xf32, #tpu.memory_space<vmem>>, vector<8x64xf32>
    %205 = arith.truncf %204 : vector<8x64xf32> to vector<8x64xbf16>
    %c0_73 = arith.constant 0 : index
    %c0_74 = arith.constant 0 : index
    %206 = vector.load %arg9[%c0_73, %c0_74] : memref<64x64xbf16, #tpu.memory_space<vmem>>, vector<64x64xbf16>
    %cst_75 = arith.constant dense<0.000000e+00> : vector<8x64xf32>
    %207 = tpu.matmul %205, %206, %cst_75 {dimension_numbers = #tpu.dot_dimension_numbers<[1], [0], [0], [1], [0, 0, 1, 1], [], []>} : vector<8x64xbf16>, vector<64x64xbf16>, vector<8x64xf32> -> vector<8x64xf32>
    %c0_76 = arith.constant 0 : index
    %c0_77 = arith.constant 0 : index
    %208 = vector.load %arg10[%c0_76, %c0_77] : memref<1x64xf32, #tpu.memory_space<vmem>>, vector<1x64xf32>
    %209 = vector.broadcast %208 : vector<1x64xf32> to vector<8x64xf32>
    %210 = arith.addf %207, %209 : vector<8x64xf32>
    %211 = vector.shape_cast %210 : vector<8x64xf32> to vector<1x8x64xf32>
    %c0_78 = arith.constant 0 : index
    %c0_79 = arith.constant 0 : index
    %c0_80 = arith.constant 0 : index
    %212 = vector.load %arg11[%c0_78, %c0_79, %c0_80] : memref<1x8x64xf32, #tpu.memory_space<vmem>>, vector<1x8x64xf32>
    tpu.vector_store %arg11[%c0_78, %c0_79, %c0_80], %211 {strides = array<i32>} : memref<1x8x64xf32, #tpu.memory_space<vmem>>, vector<1x8x64xf32>,
    return
  }
  func.func @transform_0(%arg0: i32) -> (i32, i32, i32) {
    %c0_i32 = arith.constant 0 : i32
    %c0_i32_0 = arith.constant 0 : i32
    %c0_i32_1 = arith.constant 0 : i32
    return %arg0, %c0_i32, %c0_i32_0 : i32, i32, i32
  }
  func.func @transform_1(%arg0: i32) -> (i32, i32, i32) {
    %c0_i32 = arith.constant 0 : i32
    %c0_i32_0 = arith.constant 0 : i32
    %c0_i32_1 = arith.constant 0 : i32
    return %arg0, %c0_i32, %c0_i32_0 : i32, i32, i32
  }
  func.func @transform_2(%arg0: i32) -> (i32, i32) {
    %c0_i32 = arith.constant 0 : i32
    %c0_i32_0 = arith.constant 0 : i32
    %c0_i32_1 = arith.constant 0 : i32
    return %c0_i32, %c0_i32_0 : i32, i32
  }
  func.func @transform_3(%arg0: i32) -> (i32, i32) {
    %c0_i32 = arith.constant 0 : i32
    %c0_i32_0 = arith.constant 0 : i32
    %c0_i32_1 = arith.constant 0 : i32
    return %c0_i32, %c0_i32_0 : i32, i32
  }
  func.func @transform_4(%arg0: i32) -> (i32, i32) {
    %c0_i32 = arith.constant 0 : i32
    %c0_i32_0 = arith.constant 0 : i32
    %c0_i32_1 = arith.constant 0 : i32
    return %c0_i32, %c0_i32_0 : i32, i32
  }
  func.func @transform_5(%arg0: i32) -> (i32, i32) {
    %c0_i32 = arith.constant 0 : i32
    %c0_i32_0 = arith.constant 0 : i32
    %c0_i32_1 = arith.constant 0 : i32
    return %c0_i32, %c0_i32_0 : i32, i32
  }
  func.func @transform_6(%arg0: i32) -> (i32, i32) {
    %c0_i32 = arith.constant 0 : i32
    %c0_i32_0 = arith.constant 0 : i32
    %c0_i32_1 = arith.constant 0 : i32
    return %c0_i32, %c0_i32_0 : i32, i32
  }
  func.func @transform_7(%arg0: i32) -> (i32, i32) {
    %c0_i32 = arith.constant 0 : i32
    %c0_i32_0 = arith.constant 0 : i32
    %c0_i32_1 = arith.constant 0 : i32
    return %c0_i32, %c0_i32_0 : i32, i32
  }
  func.func @transform_8(%arg0: i32) -> (i32, i32) {
    %c0_i32 = arith.constant 0 : i32
    %c0_i32_0 = arith.constant 0 : i32
    %c0_i32_1 = arith.constant 0 : i32
    return %c0_i32, %c0_i32_0 : i32, i32
  }
  func.func @transform_9(%arg0: i32) -> (i32, i32) {
    %c0_i32 = arith.constant 0 : i32
    %c0_i32_0 = arith.constant 0 : i32
    %c0_i32_1 = arith.constant 0 : i32
    return %c0_i32, %c0_i32_0 : i32, i32
  }
  func.func @transform_10(%arg0: i32) -> (i32, i32, i32) {
    %c0_i32 = arith.constant 0 : i32
    %c0_i32_0 = arith.constant 0 : i32
    %c0_i32_1 = arith.constant 0 : i32
    return %arg0, %c0_i32, %c0_i32_0 : i32, i32, i32
  }
}

module attributes {stable_mosaic.version = 11 : i64} {
  func.func @cross_attn_kernel(%arg0: i32, %arg1: memref<1x8x64xf32, #tpu.memory_space<vmem>>, %arg2: memref<1x16x64xf32, #tpu.memory_space<vmem>>, %arg3: memref<1x64xf32, #tpu.memory_space<vmem>>, %arg4: memref<1x64xf32, #tpu.memory_space<vmem>>, %arg5: memref<64x64xbf16, #tpu.memory_space<vmem>>, %arg6: memref<1x64xf32, #tpu.memory_space<vmem>>, %arg7: memref<64x128xbf16, #tpu.memory_space<vmem>>, %arg8: memref<1x128xf32, #tpu.memory_space<vmem>>, %arg9: memref<64x64xbf16, #tpu.memory_space<vmem>>, %arg10: memref<1x64xf32, #tpu.memory_space<vmem>>, %arg11: memref<1x8x64xf32, #tpu.memory_space<vmem>>, %arg12: memref<8x64xf32, #tpu.memory_space<vmem>>) attributes {dimension_semantics = [#tpu.dimension_semantics<parallel>], iteration_bounds = array<i64: 2>, scalar_prefetch = 0 : i64, scratch_operands = 1 : i64, tpu.core_type = #tpu.core_type<tc>, window_params = [{transform_indices = @transform_0, window_bounds = array<i64: 1, 8, 64>}, {transform_indices = @transform_1, window_bounds = array<i64: 1, 16, 64>}, {pipeline_mode = #tpu.pipeline_mode<synchronous>, transform_indices = @transform_2, window_bounds = array<i64: 1, 64>}, {pipeline_mode = #tpu.pipeline_mode<synchronous>, transform_indices = @transform_3, window_bounds = array<i64: 1, 64>}, {pipeline_mode = #tpu.pipeline_mode<synchronous>, transform_indices = @transform_4, window_bounds = array<i64: 64, 64>}, {pipeline_mode = #tpu.pipeline_mode<synchronous>, transform_indices = @transform_5, window_bounds = array<i64: 1, 64>}, {pipeline_mode = #tpu.pipeline_mode<synchronous>, transform_indices = @transform_6, window_bounds = array<i64: 64, 128>}, {pipeline_mode = #tpu.pipeline_mode<synchronous>, transform_indices = @transform_7, window_bounds = array<i64: 1, 128>}, {pipeline_mode = #tpu.pipeline_mode<synchronous>, transform_indices = @transform_8, window_bounds = array<i64: 64, 64>}, {pipeline_mode = #tpu.pipeline_mode<synchronous>, transform_indices = @transform_9, window_bounds = array<i64: 1, 64>}, {transform_indices = @transform_10, window_bounds = array<i64: 1, 8, 64>}]} {
    %c0 = arith.constant 0 : index
    %c0_0 = arith.constant 0 : index
    %0 = vector.load %arg3[%c0, %c0_0] : memref<1x64xf32, #tpu.memory_space<vmem>>, vector<1x64xf32>
    %c0_1 = arith.constant 0 : index
    %c0_2 = arith.constant 0 : index
    %1 = vector.load %arg4[%c0_1, %c0_2] : memref<1x64xf32, #tpu.memory_space<vmem>>, vector<1x64xf32>
    %c0_3 = arith.constant 0 : index
    %c0_4 = arith.constant 0 : index
    %c0_5 = arith.constant 0 : index
    %2 = vector.load %arg1[%c0_3, %c0_4, %c0_5] : memref<1x8x64xf32, #tpu.memory_space<vmem>>, vector<1x8x64xf32>
    %3 = vector.shape_cast %2 : vector<1x8x64xf32> to vector<8x64xf32>
    %c0_6 = arith.constant 0 : index
    %c0_7 = arith.constant 0 : index
    %c0_8 = arith.constant 0 : index
    %4 = vector.load %arg2[%c0_6, %c0_7, %c0_8] : memref<1x16x64xf32, #tpu.memory_space<vmem>>, vector<1x16x64xf32>
    %5 = vector.shape_cast %4 : vector<1x16x64xf32> to vector<16x64xf32>
    %cst = arith.constant dense<0.000000e+00> : vector<8xf32>
    %6 = vector.multi_reduction <add>, %3, %cst [1] : vector<8x64xf32> to vector<8xf32>
    %7 = vector.shape_cast %6 : vector<8xf32> to vector<8x1xf32>
    %cst_9 = arith.constant 6.400000e+01 : f32
    %8 = vector.broadcast %cst_9 : f32 to vector<8x1xf32>
    %9 = arith.divf %7, %8 : vector<8x1xf32>
    %10 = arith.mulf %3, %3 : vector<8x64xf32>
    %cst_10 = arith.constant dense<0.000000e+00> : vector<8xf32>
    %11 = vector.multi_reduction <add>, %10, %cst_10 [1] : vector<8x64xf32> to vector<8xf32>
    %12 = vector.shape_cast %11 : vector<8xf32> to vector<8x1xf32>
    %cst_11 = arith.constant 6.400000e+01 : f32
    %13 = vector.broadcast %cst_11 : f32 to vector<8x1xf32>
    %14 = arith.divf %12, %13 : vector<8x1xf32>
    %15 = arith.mulf %9, %9 : vector<8x1xf32>
    %16 = arith.subf %14, %15 : vector<8x1xf32>
    %cst_12 = arith.constant 0.000000e+00 : f32
    %17 = vector.broadcast %cst_12 : f32 to vector<8x1xf32>
    %18 = arith.maximumf %16, %17 : vector<8x1xf32>
    %19 = vector.broadcast %9 : vector<8x1xf32> to vector<8x64xf32>
    %20 = arith.subf %3, %19 : vector<8x64xf32>
    %cst_13 = arith.constant 9.99999997E-7 : f32
    %21 = vector.broadcast %cst_13 : f32 to vector<8x1xf32>
    %22 = arith.addf %18, %21 : vector<8x1xf32>
    %23 = math.rsqrt %22 : vector<8x1xf32>
    %24 = vector.broadcast %23 : vector<8x1xf32> to vector<8x64xf32>
    %25 = arith.mulf %20, %24 : vector<8x64xf32>
    %26 = vector.broadcast %0 : vector<1x64xf32> to vector<8x64xf32>
    %27 = arith.mulf %25, %26 : vector<8x64xf32>
    %28 = vector.broadcast %1 : vector<1x64xf32> to vector<8x64xf32>
    %29 = arith.addf %27, %28 : vector<8x64xf32>
    %30 = arith.truncf %29 : vector<8x64xf32> to vector<8x64xbf16>
    %cst_14 = arith.constant dense<0.000000e+00> : vector<16xf32>
    %31 = vector.multi_reduction <add>, %5, %cst_14 [1] : vector<16x64xf32> to vector<16xf32>
    %32 = vector.shape_cast %31 : vector<16xf32> to vector<16x1xf32>
    %cst_15 = arith.constant 6.400000e+01 : f32
    %33 = vector.broadcast %cst_15 : f32 to vector<16x1xf32>
    %34 = arith.divf %32, %33 : vector<16x1xf32>
    %35 = arith.mulf %5, %5 : vector<16x64xf32>
    %cst_16 = arith.constant dense<0.000000e+00> : vector<16xf32>
    %36 = vector.multi_reduction <add>, %35, %cst_16 [1] : vector<16x64xf32> to vector<16xf32>
    %37 = vector.shape_cast %36 : vector<16xf32> to vector<16x1xf32>
    %cst_17 = arith.constant 6.400000e+01 : f32
    %38 = vector.broadcast %cst_17 : f32 to vector<16x1xf32>
    %39 = arith.divf %37, %38 : vector<16x1xf32>
    %40 = arith.mulf %34, %34 : vector<16x1xf32>
    %41 = arith.subf %39, %40 : vector<16x1xf32>
    %cst_18 = arith.constant 0.000000e+00 : f32
    %42 = vector.broadcast %cst_18 : f32 to vector<16x1xf32>
    %43 = arith.maximumf %41, %42 : vector<16x1xf32>
    %44 = vector.broadcast %34 : vector<16x1xf32> to vector<16x64xf32>
    %45 = arith.subf %5, %44 : vector<16x64xf32>
    %cst_19 = arith.constant 9.99999997E-7 : f32
    %46 = vector.broadcast %cst_19 : f32 to vector<16x1xf32>
    %47 = arith.addf %43, %46 : vector<16x1xf32>
    %48 = math.rsqrt %47 : vector<16x1xf32>
    %49 = vector.broadcast %48 : vector<16x1xf32> to vector<16x64xf32>
    %50 = arith.mulf %45, %49 : vector<16x64xf32>
    %51 = vector.broadcast %0 : vector<1x64xf32> to vector<16x64xf32>
    %52 = arith.mulf %50, %51 : vector<16x64xf32>
    %53 = vector.broadcast %1 : vector<1x64xf32> to vector<16x64xf32>
    %54 = arith.addf %52, %53 : vector<16x64xf32>
    %55 = arith.truncf %54 : vector<16x64xf32> to vector<16x64xbf16>
    %c0_20 = arith.constant 0 : index
    %c0_21 = arith.constant 0 : index
    %56 = vector.load %arg5[%c0_20, %c0_21] : memref<64x64xbf16, #tpu.memory_space<vmem>>, vector<64x64xbf16>
    %cst_22 = arith.constant dense<0.000000e+00> : vector<8x64xf32>
    %57 = tpu.matmul %30, %56, %cst_22 {dimension_numbers = #tpu.dot_dimension_numbers<[1], [0], [0], [1], [0, 0, 1, 1], [], []>} : vector<8x64xbf16>, vector<64x64xbf16>, vector<8x64xf32> -> vector<8x64xf32>
    %c0_23 = arith.constant 0 : index
    %c0_24 = arith.constant 0 : index
    %58 = vector.load %arg6[%c0_23, %c0_24] : memref<1x64xf32, #tpu.memory_space<vmem>>, vector<1x64xf32>
    %59 = vector.broadcast %58 : vector<1x64xf32> to vector<8x64xf32>
    %60 = arith.addf %57, %59 : vector<8x64xf32>
    %c0_25 = arith.constant 0 : index
    %c0_26 = arith.constant 0 : index
    %61 = vector.load %arg7[%c0_25, %c0_26] : memref<64x128xbf16, #tpu.memory_space<vmem>>, vector<64x128xbf16>
    %cst_27 = arith.constant dense<0.000000e+00> : vector<16x128xf32>
    %62 = tpu.matmul %55, %61, %cst_27 {dimension_numbers = #tpu.dot_dimension_numbers<[1], [0], [0], [1], [0, 0, 1, 1], [], []>} : vector<16x64xbf16>, vector<64x128xbf16>, vector<16x128xf32> -> vector<16x128xf32>
    %c0_28 = arith.constant 0 : index
    %c0_29 = arith.constant 0 : index
    %63 = vector.load %arg8[%c0_28, %c0_29] : memref<1x128xf32, #tpu.memory_space<vmem>>, vector<1x128xf32>
    %64 = vector.broadcast %63 : vector<1x128xf32> to vector<16x128xf32>
    %65 = arith.addf %62, %64 : vector<16x128xf32>
    %66 = arith.truncf %60 : vector<8x64xf32> to vector<8x64xbf16>
    %67 = arith.truncf %65 : vector<16x128xf32> to vector<16x128xbf16>
    %68 = vector.extract_strided_slice %66 {offsets = [0, 0], sizes = [8, 8], strides = [1, 1]} : vector<8x64xbf16> to vector<8x8xbf16>
    %69 = vector.extract_strided_slice %67 {offsets = [0, 0], sizes = [16, 8], strides = [1, 1]} : vector<16x128xbf16> to vector<16x8xbf16>
    %70 = vector.extract_strided_slice %67 {offsets = [0, 64], sizes = [16, 8], strides = [1, 1]} : vector<16x128xbf16> to vector<16x8xbf16>
    %cst_30 = arith.constant dense<0.000000e+00> : vector<8x16xf32>
    %71 = tpu.matmul %68, %69, %cst_30 {dimension_numbers = #tpu.dot_dimension_numbers<[1], [1], [0], [0], [0, 0, 1, 0], [], []>} : vector<8x8xbf16>, vector<16x8xbf16>, vector<8x16xf32> -> vector<8x16xf32>
    %cst_31 = arith.constant dense<0xFF800000> : vector<8xf32>
    %72 = vector.multi_reduction <maximumf>, %71, %cst_31 [1] : vector<8x16xf32> to vector<8xf32>
    %73 = vector.shape_cast %72 : vector<8xf32> to vector<8x1xf32>
    %74 = vector.broadcast %73 : vector<8x1xf32> to vector<8x16xf32>
    %75 = arith.subf %71, %74 : vector<8x16xf32>
    %76 = math.exp %75 : vector<8x16xf32>
    %cst_32 = arith.constant dense<0.000000e+00> : vector<8xf32>
    %77 = vector.multi_reduction <add>, %76, %cst_32 [1] : vector<8x16xf32> to vector<8xf32>
    %78 = vector.shape_cast %77 : vector<8xf32> to vector<8x1xf32>
    %79 = tpu.reciprocal %78 {approx = true} : vector<8x1xf32> -> vector<8x1xf32>
    %80 = vector.broadcast %79 : vector<8x1xf32> to vector<8x16xf32>
    %81 = arith.mulf %76, %80 : vector<8x16xf32>
    %82 = arith.truncf %81 : vector<8x16xf32> to vector<8x16xbf16>
    %cst_33 = arith.constant dense<0.000000e+00> : vector<8x8xf32>
    %83 = tpu.matmul %82, %70, %cst_33 {dimension_numbers = #tpu.dot_dimension_numbers<[1], [0], [0], [1], [0, 0, 1, 1], [], []>} : vector<8x16xbf16>, vector<16x8xbf16>, vector<8x8xf32> -> vector<8x8xf32>
    %c0_34 = arith.constant 0 : index
    %c0_35 = arith.constant 0 : index
    %84 = vector.load %arg12[%c0_34, %c0_35] : memref<8x64xf32, #tpu.memory_space<vmem>>, vector<8x8xf32>
    tpu.vector_store %arg12[%c0_34, %c0_35], %83 {strides = array<i32>} : memref<8x64xf32, #tpu.memory_space<vmem>>, vector<8x8xf32>,
    %85 = vector.extract_strided_slice %66 {offsets = [0, 8], sizes = [8, 8], strides = [1, 1]} : vector<8x64xbf16> to vector<8x8xbf16>
    %86 = vector.extract_strided_slice %67 {offsets = [0, 8], sizes = [16, 8], strides = [1, 1]} : vector<16x128xbf16> to vector<16x8xbf16>
    %87 = vector.extract_strided_slice %67 {offsets = [0, 72], sizes = [16, 8], strides = [1, 1]} : vector<16x128xbf16> to vector<16x8xbf16>
    %cst_36 = arith.constant dense<0.000000e+00> : vector<8x16xf32>
    %88 = tpu.matmul %85, %86, %cst_36 {dimension_numbers = #tpu.dot_dimension_numbers<[1], [1], [0], [0], [0, 0, 1, 0], [], []>} : vector<8x8xbf16>, vector<16x8xbf16>, vector<8x16xf32> -> vector<8x16xf32>
    %cst_37 = arith.constant dense<0xFF800000> : vector<8xf32>
    %89 = vector.multi_reduction <maximumf>, %88, %cst_37 [1] : vector<8x16xf32> to vector<8xf32>
    %90 = vector.shape_cast %89 : vector<8xf32> to vector<8x1xf32>
    %91 = vector.broadcast %90 : vector<8x1xf32> to vector<8x16xf32>
    %92 = arith.subf %88, %91 : vector<8x16xf32>
    %93 = math.exp %92 : vector<8x16xf32>
    %cst_38 = arith.constant dense<0.000000e+00> : vector<8xf32>
    %94 = vector.multi_reduction <add>, %93, %cst_38 [1] : vector<8x16xf32> to vector<8xf32>
    %95 = vector.shape_cast %94 : vector<8xf32> to vector<8x1xf32>
    %96 = tpu.reciprocal %95 {approx = true} : vector<8x1xf32> -> vector<8x1xf32>
    %97 = vector.broadcast %96 : vector<8x1xf32> to vector<8x16xf32>
    %98 = arith.mulf %93, %97 : vector<8x16xf32>
    %99 = arith.truncf %98 : vector<8x16xf32> to vector<8x16xbf16>
    %cst_39 = arith.constant dense<0.000000e+00> : vector<8x8xf32>
    %100 = tpu.matmul %99, %87, %cst_39 {dimension_numbers = #tpu.dot_dimension_numbers<[1], [0], [0], [1], [0, 0, 1, 1], [], []>} : vector<8x16xbf16>, vector<16x8xbf16>, vector<8x8xf32> -> vector<8x8xf32>
    %c0_40 = arith.constant 0 : index
    %c8 = arith.constant 8 : index
    %101 = vector.load %arg12[%c0_40, %c8] : memref<8x64xf32, #tpu.memory_space<vmem>>, vector<8x8xf32>
    tpu.vector_store %arg12[%c0_40, %c8], %100 {strides = array<i32>} : memref<8x64xf32, #tpu.memory_space<vmem>>, vector<8x8xf32>,
    %102 = vector.extract_strided_slice %66 {offsets = [0, 16], sizes = [8, 8], strides = [1, 1]} : vector<8x64xbf16> to vector<8x8xbf16>
    %103 = vector.extract_strided_slice %67 {offsets = [0, 16], sizes = [16, 8], strides = [1, 1]} : vector<16x128xbf16> to vector<16x8xbf16>
    %104 = vector.extract_strided_slice %67 {offsets = [0, 80], sizes = [16, 8], strides = [1, 1]} : vector<16x128xbf16> to vector<16x8xbf16>
    %cst_41 = arith.constant dense<0.000000e+00> : vector<8x16xf32>
    %105 = tpu.matmul %102, %103, %cst_41 {dimension_numbers = #tpu.dot_dimension_numbers<[1], [1], [0], [0], [0, 0, 1, 0], [], []>} : vector<8x8xbf16>, vector<16x8xbf16>, vector<8x16xf32> -> vector<8x16xf32>
    %cst_42 = arith.constant dense<0xFF800000> : vector<8xf32>
    %106 = vector.multi_reduction <maximumf>, %105, %cst_42 [1] : vector<8x16xf32> to vector<8xf32>
    %107 = vector.shape_cast %106 : vector<8xf32> to vector<8x1xf32>
    %108 = vector.broadcast %107 : vector<8x1xf32> to vector<8x16xf32>
    %109 = arith.subf %105, %108 : vector<8x16xf32>
    %110 = math.exp %109 : vector<8x16xf32>
    %cst_43 = arith.constant dense<0.000000e+00> : vector<8xf32>
    %111 = vector.multi_reduction <add>, %110, %cst_43 [1] : vector<8x16xf32> to vector<8xf32>
    %112 = vector.shape_cast %111 : vector<8xf32> to vector<8x1xf32>
    %113 = tpu.reciprocal %112 {approx = true} : vector<8x1xf32> -> vector<8x1xf32>
    %114 = vector.broadcast %113 : vector<8x1xf32> to vector<8x16xf32>
    %115 = arith.mulf %110, %114 : vector<8x16xf32>
    %116 = arith.truncf %115 : vector<8x16xf32> to vector<8x16xbf16>
    %cst_44 = arith.constant dense<0.000000e+00> : vector<8x8xf32>
    %117 = tpu.matmul %116, %104, %cst_44 {dimension_numbers = #tpu.dot_dimension_numbers<[1], [0], [0], [1], [0, 0, 1, 1], [], []>} : vector<8x16xbf16>, vector<16x8xbf16>, vector<8x8xf32> -> vector<8x8xf32>
    %c0_45 = arith.constant 0 : index
    %c16 = arith.constant 16 : index
    %118 = vector.load %arg12[%c0_45, %c16] : memref<8x64xf32, #tpu.memory_space<vmem>>, vector<8x8xf32>
    tpu.vector_store %arg12[%c0_45, %c16], %117 {strides = array<i32>} : memref<8x64xf32, #tpu.memory_space<vmem>>, vector<8x8xf32>,
    %119 = vector.extract_strided_slice %66 {offsets = [0, 24], sizes = [8, 8], strides = [1, 1]} : vector<8x64xbf16> to vector<8x8xbf16>
    %120 = vector.extract_strided_slice %67 {offsets = [0, 24], sizes = [16, 8], strides = [1, 1]} : vector<16x128xbf16> to vector<16x8xbf16>
    %121 = vector.extract_strided_slice %67 {offsets = [0, 88], sizes = [16, 8], strides = [1, 1]} : vector<16x128xbf16> to vector<16x8xbf16>
    %cst_46 = arith.constant dense<0.000000e+00> : vector<8x16xf32>
    %122 = tpu.matmul %119, %120, %cst_46 {dimension_numbers = #tpu.dot_dimension_numbers<[1], [1], [0], [0], [0, 0, 1, 0], [], []>} : vector<8x8xbf16>, vector<16x8xbf16>, vector<8x16xf32> -> vector<8x16xf32>
    %cst_47 = arith.constant dense<0xFF800000> : vector<8xf32>
    %123 = vector.multi_reduction <maximumf>, %122, %cst_47 [1] : vector<8x16xf32> to vector<8xf32>
    %124 = vector.shape_cast %123 : vector<8xf32> to vector<8x1xf32>
    %125 = vector.broadcast %124 : vector<8x1xf32> to vector<8x16xf32>
    %126 = arith.subf %122, %125 : vector<8x16xf32>
    %127 = math.exp %126 : vector<8x16xf32>
    %cst_48 = arith.constant dense<0.000000e+00> : vector<8xf32>
    %128 = vector.multi_reduction <add>, %127, %cst_48 [1] : vector<8x16xf32> to vector<8xf32>
    %129 = vector.shape_cast %128 : vector<8xf32> to vector<8x1xf32>
    %130 = tpu.reciprocal %129 {approx = true} : vector<8x1xf32> -> vector<8x1xf32>
    %131 = vector.broadcast %130 : vector<8x1xf32> to vector<8x16xf32>
    %132 = arith.mulf %127, %131 : vector<8x16xf32>
    %133 = arith.truncf %132 : vector<8x16xf32> to vector<8x16xbf16>
    %cst_49 = arith.constant dense<0.000000e+00> : vector<8x8xf32>
    %134 = tpu.matmul %133, %121, %cst_49 {dimension_numbers = #tpu.dot_dimension_numbers<[1], [0], [0], [1], [0, 0, 1, 1], [], []>} : vector<8x16xbf16>, vector<16x8xbf16>, vector<8x8xf32> -> vector<8x8xf32>
    %c0_50 = arith.constant 0 : index
    %c24 = arith.constant 24 : index
    %135 = vector.load %arg12[%c0_50, %c24] : memref<8x64xf32, #tpu.memory_space<vmem>>, vector<8x8xf32>
    tpu.vector_store %arg12[%c0_50, %c24], %134 {strides = array<i32>} : memref<8x64xf32, #tpu.memory_space<vmem>>, vector<8x8xf32>,
    %136 = vector.extract_strided_slice %66 {offsets = [0, 32], sizes = [8, 8], strides = [1, 1]} : vector<8x64xbf16> to vector<8x8xbf16>
    %137 = vector.extract_strided_slice %67 {offsets = [0, 32], sizes = [16, 8], strides = [1, 1]} : vector<16x128xbf16> to vector<16x8xbf16>
    %138 = vector.extract_strided_slice %67 {offsets = [0, 96], sizes = [16, 8], strides = [1, 1]} : vector<16x128xbf16> to vector<16x8xbf16>
    %cst_51 = arith.constant dense<0.000000e+00> : vector<8x16xf32>
    %139 = tpu.matmul %136, %137, %cst_51 {dimension_numbers = #tpu.dot_dimension_numbers<[1], [1], [0], [0], [0, 0, 1, 0], [], []>} : vector<8x8xbf16>, vector<16x8xbf16>, vector<8x16xf32> -> vector<8x16xf32>
    %cst_52 = arith.constant dense<0xFF800000> : vector<8xf32>
    %140 = vector.multi_reduction <maximumf>, %139, %cst_52 [1] : vector<8x16xf32> to vector<8xf32>
    %141 = vector.shape_cast %140 : vector<8xf32> to vector<8x1xf32>
    %142 = vector.broadcast %141 : vector<8x1xf32> to vector<8x16xf32>
    %143 = arith.subf %139, %142 : vector<8x16xf32>
    %144 = math.exp %143 : vector<8x16xf32>
    %cst_53 = arith.constant dense<0.000000e+00> : vector<8xf32>
    %145 = vector.multi_reduction <add>, %144, %cst_53 [1] : vector<8x16xf32> to vector<8xf32>
    %146 = vector.shape_cast %145 : vector<8xf32> to vector<8x1xf32>
    %147 = tpu.reciprocal %146 {approx = true} : vector<8x1xf32> -> vector<8x1xf32>
    %148 = vector.broadcast %147 : vector<8x1xf32> to vector<8x16xf32>
    %149 = arith.mulf %144, %148 : vector<8x16xf32>
    %150 = arith.truncf %149 : vector<8x16xf32> to vector<8x16xbf16>
    %cst_54 = arith.constant dense<0.000000e+00> : vector<8x8xf32>
    %151 = tpu.matmul %150, %138, %cst_54 {dimension_numbers = #tpu.dot_dimension_numbers<[1], [0], [0], [1], [0, 0, 1, 1], [], []>} : vector<8x16xbf16>, vector<16x8xbf16>, vector<8x8xf32> -> vector<8x8xf32>
    %c0_55 = arith.constant 0 : index
    %c32 = arith.constant 32 : index
    %152 = vector.load %arg12[%c0_55, %c32] : memref<8x64xf32, #tpu.memory_space<vmem>>, vector<8x8xf32>
    tpu.vector_store %arg12[%c0_55, %c32], %151 {strides = array<i32>} : memref<8x64xf32, #tpu.memory_space<vmem>>, vector<8x8xf32>,
    %153 = vector.extract_strided_slice %66 {offsets = [0, 40], sizes = [8, 8], strides = [1, 1]} : vector<8x64xbf16> to vector<8x8xbf16>
    %154 = vector.extract_strided_slice %67 {offsets = [0, 40], sizes = [16, 8], strides = [1, 1]} : vector<16x128xbf16> to vector<16x8xbf16>
    %155 = vector.extract_strided_slice %67 {offsets = [0, 104], sizes = [16, 8], strides = [1, 1]} : vector<16x128xbf16> to vector<16x8xbf16>
    %cst_56 = arith.constant dense<0.000000e+00> : vector<8x16xf32>
    %156 = tpu.matmul %153, %154, %cst_56 {dimension_numbers = #tpu.dot_dimension_numbers<[1], [1], [0], [0], [0, 0, 1, 0], [], []>} : vector<8x8xbf16>, vector<16x8xbf16>, vector<8x16xf32> -> vector<8x16xf32>
    %cst_57 = arith.constant dense<0xFF800000> : vector<8xf32>
    %157 = vector.multi_reduction <maximumf>, %156, %cst_57 [1] : vector<8x16xf32> to vector<8xf32>
    %158 = vector.shape_cast %157 : vector<8xf32> to vector<8x1xf32>
    %159 = vector.broadcast %158 : vector<8x1xf32> to vector<8x16xf32>
    %160 = arith.subf %156, %159 : vector<8x16xf32>
    %161 = math.exp %160 : vector<8x16xf32>
    %cst_58 = arith.constant dense<0.000000e+00> : vector<8xf32>
    %162 = vector.multi_reduction <add>, %161, %cst_58 [1] : vector<8x16xf32> to vector<8xf32>
    %163 = vector.shape_cast %162 : vector<8xf32> to vector<8x1xf32>
    %164 = tpu.reciprocal %163 {approx = true} : vector<8x1xf32> -> vector<8x1xf32>
    %165 = vector.broadcast %164 : vector<8x1xf32> to vector<8x16xf32>
    %166 = arith.mulf %161, %165 : vector<8x16xf32>
    %167 = arith.truncf %166 : vector<8x16xf32> to vector<8x16xbf16>
    %cst_59 = arith.constant dense<0.000000e+00> : vector<8x8xf32>
    %168 = tpu.matmul %167, %155, %cst_59 {dimension_numbers = #tpu.dot_dimension_numbers<[1], [0], [0], [1], [0, 0, 1, 1], [], []>} : vector<8x16xbf16>, vector<16x8xbf16>, vector<8x8xf32> -> vector<8x8xf32>
    %c0_60 = arith.constant 0 : index
    %c40 = arith.constant 40 : index
    %169 = vector.load %arg12[%c0_60, %c40] : memref<8x64xf32, #tpu.memory_space<vmem>>, vector<8x8xf32>
    tpu.vector_store %arg12[%c0_60, %c40], %168 {strides = array<i32>} : memref<8x64xf32, #tpu.memory_space<vmem>>, vector<8x8xf32>,
    %170 = vector.extract_strided_slice %66 {offsets = [0, 48], sizes = [8, 8], strides = [1, 1]} : vector<8x64xbf16> to vector<8x8xbf16>
    %171 = vector.extract_strided_slice %67 {offsets = [0, 48], sizes = [16, 8], strides = [1, 1]} : vector<16x128xbf16> to vector<16x8xbf16>
    %172 = vector.extract_strided_slice %67 {offsets = [0, 112], sizes = [16, 8], strides = [1, 1]} : vector<16x128xbf16> to vector<16x8xbf16>
    %cst_61 = arith.constant dense<0.000000e+00> : vector<8x16xf32>
    %173 = tpu.matmul %170, %171, %cst_61 {dimension_numbers = #tpu.dot_dimension_numbers<[1], [1], [0], [0], [0, 0, 1, 0], [], []>} : vector<8x8xbf16>, vector<16x8xbf16>, vector<8x16xf32> -> vector<8x16xf32>
    %cst_62 = arith.constant dense<0xFF800000> : vector<8xf32>
    %174 = vector.multi_reduction <maximumf>, %173, %cst_62 [1] : vector<8x16xf32> to vector<8xf32>
    %175 = vector.shape_cast %174 : vector<8xf32> to vector<8x1xf32>
    %176 = vector.broadcast %175 : vector<8x1xf32> to vector<8x16xf32>
    %177 = arith.subf %173, %176 : vector<8x16xf32>
    %178 = math.exp %177 : vector<8x16xf32>
    %cst_63 = arith.constant dense<0.000000e+00> : vector<8xf32>
    %179 = vector.multi_reduction <add>, %178, %cst_63 [1] : vector<8x16xf32> to vector<8xf32>
    %180 = vector.shape_cast %179 : vector<8xf32> to vector<8x1xf32>
    %181 = tpu.reciprocal %180 {approx = true} : vector<8x1xf32> -> vector<8x1xf32>
    %182 = vector.broadcast %181 : vector<8x1xf32> to vector<8x16xf32>
    %183 = arith.mulf %178, %182 : vector<8x16xf32>
    %184 = arith.truncf %183 : vector<8x16xf32> to vector<8x16xbf16>
    %cst_64 = arith.constant dense<0.000000e+00> : vector<8x8xf32>
    %185 = tpu.matmul %184, %172, %cst_64 {dimension_numbers = #tpu.dot_dimension_numbers<[1], [0], [0], [1], [0, 0, 1, 1], [], []>} : vector<8x16xbf16>, vector<16x8xbf16>, vector<8x8xf32> -> vector<8x8xf32>
    %c0_65 = arith.constant 0 : index
    %c48 = arith.constant 48 : index
    %186 = vector.load %arg12[%c0_65, %c48] : memref<8x64xf32, #tpu.memory_space<vmem>>, vector<8x8xf32>
    tpu.vector_store %arg12[%c0_65, %c48], %185 {strides = array<i32>} : memref<8x64xf32, #tpu.memory_space<vmem>>, vector<8x8xf32>,
    %187 = vector.extract_strided_slice %66 {offsets = [0, 56], sizes = [8, 8], strides = [1, 1]} : vector<8x64xbf16> to vector<8x8xbf16>
    %188 = vector.extract_strided_slice %67 {offsets = [0, 56], sizes = [16, 8], strides = [1, 1]} : vector<16x128xbf16> to vector<16x8xbf16>
    %189 = vector.extract_strided_slice %67 {offsets = [0, 120], sizes = [16, 8], strides = [1, 1]} : vector<16x128xbf16> to vector<16x8xbf16>
    %cst_66 = arith.constant dense<0.000000e+00> : vector<8x16xf32>
    %190 = tpu.matmul %187, %188, %cst_66 {dimension_numbers = #tpu.dot_dimension_numbers<[1], [1], [0], [0], [0, 0, 1, 0], [], []>} : vector<8x8xbf16>, vector<16x8xbf16>, vector<8x16xf32> -> vector<8x16xf32>
    %cst_67 = arith.constant dense<0xFF800000> : vector<8xf32>
    %191 = vector.multi_reduction <maximumf>, %190, %cst_67 [1] : vector<8x16xf32> to vector<8xf32>
    %192 = vector.shape_cast %191 : vector<8xf32> to vector<8x1xf32>
    %193 = vector.broadcast %192 : vector<8x1xf32> to vector<8x16xf32>
    %194 = arith.subf %190, %193 : vector<8x16xf32>
    %195 = math.exp %194 : vector<8x16xf32>
    %cst_68 = arith.constant dense<0.000000e+00> : vector<8xf32>
    %196 = vector.multi_reduction <add>, %195, %cst_68 [1] : vector<8x16xf32> to vector<8xf32>
    %197 = vector.shape_cast %196 : vector<8xf32> to vector<8x1xf32>
    %198 = tpu.reciprocal %197 {approx = true} : vector<8x1xf32> -> vector<8x1xf32>
    %199 = vector.broadcast %198 : vector<8x1xf32> to vector<8x16xf32>
    %200 = arith.mulf %195, %199 : vector<8x16xf32>
    %201 = arith.truncf %200 : vector<8x16xf32> to vector<8x16xbf16>
    %cst_69 = arith.constant dense<0.000000e+00> : vector<8x8xf32>
    %202 = tpu.matmul %201, %189, %cst_69 {dimension_numbers = #tpu.dot_dimension_numbers<[1], [0], [0], [1], [0, 0, 1, 1], [], []>} : vector<8x16xbf16>, vector<16x8xbf16>, vector<8x8xf32> -> vector<8x8xf32>
    %c0_70 = arith.constant 0 : index
    %c56 = arith.constant 56 : index
    %203 = vector.load %arg12[%c0_70, %c56] : memref<8x64xf32, #tpu.memory_space<vmem>>, vector<8x8xf32>
    tpu.vector_store %arg12[%c0_70, %c56], %202 {strides = array<i32>} : memref<8x64xf32, #tpu.memory_space<vmem>>, vector<8x8xf32>,
    %c0_71 = arith.constant 0 : index
    %c0_72 = arith.constant 0 : index
    %204 = vector.load %arg12[%c0_71, %c0_72] : memref<8x64xf32, #tpu.memory_space<vmem>>, vector<8x64xf32>
    %205 = arith.truncf %204 : vector<8x64xf32> to vector<8x64xbf16>
    %c0_73 = arith.constant 0 : index
    %c0_74 = arith.constant 0 : index
    %206 = vector.load %arg9[%c0_73, %c0_74] : memref<64x64xbf16, #tpu.memory_space<vmem>>, vector<64x64xbf16>
    %cst_75 = arith.constant dense<0.000000e+00> : vector<8x64xf32>
    %207 = tpu.matmul %205, %206, %cst_75 {dimension_numbers = #tpu.dot_dimension_numbers<[1], [0], [0], [1], [0, 0, 1, 1], [], []>} : vector<8x64xbf16>, vector<64x64xbf16>, vector<8x64xf32> -> vector<8x64xf32>
    %c0_76 = arith.constant 0 : index
    %c0_77 = arith.constant 0 : index
    %208 = vector.load %arg10[%c0_76, %c0_77] : memref<1x64xf32, #tpu.memory_space<vmem>>, vector<1x64xf32>
    %209 = vector.broadcast %208 : vector<1x64xf32> to vector<8x64xf32>
    %210 = arith.addf %207, %209 : vector<8x64xf32>
    %211 = vector.shape_cast %210 : vector<8x64xf32> to vector<1x8x64xf32>
    %c0_78 = arith.constant 0 : index
    %c0_79 = arith.constant 0 : index
    %c0_80 = arith.constant 0 : index
    %212 = vector.load %arg11[%c0_78, %c0_79, %c0_80] : memref<1x8x64xf32, #tpu.memory_space<vmem>>, vector<1x8x64xf32>
    tpu.vector_store %arg11[%c0_78, %c0_79, %c0_80], %211 {strides = array<i32>} : memref<1x8x64xf32, #tpu.memory_space<vmem>>, vector<1x8x64xf32>,
    return
  }
  func.func @transform_0(%arg0: i32) -> (i32, i32, i32) {
    %c0_i32 = arith.constant 0 : i32
    %c0_i32_0 = arith.constant 0 : i32
    %c0_i32_1 = arith.constant 0 : i32
    return %arg0, %c0_i32, %c0_i32_0 : i32, i32, i32
  }
  func.func @transform_1(%arg0: i32) -> (i32, i32, i32) {
    %c0_i32 = arith.constant 0 : i32
    %c0_i32_0 = arith.constant 0 : i32
    %c0_i32_1 = arith.constant 0 : i32
    return %arg0, %c0_i32, %c0_i32_0 : i32, i32, i32
  }
  func.func @transform_2(%arg0: i32) -> (i32, i32) {
    %c0_i32 = arith.constant 0 : i32
    %c0_i32_0 = arith.constant 0 : i32
    %c0_i32_1 = arith.constant 0 : i32
    return %c0_i32, %c0_i32_0 : i32, i32
  }
  func.func @transform_3(%arg0: i32) -> (i32, i32) {
    %c0_i32 = arith.constant 0 : i32
    %c0_i32_0 = arith.constant 0 : i32
    %c0_i32_1 = arith.constant 0 : i32
    return %c0_i32, %c0_i32_0 : i32, i32
  }
  func.func @transform_4(%arg0: i32) -> (i32, i32) {
    %c0_i32 = arith.constant 0 : i32
    %c0_i32_0 = arith.constant 0 : i32
    %c0_i32_1 = arith.constant 0 : i32
    return %c0_i32, %c0_i32_0 : i32, i32
  }
  func.func @transform_5(%arg0: i32) -> (i32, i32) {
    %c0_i32 = arith.constant 0 : i32
    %c0_i32_0 = arith.constant 0 : i32
    %c0_i32_1 = arith.constant 0 : i32
    return %c0_i32, %c0_i32_0 : i32, i32
  }
  func.func @transform_6(%arg0: i32) -> (i32, i32) {
    %c0_i32 = arith.constant 0 : i32
    %c0_i32_0 = arith.constant 0 : i32
    %c0_i32_1 = arith.constant 0 : i32
    return %c0_i32, %c0_i32_0 : i32, i32
  }
  func.func @transform_7(%arg0: i32) -> (i32, i32) {
    %c0_i32 = arith.constant 0 : i32
    %c0_i32_0 = arith.constant 0 : i32
    %c0_i32_1 = arith.constant 0 : i32
    return %c0_i32, %c0_i32_0 : i32, i32
  }
  func.func @transform_8(%arg0: i32) -> (i32, i32) {
    %c0_i32 = arith.constant 0 : i32
    %c0_i32_0 = arith.constant 0 : i32
    %c0_i32_1 = arith.constant 0 : i32
    return %c0_i32, %c0_i32_0 : i32, i32
  }
  func.func @transform_9(%arg0: i32) -> (i32, i32) {
    %c0_i32 = arith.constant 0 : i32
    %c0_i32_0 = arith.constant 0 : i32
    %c0_i32_1 = arith.constant 0 : i32
    return %c0_i32, %c0_i32_0 : i32, i32
  }
  func.func @transform_10(%arg0: i32) -> (i32, i32, i32) {
    %c0_i32 = arith.constant 0 : i32
    %c0_i32_0 = arith.constant 0 : i32
    %c0_i32_1 = arith.constant 0 : i32
    return %arg0, %c0_i32, %c0_i32_0 : i32, i32, i32
  }
}

</mosaic_0001>

<bundles_post_ra>
// kernel: tpu_custom_call.1
= control target key start
LH: loop header
LB: loop body
LE: loop exit
PB: predicated region body
PF: predicated region fallthrough
CT: control target
= control target key end

     0   :  { %s2247_s0 = inlined_call_operand.hbm [shape: f32[2,8,64], index: 0, kind: input, shape index: {}]   ;;  %s2248_s1 = inlined_call_operand.hbm [shape: f32[2,16,64], index: 1, kind: input, shape index: {}]   ;;  %s2249_s2 = inlined_call_operand.vmem [shape: f32[1,64], index: 2, kind: input, shape index: {}]   ;;  %s2250_s3 = inlined_call_operand.vmem [shape: f32[1,64], index: 3, kind: input, shape index: {}]   ;;  %s2251_s4 = inlined_call_operand.hbm [shape: bf16[64,64], index: 4, kind: input, shape index: {}]   ;;  %s2252_s5 = inlined_call_operand.vmem [shape: f32[1,64], index: 5, kind: input, shape index: {}]   ;;  %s2253_s6 = inlined_call_operand.hbm [shape: bf16[64,128], index: 6, kind: input, shape index: {}]   ;;  %s2254_s7 = inlined_call_operand.vmem [shape: f32[1,128], index: 7, kind: input, shape index: {}]   ;;  %s2255_s8 = inlined_call_operand.hbm [shape: bf16[64,64], index: 8, kind: input, shape index: {}]   ;;  %s2256_s9 = inlined_call_operand.vmem [shape: f32[1,64], index: 9, kind: input, shape index: {}]   ;;  %s2257_s10 = inlined_call_operand.hbm [shape: f32[2,8,64], index: 10, kind: output, shape index: {}]  }
   0x1   :  { %2263 = sst [smem:[#allocation23_spill]] %s2251_s4 }
   0x2   :  { %2264 = sst [smem:[#allocation24_spill]] %s2253_s6 }
   0x3   :  { %2265 = sst [smem:[#allocation25_spill]] %s2255_s8 }
   0x4   :  { %15 = vsyncpa [#allocation4], 0 }
   0x5   :  { %17 = vsyncpa [#allocation4 + $0x1], 0 }
   0x6   :  { %18 = vsyncpa [#allocation7], 0 }
   0x7   :  { %20 = vsyncpa [#allocation7 + $0x1], 0 }
   0x8   :  { %21 = vsyncpa [#allocation10], 0 }
   0x9   :  { %22 = vsyncpa [#allocation5], 0 }
   0xa   :  { %24 = vsyncpa [#allocation5 + $0x1], 0  ;;  %s1909_s13 = smov 0   ;;  %s1911_s14 = smov 0  }
   0xb   :  { %s1913_s15 = smov 0   ;;  %s1915_s16 = smov 0  }
   0xc LB: > { %2266 = sst [smem:[#allocation18_spill]] %s1817_s13  ;;  %s1933_s20 = sadd.s32 4294967295, %s1829_s16   ;;  %s1829_s16 = sphi %s1915_s16, %s2284_s16   ;;  %s1825_s15 = sphi %s1913_s15, %s2286_s15   ;;  %s1821_s14 = sphi %s1911_s14, %s2288_s14   ;;  %s1817_s13 = sphi %s1909_s13, %s2287_s13  }
   0xd   : > { %2267 = sst [smem:[#allocation19_spill]] %s1825_s15  ;;  %p1353_p0 = scmp.ge.s32.totalorder %s1829_s16, 1 }
   0xe   : > { %s2268_s4 = sld [smem:[#allocation23_spill]]  ;;  %p51_p1 = scmp.eq.s32.totalorder %s1933_s20, 0 }
   0xf   : > { %p281_p2 = scmp.lt.s32.totalorder %s1829_s16, 3  ;;  %s1831_s22 = smov [#allocation8]  }
  0x10   : > { %s300_s23 = sshll.u32 %s1831_s22, 4  ;;  %s2270_s6 = sld [smem:[#allocation24_spill]]  ;;  %s301_s23 = int_to_ptr.vmem [resolvable:$true] %s300_s23 }
  0x11   : > { %p1938_p3 = pnand %p1353_p0, %p281_p2  ;;  %s2272_s8 = sld [smem:[#allocation25_spill]] }
  0x12   : > { %s1832_s11 = smov [#allocation9]   ;;  %s1833_s17 = smov 64  }
  0x13   : > { %p1472_p4 = pneg %p1938_p3  ;;  %s317_s12 = sshll.u32 %s1832_s11, 4  ;;  %s318_s12 = int_to_ptr.vmem [resolvable:$true] %s317_s12 }
  0x14   : > { %s298_s19 = sshll.u32 %s2268_s4, 4  ;;  %s1834_s18 = smov 4   ;;  %s299_s19 = int_to_ptr.hbm [resolvable:$true] %s298_s19 }
  0x15   : > { %p1950_p6 = pnand %p1472_p4, %p51_p1  ;;  %s1835_s22 = smov [#allocation11]  }
  0x16   : > { %s315_s26 = sshll.u32 %s2270_s6, 4  ;;  %s334_s24 = sshll.u32 %s1835_s22, 4  ;;  %s316_s26 = int_to_ptr.hbm [resolvable:$true] %s315_s26  ;;  %s335_s24 = int_to_ptr.vmem [resolvable:$true] %s334_s24 }
  0x17   : > { %s332_s30 = sshll.u32 %s2272_s8, 4  ;;  %s1352_s25 = sadd.s32 4294967294, %s1829_s16   ;;  %s333_s30 = int_to_ptr.hbm [resolvable:$true] %s332_s30 }
  0x18   : > { %1475 = dma.hbm_to_vmem [thread:$0]  (!%p1950_p6), %s299_s19, 512, %s301_s23, [#allocation7], %s1833_s17, %s1833_s17, %s1834_s18  }
  0x19   : > { %1478 = dma.hbm_to_vmem [thread:$0]  (!%p1950_p6), %s316_s26, 512, %s318_s12, [#allocation10], %s1833_s17, %s1833_s17, %s1834_s18  }
  0x1a   : > { %1481 = dma.hbm_to_vmem [thread:$0]  (!%p1950_p6), %s333_s30, 512, %s335_s24, [#allocation10], %s1833_s17, %s1833_s17, %s1834_s18  }
  0x1b   : > { %s1965_s28 = sadd.s32 1, %s1829_s16   ;;  %s37_s29 = sadd.s32 1, %s1825_s15 }
  0x1c   : > { %2273 = sst [smem:[#allocation20_spill]] %s1965_s28  ;;  %s34_s19 = ssub.s32 %s1829_s16, %s1965_s28 }
  0x1d   : > { %p44_p7 = scmp.ne.s32.totalorder %s1825_s15, %s1821_s14  ;;  %p35_p8 = scmp.eq.s32.totalorder %s34_s19, 0 }
  0x1e   : > { %p45_p9 = scmp.eq.s32.totalorder %s1829_s16, 0  ;;  %p50_p10 = scmp.ne.s32.totalorder %s1821_s14, %s1817_s13 }
  0x1f   : > { %p268_p11 = scmp.eq.s32.totalorder %s1933_s20, 1  ;;  %p274_p2 = scmp.eq.s32.totalorder %s1352_s25, 1 }
  0x20   : > { %s1977_s23 = scalar_select %p35_p8, %s1825_s15, %s37_s29  }
  0x21   : > { %p1979_p12 = por %p45_p9, %p44_p7  ;;  %p1985_p13 = por %p51_p1, %p50_p10 }
  0x22   : > { %2274 = sst [smem:[#allocation21_spill]] %s1977_s23  ;;  %p1989_p0 = por %p268_p11, %p44_p7 }
  0x23   : > { %p1496_p4 = scmp.lt.s32.totalorder %s1829_s16, 2  ;;  %s1995_s11 = sand.u32 1, %s1825_s15  }
  0x24   : > { %p1997_p6 = por %p274_p2, %p50_p10  ;;  %s1358_s17 = sshll.u32 %s1995_s11, 3 }
  0x25   : > { %s1359_s18 = sshll.u32 %s1829_s16, 3  ;;  %s355_s4 = scalar_lea.vmem [#allocation3], %s1358_s17 }
  0x26   : > { %s2278_s12 = scalar_select %p1997_p6, 1, 0 }
  0x27   : > { %s359_s29 = scalar_lea.hbm %s2247_s0, %s1359_s18  ;;  %s363_s6 = sshll.u32 %s355_s4, 4  ;;  %s364_s6 = int_to_ptr.vmem [resolvable:$true] %s363_s6 }
  0x28   : > { %2279 = sst [smem:[#allocation22_spill]] %s2278_s12  ;;  %s361_s19 = sshll.u32 %s359_s29, 4  ;;  %s362_s19 = int_to_ptr.hbm [resolvable:$true] %s361_s19 }
  0x29   : > { %p2008_p7 = pnand %p1496_p4, %p1979_p12  ;;  %s1360_s8 = sshll.u32 %s1995_s11, 4 }
  0x2a   : > { %s370_s23 = sand.u32 1, %s1829_s16   ;;  %s374_s15 = scalar_lea.vmem [#allocation6], %s1360_s8 }
  0x2b   : > { %s382_s28 = sshll.u32 %s374_s15, 4  ;;  %s352_s12 = scalar_lea.sflag [#allocation4], %s1995_s11  ;;  %s383_s28 = int_to_ptr.vmem [resolvable:$true] %s382_s28 }
  0x2c   : > { %s1691_s13 = sshra.s32 %s362_s19, 4  ;;  %p1695_p9 = pneg %p2008_p7  ;;  %s1692_s13 = int_to_ptr.hbm [resolvable:$true] %s1691_s13 }
  0x2d   : > { %s1693_s18 = scalar_lea.hbm %s1692_s13, 8  ;;  %s1698_s17 = scalar_lea.hbm %s2247_s0, 16 }
  0x2e   : > { %p1694_p8 = scmp.ne.s32.totalorder %s1692_s13, %s1693_s18  ;;  %p1699_p12 = scmp.lt.s32.totalorder %s1692_s13, %s2247_s0 }
  0x2f   : > { %p1700_p2 = scmp.lt.s32.totalorder %s1698_s17, %s1693_s18 }
  0x30   : > { %p1696_p10 = pnand %p1695_p9, %p1694_p8 }
  0x31   : > { %p1701_p4 = por %p1700_p2, %p1699_p12 }
  0x32   : > { %p1697_p11 = pneg %p1696_p10 }
  0x34   : > { %p1702_p5 = pnand %p1701_p4, %p1697_p11 }
  0x36   : > { %1705 = shalt.err (!%p1702_p5)
}
  0x37   : > { %1485 = dma.hbm_to_vmem [thread:$0]  (!%p2008_p7), %s362_s19, 128, %s364_s6, %s352_s12  }
  0x38   : > { %s1441_s8 = sshll.u32 %s1829_s16, 4  ;;  %s371_s26 = scalar_lea.sflag [#allocation7], %s370_s23 }
  0x39   : > { %s379_s29 = scalar_lea.hbm %s2248_s1, %s1441_s8  ;;  %s1728_s6 = scalar_lea.hbm %s2248_s1, 32 }
  0x3a   : > { %s380_s4 = sshll.u32 %s379_s29, 4  ;;  %s381_s4 = int_to_ptr.hbm [resolvable:$true] %s380_s4 }
  0x3b   : > { %s1721_s22 = sshra.s32 %s381_s4, 4  ;;  %s1722_s22 = int_to_ptr.hbm [resolvable:$true] %s1721_s22 }
  0x3c   : > { %s1723_s13 = scalar_lea.hbm %s1722_s22, 16  ;;  %p1729_p11 = scmp.lt.s32.totalorder %s1722_s22, %s2248_s1 }
  0x3d   : > { %p1724_p8 = scmp.ne.s32.totalorder %s1722_s22, %s1723_s13  ;;  %p1730_p12 = scmp.lt.s32.totalorder %s1728_s6, %s1723_s13 }
  0x3f   : > { %p1726_p5 = pnand %p1724_p8, %p1695_p9  ;;  %p1731_p2 = por %p1730_p12, %p1729_p11 }
  0x41   : > { %p1727_p10 = pneg %p1726_p5 }
  0x43   : > { %p1732_p4 = pnand %p1731_p2, %p1727_p10 }
  0x45   : > { %1735 = shalt.err (!%p1732_p4)
}
  0x46   : > { %s1836_s23 = smov 128   ;;  %s1837_s24 = smov 8  }
  0x47   : > { %1488 = dma.hbm_to_vmem [thread:$0]  (!%p2008_p7), %s381_s4, 256, %s383_s28, %s371_s26, %s1836_s23, %s1836_s23, %s1837_s24  }
  0x48   : > { %394 = sbr.rel (%p1938_p3) target bundleno = 1662 (0x67e), region = 60  ;;  %s2046_s8 = sand.u32 (!%p1938_p3), 1, %s1821_s14  }
  0x49   : > { %s1364_s15 = sshll.u32 (!%p1938_p3), %s2046_s8, 3  ;;  %s397_s11 = scalar_lea.sflag (!%p1938_p3), [#allocation4], %s2046_s8 }
  0x4a   : > { %s400_s29 = scalar_lea.vmem (!%p1938_p3), [#allocation3], %s1364_s15 }
  0x4d   : > { %1796 = dma.done.wait (%p1985_p13), %s397_s11, 128  }
  0x4e   : > { %1798 = vsyncadd (%p1985_p13), %s397_s11, 4294967168  ;;  %s406_s21 = sand.u32 1, %s1933_s20   ;;  %s1365_s28 = sshll.u32 %s2046_s8, 4 }
  0x4f   : > { %s407_s25 = scalar_lea.sflag [#allocation7], %s406_s21  ;;  %s410_s4 = scalar_lea.vmem [#allocation6], %s1365_s28 }
  0x50   : > { %1800 = dma.done.wait (%p1985_p13), %s407_s25, 256  }
  0x51   : > { %1802 = vsyncadd (%p1985_p13), %s407_s25, 4294967040 }
  0x52   : > { %1804 = dma.done.wait (%p51_p1), [#allocation7], 512  }
  0x53   : > { %1806 = vsyncadd (%p51_p1), [#allocation7], 4294966784 }
  0x54   : > { %1808 = dma.done.wait (%p51_p1), [#allocation10], 1024  }
  0x55   : > { %1810 = vsyncadd (%p51_p1), [#allocation10], 4294966272  ;;  %vm474_vm0 = vcmask 523264   ;;  %v2070_v0 = vld [vmem:[%s410_s4] sm:$0xff]  ;;  %v2072_v1 = vld [vmem:[%s400_s29] sm:$0xff]  ;;  %v1838_v12 = vmov 64.0  }
  0x56   : > { %v516_v2 = vsel %vm474_vm0, %v2070_v0, 0.0  ;;  %v475_v3 = vsel %vm474_vm0, %v2072_v1, 0.0  ;;  %v524_v4 = vmul.f32 %v2070_v0, %v2070_v0  ;;  %v2080_v5 = vld [vmem:[%s410_s4 + $0x8] sm:$0xff]  ;;  %v486_v7 = vmul.f32 %v2072_v1, %v2072_v1  ;;  %v1444_v21 = vld [vmem:[#allocation8 + $0x10] sm:$0xff]  ;;  %v1442_v32 = vld [vmem:[#allocation8] sm:$0xff]  ;;  %s1839_s19 = smov 64  }
  0x57   : > { %517 = vadd.xlane.f32.xlu0 %v516_v2  ;;  %476 = vadd.xlane.f32.xlu2 %v475_v3  ;;  %v525_v8 = vmul.f32 %v2080_v5, %v2080_v5  ;;  %v519_v9 = vsel %vm474_vm0, %v2080_v5, 0.0  ;;  %1561 = vrcp.f32 %v1838_v12  ;;  %v1445_v18 = vld [vmem:[#allocation8 + $0x18] sm:$0xff]  ;;  %v1448_v25 = vld [vmem:[#allocation9 + $0x10] sm:$0xff]  ;;  %v1443_v27 = vld [vmem:[#allocation8 + $0x8] sm:$0xff]  ;;  %vm684_vm11 = vcmask 64512   ;;  %s1840_s23 = smov 104  }
  0x58   : > { %v526_v6 = vsel %vm474_vm0, %v524_v4, 0.0  ;;  %v487_v10 = vsel %vm474_vm0, %v486_v7, 0.0  ;;  %614 = vmatpush.bf16.msra.mxu0 %v1445_v18  ;;  %v1449_v19 = vld [vmem:[#allocation9 + $0x18] sm:$0xff]  ;;  %v1447_v30 = vld [vmem:[#allocation9 + $0x8] sm:$0xff]  ;;  %v1446_v35 = vld [vmem:[#allocation9] sm:$0xff]  ;;  %s1841_s24 = smov 112  }
  0x59   : > { %527 = vadd.xlane.f32.xlu1 %v526_v6  ;;  %v529_v11 = vsel %vm474_vm0, %v525_v8, 0.0  ;;  %666 = vmatpush.bf16.msra.mxu1 %v1449_v19  ;;  %s1842_s11 = smov 88   ;;  %s1843_s29 = smov 96   ;;  %vm704_vm12 = vcmask 130048   ;;  %vm798_vm13 = vcmask 130112   ;;  %vm858_vm14 = vcmask 195712  }
  0x5a   : > { %s1844_s21 = smov 80   ;;  %s1845_s28 = smov 120   ;;  %vm918_vm15 = vcmask 261312  }
  0x5b   : > { %s1846_s25 = smov 72   ;;  %s1847_s4 = smov 40  }
  0x5c   : > { %615 = vmatpush.bf16.msra.mxu0 %v1444_v21  ;;  %s1848_s27 = smov 24   ;;  %s1849_s26 = smov 48  }
  0x5d   : > { %v1562_v13 = vpop.eup %1561  ;;  %667 = vmatpush.bf16.msra.mxu1 %v1448_v25  ;;  %s1850_s22 = smov 56   ;;  %s1851_s13 = smov 16  }
  0x5e   : > { %v479_v14 = vmul.f32 64.0, %v1562_v13  ;;  %vm483_vm1 = vweird.f32 %v1562_v13  ;;  %s1852_s18 = smov 8   ;;  %s1853_s17 = smov 32  }
  0x5f   : > { %520 = vadd.xlane.f32.xlu0 %v519_v9  ;;  %488 = vadd.xlane.f32.xlu2 %v487_v10  ;;  %v1556_v10 = vld [vmem:[%s2249_s2] ss:$0 sm:$0xff]  ;;  %s1438_s6 = sshll.u32 %s1933_s20, 3  ;;  %s1216_s20 = scalar_lea.sflag [#allocation5], %s2046_s8 }
  0x60   : > { %v480_v15 = vsub.f32 1.0, %v479_v14  ;;  %616 = vmatpush.bf16.msra.mxu0 %v1443_v27 }
  0x61   : > { %530 = vadd.xlane.f32.xlu1 %v529_v11  ;;  %668 = vmatpush.bf16.msra.mxu1 %v1447_v30 }
  0x62   : > { %v481_v16 = vmul.f32 %v1562_v13, %v480_v15 }
  0x64   : > { %v482_v17 = vadd.f32 %v1562_v13, %v481_v16  ;;  %617 = vmatpush.bf16.msra.mxu0 %v1442_v32 }
  0x65   : > { %669 = vmatpush.bf16.msra.mxu1 %v1446_v35  ;;  %v1558_v35 = vld [vmem:[%s2252_s5] ss:$0 sm:$0xff] }
  0x66   : > { %v484_v20 = vsel %vm483_vm1, %v1562_v13, %v482_v17  ;;  %v1557_v17 = vld [vmem:[%s2250_s3] ss:$0 sm:$0xff]  ;;  %vm978_vm1 = vcmask 326912  }
  0xca   : > { %v518_v22 = vpop.xlane.xlu0 %517  ;;  %v477_v23 = vpop.xlane.xlu2 %476 }
  0xcb   : > { %v2091_v24 = vmul.f32 %v518_v22, %v484_v20  ;;  %v2095_v29 = vmul.f32 %v484_v20, %v477_v23 }
  0xcc   : > { %v528_v26 = vpop.xlane.xlu1 %527 }
  0xcd   : > { %v534_v28 = vmul.f32 %v2091_v24, %v2091_v24  ;;  %v532_v31 = vmul.f32 %v528_v26, %v484_v20  ;;  %v491_v34 = vmul.f32 %v2095_v29, %v2095_v29  ;;  %v540_v6 = vsub.f32 %v2070_v0, %v2091_v24  ;;  %v1559_v26 = vld [vmem:[%s2254_s7] ss:$0 sm:$0xff] }
  0xce   : > { %v494_v9 = vsub.f32 %v2072_v1, %v2095_v29 }
  0xcf   : > { %v536_v33 = vsub.f32 %v532_v31, %v534_v28 }
  0xd1   : > { %v538_v36 = vmax.f32 %v536_v33, 0.0 }
  0xd2   : > { %v521_v37 = vpop.xlane.xlu0 %520  ;;  %v489_v38 = vpop.xlane.xlu2 %488 }
  0xd3   : > { %v523_v39 = vmul.f32 %v521_v37, %v484_v20  ;;  %v490_v40 = vmul.f32 %v489_v38, %v484_v20  ;;  %v542_v41 = vadd.f32 1e-06, %v538_v36 }
  0xd4   : > { %v531_v42 = vpop.xlane.xlu1 %530 }
  0xd5   : > { %v535_v43 = vmul.f32 %v523_v39, %v523_v39  ;;  %v492_v44 = vsub.f32 %v490_v40, %v491_v34  ;;  %v533_v45 = vmul.f32 %v531_v42, %v484_v20  ;;  %1563 = vrsqrt.f32 %v542_v41 }
  0xd6   : > { %vm550_vm3 = vweird.f32 %v542_v41  ;;  %v541_v14 = vsub.f32 %v2080_v5, %v523_v39 }
  0xd7   : > { %v493_v46 = vmax.f32 %v492_v44, 0.0  ;;  %v537_v47 = vsub.f32 %v533_v45, %v535_v43 }
  0xd9   : > { %v495_v48 = vadd.f32 1e-06, %v493_v46  ;;  %v539_v49 = vmax.f32 %v537_v47, 0.0 }
  0xdb   : > { %1565 = vrsqrt.f32 %v495_v48  ;;  %v543_v50 = vadd.f32 1e-06, %v539_v49  ;;  %v1564_v51 = vpop.eup %1563  ;;  %vm502_vm4 = vweird.f32 %v495_v48 }
  0xdc   : > { %v545_v52 = vmul.f32 %v1564_v51, %v542_v41  ;;  %vm551_vm2 = vweird.f32 %v1564_v51 }
  0xdd   : > { %1567 = vrsqrt.f32 %v543_v50  ;;  %vm552_vm6 = vmor %vm550_vm3, %vm551_vm2  ;;  %vm560_vm9 = vweird.f32 %v543_v50  ;;  %vm1038_vm2 = vcmask 392512   ;;  %vm1098_vm3 = vcmask 458112  }
  0xde   : > { %v546_v53 = vmul.f32 %v1564_v51, %v545_v52 }
  0xe0   : > { %v547_v55 = vmul.f32 0.5, %v546_v53 }
  0xe1   : > { %v1566_v54 = vpop.eup %1565 }
  0xe2   : > { %v497_v56 = vmul.f32 %v1566_v54, %v495_v48  ;;  %v548_v58 = vsub.f32 1.5, %v547_v55  ;;  %vm503_vm5 = vweird.f32 %v1566_v54 }
  0xe3   : > { %v1568_v57 = vpop.eup %1567  ;;  %vm504_vm7 = vmor %vm502_vm4, %vm503_vm5  ;;  %vm1158_vm4 = vcmask 523712  }
  0xe4   : > { %v498_v59 = vmul.f32 %v1566_v54, %v497_v56  ;;  %v555_v60 = vmul.f32 %v1568_v57, %v543_v50  ;;  %v549_v61 = vmul.f32 %v1564_v51, %v548_v58  ;;  %vm561_vm8 = vweird.f32 %v1568_v57 }
  0xe5   : > { %vm562_vm10 = vmor %vm560_vm9, %vm561_vm8 }
  0xe6   : > { %v499_v62 = vmul.f32 0.5, %v498_v59  ;;  %v556_v63 = vmul.f32 %v1568_v57, %v555_v60  ;;  %v553_v4 = vsel %vm552_vm6, %v1564_v51, %v549_v61 }
  0xe7   : > { %v564_v11 = vmul.f32 %v553_v4, %v540_v6 }
  0xe8   : > { %v500_v2 = vsub.f32 1.5, %v499_v62  ;;  %v557_v3 = vmul.f32 0.5, %v556_v63 }
  0xe9   : > { %v566_v1 = vmul.f32 %v1556_v10, %v564_v11 }
  0xea   : > { %v501_v7 = vmul.f32 %v1566_v54, %v500_v2  ;;  %v558_v8 = vsub.f32 1.5, %v557_v3 }
  0xeb   : > { %v568_v22 = vadd.f32 %v1557_v17, %v566_v1 }
  0xec   : > { %v559_v12 = vmul.f32 %v1568_v57, %v558_v8  ;;  %v505_v13 = vsel %vm504_vm7, %v1566_v54, %v501_v7 }
  0xed   : > { %v506_v15 = vmul.f32 %v505_v13, %v494_v9 }
  0xee   : > { %v563_v0 = vsel %vm562_vm10, %v1568_v57, %v559_v12 }
  0xef   : > { %v510_v16 = vmul.f32 %v1556_v10, %v506_v15  ;;  %v565_v18 = vmul.f32 %v563_v0, %v541_v14 }
  0xf1   : > { %v514_v19 = vadd.f32 %v1557_v17, %v510_v16  ;;  %v567_v20 = vmul.f32 %v1556_v10, %v565_v18 }
  0xf3   : > { %v515_v21 = vpack.c.bf16 %v514_v19, %v514_v19  ;;  %v569_v23 = vadd.f32 %v1557_v17, %v567_v20 }
  0xf5   : > { %1386 = vmatmul.msk.bf16.vlgmr.msra.gmra.mxu0 %vm474_vm0, %v515_v21  ;;  %v570_v24 = vpack.c.bf16 %v569_v23, %v568_v22 }
  0xf7   : > { %1403 = vmatmul.msk.bf16.vlgmr.msra.gmra.mxu1 %vm474_vm0, %v570_v24 }
 0x172   : > { %v619_v5 = vpop.f32.mrf.mxu0 }
 0x173   : > { %v620_v38 = vadd.f32 %v1558_v35, %v619_v5 }
 0x174   : > { %v671_v25 = vpop.f32.mrf.mxu1 }
 0x175   : > { %v672_v27 = vadd.f32 %v1559_v26, %v671_v25  ;;  %v676_v39 = vpack.c.bf16 %v620_v38, %v620_v38 }
 0x177   : > { %v677_v30 = vpack.c.bf16 %v672_v27, %v672_v27  ;;  %v738_v40 = vunpack.c.l.b16 %v676_v39 }
 0x179   : > { %v681_v33 = vunpack.c.l.b16 %v677_v30  ;;  %v739_v41 = vpack.c.b16 %v738_v40, %v738_v40 }
 0x17a   : > { %v621_v28 = vpop.f32.mrf.mxu0 }
 0x17c   : > { %v673_v29 = vpop.f32.mrf.mxu1 }
 0x17d   : > { %v674_v31 = vadd.f32 %v1559_v26, %v673_v29 }
 0x17f   : > { %v678_v32 = vpack.c.bf16 %v674_v31, %v674_v31 }
 0x181   : > { %v682_v34 = vunpack.c.l.b16 %v678_v32 }
 0x183   : > { %v2118_v36 = vpack.c.b16 %v682_v34, %v681_v33 }
 0x185   : > { %717 = vrot.lane.b32.xlu2 %v2118_v36, %s1839_s19  ;;  %v689_v37 = vsel %vm684_vm11, %v2118_v36, 0 }
 0x186   : > { %698 = vmatpush.bf16.xpose.msra.mxu2 %v689_v37 }
 0x18d   : > { %862 = vrot.lane.b32.xlu2 %v2118_v36, %s1840_s23  ;;  %1404 = vmatmul.msk.bf16.vlgmr.msra.gmra.mxu2 %vm684_vm11, %v676_v39 }
 0x195   : > { %802 = vrot.lane.b32.xlu2 %v2118_v36, %s1841_s24 }
 0x19d   : > { %980 = vrot.lane.b32.xlu2 %v739_v41, %s1842_s11 }
 0x1a5   : > { %920 = vrot.lane.b32.xlu2 %v739_v41, %s1843_s29 }
 0x1ad   : > { %1040 = vrot.lane.b32.xlu2 %v739_v41, %s1844_s21 }
 0x1df   : > { %v718_v42 = vpop.permute.xlu2 %717 }
 0x1e0   : > { %730 = vmatpush.bf16.msra.mxu3 %v718_v42 }
 0x1e7   : > { %v863_v43 = vpop.permute.xlu2 %862 }
 0x1e8   : > { %v868_v62 = vsel %vm684_vm11, %v863_v43, 0 }
 0x1ef   : > { %v803_v44 = vpop.permute.xlu2 %802 }
 0x1f0   : > { %v808_v45 = vsel %vm684_vm11, %v803_v44, 0 }
 0x1f1   : > { %817 = vmatpush.bf16.xpose.msrb.mxu0 %v808_v45 }
 0x1f7   : > { %v981_v8 = vpop.permute.xlu2 %980 }
 0x1ff   : > { %v921_v15 = vpop.permute.xlu2 %920 }
 0x207   : > { %v1041_v0 = vpop.permute.xlu2 %1040 }
 0x210   : > { %v700_v46 = vpop.f32.mrf.mxu2 }
 0x211   : > { %v705_v47 = vsel %vm704_vm12, %v700_v46, -inf }
 0x212   : > { %706 = vmax.xlane.f32.xlu0 %v705_v47 }
 0x218   : > { %v702_v48 = vpop.f32.mrf.mxu2 }
 0x226   : > { %742 = vrot.lane.b32.xlu0 %v2118_v36, %s1845_s28 }
 0x22e   : > { %860 = vrot.lane.b32.xlu0 %v739_v41, %s1840_s23  ;;  %s1226_s23 = scalar_lea.hbm %s2257_s10, %s1438_s6 }
 0x236   : > { %800 = vrot.lane.b32.xlu0 %v739_v41, %s1841_s24 }
 0x23e   : > { %1102 = vrot.lane.b32.xlu0 %v2118_v36, %s1846_s25 }
 0x246   : > { %1042 = vrot.lane.b32.xlu0 %v2118_v36, %s1844_s21 }
 0x285   : > { %v707_v49 = vpop.xlane.xlu0 %706 }
 0x286   : > { %v708_v50 = vsub.f32 %v700_v46, %v707_v49 }
 0x288   : > { %v709_v51 = vmul.f32 1.442695, %v708_v50 }
 0x28a   : > { %1569 = vpow2.f32 %v709_v51 }
 0x290   : > { %v1570_v52 = vpop.eup %1569 }
 0x291   : > { %v711_v53 = vsel %vm704_vm12, %v1570_v52, 0.0 }
 0x292   : > { %712 = vadd.xlane.f32.xlu1 %v711_v53 }
 0x298   : > { %v743_v54 = vpop.permute.xlu0 %742 }
 0x299   : > { %v748_v55 = vsel %vm684_vm11, %v743_v54, 0 }
 0x29a   : > { %757 = vmatpush.bf16.xpose.msrb.mxu3 %v748_v55 }
 0x2a0   : > { %v861_v56 = vpop.permute.xlu0 %860 }
 0x2a8   : > { %v801_v57 = vpop.permute.xlu0 %800 }
 0x2a9   : > { %1408 = vmatmul.msk.bf16.vlgmr.msrb.gmra.mxu0 %vm684_vm11, %v801_v57 }
 0x2ab   : > { %740 = vrot.lane.b32.xlu1 %v739_v41, %s1845_s28  ;;  %s1230_s28 = sshll.u32 %s1226_s23, 4  ;;  %s1231_s28 = int_to_ptr.hbm [resolvable:$true] %s1230_s28 }
 0x2b0   : > { %v1103_v2 = vpop.permute.xlu0 %1102 }
 0x2b1   : > { %v1108_v14 = vsel %vm684_vm11, %v1103_v2, 0 }
 0x2b3   : > { %982 = vrot.lane.b32.xlu1 %v2118_v36, %s1842_s11 }
 0x2b8   : > { %v1043_v9 = vpop.permute.xlu0 %1042 }
 0x2b9   : > { %v1048_v13 = vsel %vm684_vm11, %v1043_v9, 0 }
 0x2bb   : > { %922 = vrot.lane.b32.xlu1 %v2118_v36, %s1843_s29  ;;  %s467_s29 = scalar_lea.vmem [#allocation12], %s1364_s15  ;;  %s1771_s15 = scalar_lea.hbm %s2257_s10, 16 }
 0x2bc   : > { %s1228_s21 = sshll.u32 %s467_s29, 4  ;;  %s1229_s21 = int_to_ptr.vmem [resolvable:$true] %s1228_s21 }
 0x2c3   : > { %1100 = vrot.lane.b32.xlu1 %v739_v41, %s1846_s25  ;;  %s1765_s25 = sshra.s32 %s1231_s28, 4  ;;  %s1766_s25 = int_to_ptr.hbm [resolvable:$true] %s1765_s25 }
 0x2c4   : > { %p1772_p7 = scmp.lt.s32.totalorder %s1766_s25, %s2257_s10 }
 0x305   : > { %v713_v58 = vpop.xlane.xlu1 %712 }
 0x306   : > { %1571 = vrcp.f32 %v713_v58 }
 0x30c   : > { %v1572_v59 = vpop.eup %1571 }
 0x30d   : > { %v715_v60 = vmul.f32 %v1572_v59, %v1570_v52 }
 0x30f   : > { %v716_v61 = vpack.c.bf16 %v715_v60, %v715_v60 }
 0x311   : > { %1405 = vmatmul.msk.bf16.vlgmr.msra.gmra.mxu3 %vm704_vm12, %v716_v61 }
 0x312   : > { %877 = vmatpush.bf16.xpose.msra.mxu3 %v868_v62 }
 0x31d   : > { %v741_v63 = vpop.permute.xlu1 %740 }
 0x321   : > { %1406 = vmatmul.msk.bf16.vlgmr.msrb.gmra.mxu3 %vm684_vm11, %v741_v63 }
 0x325   : > { %v983_v3 = vpop.permute.xlu1 %982 }
 0x326   : > { %v988_v4 = vsel %vm684_vm11, %v983_v3, 0  ;;  %v819_v6 = vpop.f32.mrf.mxu0 }
 0x327   : > { %997 = vmatpush.bf16.xpose.msrb.mxu3 %v988_v4  ;;  %v823_v7 = vsel %vm704_vm12, %v819_v6, -inf }
 0x328   : > { %824 = vmax.xlane.f32.xlu2 %v823_v7 }
 0x32d   : > { %v923_v10 = vpop.permute.xlu1 %922 }
 0x32e   : > { %v928_v11 = vsel %vm684_vm11, %v923_v10, 0  ;;  %v821_v12 = vpop.f32.mrf.mxu0 }
 0x32f   : > { %937 = vmatpush.bf16.xpose.msra.mxu0 %v928_v11 }
 0x331   : > { %1410 = vmatmul.msk.bf16.vlgmr.msra.gmra.mxu3 %vm684_vm11, %v861_v56 }
 0x332   : > { %1117 = vmatpush.bf16.xpose.msra.mxu3 %v1108_v14 }
 0x335   : > { %v1101_v16 = vpop.permute.xlu1 %1100 }
 0x336   : > { %1412 = vmatmul.msk.bf16.vlgmr.msra.gmra.mxu0 %vm684_vm11, %v921_v15 }
 0x337   : > { %1057 = vmatpush.bf16.xpose.msrb.mxu0 %v1048_v13 }
 0x341   : > { %1414 = vmatmul.msk.bf16.vlgmr.msrb.gmra.mxu3 %vm684_vm11, %v981_v8 }
 0x346   : > { %1416 = vmatmul.msk.bf16.vlgmr.msrb.gmra.mxu0 %vm684_vm11, %v1041_v0 }
 0x351   : > { %1418 = vmatmul.msk.bf16.vlgmr.msra.gmra.mxu3 %vm684_vm11, %v1101_v16 }
 0x394   : > { %v732_v17 = vpop.f32.mrf.mxu3 }
 0x395   : > { %736 = vst.msk [vmem:[#allocation2] sm:$0xff] %vm684_vm11, %v732_v17 }
 0x39b   : > { %v825_v25 = vpop.xlane.xlu2 %824 }
 0x39c   : > { %v734_v18 = vpop.f32.mrf.mxu3  ;;  %v826_v26 = vsub.f32 %v819_v6, %v825_v25 }
 0x39e   : > { %v827_v31 = vmul.f32 1.442695, %v826_v26 }
 0x3a0   : > { %1573 = vpow2.f32 %v827_v31 }
 0x3a4   : > { %v759_v1 = vpop.f32.mrf.mxu3 }
 0x3a5   : > { %v763_v19 = vsel %vm704_vm12, %v759_v1, -inf }
 0x3a6   : > { %764 = vmax.xlane.f32.xlu1 %v763_v19  ;;  %v1574_v35 = vpop.eup %1573 }
 0x3a7   : > { %v829_v38 = vsel %vm704_vm12, %v1574_v35, 0.0 }
 0x3ac   : > { %v761_v20 = vpop.f32.mrf.mxu3 }
 0x3b3   : > { %v939_v21 = vpop.f32.mrf.mxu0 }
 0x3b4   : > { %v879_v22 = vpop.f32.mrf.mxu3  ;;  %v943_v23 = vsel %vm704_vm12, %v939_v21, -inf }
 0x3b5   : > { %944 = vmax.xlane.f32.xlu0 %v943_v23  ;;  %v883_v34 = vsel %vm704_vm12, %v879_v22, -inf }
 0x3bb   : > { %v941_v24 = vpop.f32.mrf.mxu0 }
 0x3bc   : > { %v881_v5 = vpop.f32.mrf.mxu3 }
 0x3c3   : > { %v1059_v27 = vpop.f32.mrf.mxu0 }
 0x3c4   : > { %v999_v28 = vpop.f32.mrf.mxu3  ;;  %v1063_v29 = vsel %vm704_vm12, %v1059_v27, -inf }
 0x3c5   : > { %1064 = vmax.xlane.f32.xlu0 %v1063_v29  ;;  %v1003_v30 = vsel %vm704_vm12, %v999_v28, -inf }
 0x3c6   : > { %1004 = vmax.xlane.f32.xlu1 %v1003_v30 }
 0x3cb   : > { %v1061_v32 = vpop.f32.mrf.mxu0 }
 0x3cc   : > { %v1001_v33 = vpop.f32.mrf.mxu3 }
 0x3cd   : > { %884 = vmax.xlane.f32.xlu0 %v883_v34 }
 0x3d4   : > { %v2159_v37 = vpop.f32.mrf.mxu3 }
 0x3d5   : > { %830 = vadd.xlane.f32.xlu0 %v829_v38  ;;  %v1123_v39 = vsel %vm704_vm12, %v2159_v37, -inf }
 0x3d6   : > { %1124 = vmax.xlane.f32.xlu2 %v1123_v39 }
 0x3dc   : > { %v1121_v40 = vpop.f32.mrf.mxu3 }
 0x3df   : > { %895 = vrot.lane.b32.xlu1 %v2118_v36, %s1847_s4 }
 0x3e7   : > { %1015 = vrot.lane.b32.xlu1 %v2118_v36, %s1848_s27 }
 0x3e9   : > { %835 = vrot.lane.b32.xlu0 %v2118_v36, %s1849_s26 }
 0x3ee   : > { %775 = vrot.lane.b32.xlu2 %v2118_v36, %s1850_s22 }
 0x419   : > { %v765_v41 = vpop.xlane.xlu1 %764 }
 0x41a   : > { %v766_v42 = vsub.f32 %v759_v1, %v765_v41 }
 0x41c   : > { %v767_v43 = vmul.f32 1.442695, %v766_v42 }
 0x41e   : > { %1575 = vpow2.f32 %v767_v43 }
 0x424   : > { %v1576_v44 = vpop.eup %1575 }
 0x425   : > { %v769_v45 = vsel %vm704_vm12, %v1576_v44, 0.0 }
 0x426   : > { %770 = vadd.xlane.f32.xlu1 %v769_v45 }
 0x428   : > { %v945_v46 = vpop.xlane.xlu0 %944 }
 0x429   : > { %v946_v47 = vsub.f32 %v939_v21, %v945_v46 }
 0x42b   : > { %v947_v48 = vmul.f32 1.442695, %v946_v47 }
 0x42d   : > { %1577 = vpow2.f32 %v947_v48 }
 0x433   : > { %v2173_v49 = vpop.eup %1577 }
 0x434   : > { %v949_v50 = vsel %vm704_vm12, %v2173_v49, 0.0 }
 0x435   : > { %950 = vadd.xlane.f32.xlu0 %v949_v50 }
 0x438   : > { %v1065_v51 = vpop.xlane.xlu0 %1064 }
 0x439   : > { %v1005_v52 = vpop.xlane.xlu1 %1004  ;;  %v1066_v54 = vsub.f32 %v1059_v27, %v1065_v51 }
 0x43a   : > { %v1006_v53 = vsub.f32 %v999_v28, %v1005_v52 }
 0x43b   : > { %v1067_v56 = vmul.f32 1.442695, %v1066_v54 }
 0x43c   : > { %v1007_v55 = vmul.f32 1.442695, %v1006_v53 }
 0x43e   : > { %1579 = vpow2.f32 %v1007_v55 }
 0x43f   : > { %1581 = vpow2.f32 %v1067_v56 }
 0x440   : > { %v885_v57 = vpop.xlane.xlu0 %884 }
 0x441   : > { %v886_v58 = vsub.f32 %v879_v22, %v885_v57 }
 0x443   : > { %v887_v59 = vmul.f32 1.442695, %v886_v58 }
 0x444   : > { %v1580_v60 = vpop.eup %1579 }
 0x445   : > { %1583 = vpow2.f32 %v887_v59  ;;  %v1009_v61 = vsel %vm704_vm12, %v1580_v60, 0.0  ;;  %v2180_v63 = vpop.eup %1581  ;;  %v1453_v59 = vld [vmem:[#allocation11 + $0x18] sm:$0xff] }
 0x446   : > { %1010 = vadd.xlane.f32.xlu2 %v1009_v61  ;;  %v1069_v6 = vsel %vm704_vm12, %v2180_v63, 0.0  ;;  %1205 = vmatpush.bf16.msra.mxu0 %v1453_v59 }
 0x448   : > { %v831_v4 = vpop.xlane.xlu0 %830 }
 0x449   : > { %v1125_v62 = vpop.xlane.xlu2 %1124  ;;  %1075 = vrot.lane.b32.xlu0 %v2118_v36, %s1851_s13  ;;  %1585 = vrcp.f32 %v831_v4 }
 0x44a   : > { %v1126_v13 = vsub.f32 %v2159_v37, %v1125_v62 }
 0x44b   : > { %v1584_v2 = vpop.eup %1583 }
 0x44c   : > { %v889_v3 = vsel %vm704_vm12, %v1584_v2, 0.0  ;;  %v1127_v14 = vmul.f32 1.442695, %v1126_v13 }
 0x44d   : > { %890 = vadd.xlane.f32.xlu1 %v889_v3 }
 0x44e   : > { %1070 = vadd.xlane.f32.xlu2 %v1069_v6  ;;  %1587 = vpow2.f32 %v1127_v14 }
 0x44f   : > { %v1586_v9 = vpop.eup %1585 }
 0x450   : > { %v833_v10 = vmul.f32 %v1586_v9, %v1574_v35 }
 0x451   : > { %v896_v7 = vpop.permute.xlu1 %895  ;;  %v776_v8 = vpop.permute.xlu2 %775 }
 0x452   : > { %788 = vmatpush.bf16.msrb.mxu2 %v776_v8  ;;  %v834_v12 = vpack.c.bf16 %v833_v10, %v833_v10  ;;  %v1560_v8 = vld [vmem:[%s2256_s9] ss:$0 sm:$0xff] }
 0x454   : > { %v1588_v15 = vpop.eup %1587 }
 0x455   : > { %v1129_v0 = vsel %vm704_vm12, %v1588_v15, 0.0 }
 0x456   : > { %908 = vmatpush.bf16.msra.mxu2 %v896_v7 }
 0x459   : > { %v1016_v16 = vpop.permute.xlu1 %1015 }
 0x45b   : > { %v836_v11 = vpop.permute.xlu0 %835 }
 0x45c   : > { %848 = vmatpush.bf16.msrb.mxu1 %v836_v11 }
 0x45f   : > { %1409 = vmatmul.msk.bf16.vlgmr.msrb.gmra.mxu1 %vm704_vm12, %v834_v12 }
 0x466   : > { %1135 = vrot.lane.b32.xlu2 %v2118_v36, %s1852_s18  ;;  %955 = vrot.lane.b32.xlu1 %v2118_v36, %s1853_s17 }
 0x490   : > { %1130 = vadd.xlane.f32.xlu1 %v1129_v0 }
 0x499   : > { %v771_v17 = vpop.xlane.xlu1 %770 }
 0x49a   : > { %1589 = vrcp.f32 %v771_v17 }
 0x4a0   : > { %v1590_v18 = vpop.eup %1589 }
 0x4a1   : > { %v773_v1 = vmul.f32 %v1590_v18, %v1576_v44 }
 0x4a3   : > { %v774_v19 = vpack.c.bf16 %v773_v1, %v773_v1 }
 0x4a5   : > { %1407 = vmatmul.msk.bf16.vlgmr.msrb.gmra.mxu2 %vm704_vm12, %v774_v19 }
 0x4a6   : > { %1028 = vmatpush.bf16.msrb.mxu2 %v1016_v16 }
 0x4a8   : > { %v951_v24 = vpop.xlane.xlu0 %950 }
 0x4b9   : > { %v1011_v20 = vpop.xlane.xlu2 %1010 }
 0x4bb   : > { %v1076_v31 = vpop.permute.xlu0 %1075 }
 0x4c0   : > { %v891_v21 = vpop.xlane.xlu1 %890 }
 0x4c1   : > { %1591 = vrcp.f32 %v891_v21  ;;  %v1071_v36 = vpop.xlane.xlu2 %1070 }
 0x4c2   : > { %1593 = vrcp.f32 %v951_v24 }
 0x4c3   : > { %1595 = vrcp.f32 %v1011_v20 }
 0x4c4   : > { %1597 = vrcp.f32 %v1071_v36 }
 0x4c7   : > { %v1592_v22 = vpop.eup %1591 }
 0x4c8   : > { %v893_v23 = vmul.f32 %v1592_v22, %v1584_v2  ;;  %v1594_v26 = vpop.eup %1593  ;;  %v1450_v2 = vld [vmem:[#allocation11] sm:$0xff] }
 0x4c9   : > { %v1136_v25 = vpop.permute.xlu2 %1135  ;;  %v1596_v27 = vpop.eup %1595  ;;  %v953_v28 = vmul.f32 %v1594_v26, %v2173_v49 }
 0x4ca   : > { %v894_v5 = vpack.c.bf16 %v893_v23, %v893_v23  ;;  %v1013_v29 = vmul.f32 %v1596_v27, %v1580_v60  ;;  %v1598_v35 = vpop.eup %1597  ;;  %v1452_v60 = vld [vmem:[#allocation11 + $0x10] sm:$0xff] }
 0x4cb   : > { %v954_v32 = vpack.c.bf16 %v953_v28, %v953_v28  ;;  %v1073_v38 = vmul.f32 %v1598_v35, %v2180_v63  ;;  %1206 = vmatpush.bf16.msra.mxu0 %v1452_v60  ;;  %v1451_v63 = vld [vmem:[#allocation11 + $0x8] sm:$0xff] }
 0x4cc   : > { %1411 = vmatmul.msk.bf16.vlgmr.msra.gmra.mxu2 %vm704_vm12, %v894_v5  ;;  %v1014_v33 = vpack.c.bf16 %v1013_v29, %v1013_v29 }
 0x4cd   : > { %1148 = vmatpush.bf16.msra.mxu2 %v1136_v25  ;;  %v1074_v39 = vpack.c.bf16 %v1073_v38, %v1073_v38 }
 0x4cf   : > { %1207 = vmatpush.bf16.msra.mxu0 %v1451_v63 }
 0x4d3   : > { %1208 = vmatpush.bf16.msra.mxu0 %v1450_v2 }
 0x4d8   : > { %v956_v30 = vpop.permute.xlu1 %955 }
 0x4d9   : > { %968 = vmatpush.bf16.msra.mxu1 %v956_v30 }
 0x4dc   : > { %v850_v34 = vpop.f32.mrf.mxu1  ;;  %1413 = vmatmul.msk.bf16.vlgmr.msra.gmra.mxu1 %vm704_vm12, %v954_v32  ;;  %1415 = vmatmul.msk.bf16.vlgmr.msrb.gmra.mxu2 %vm704_vm12, %v1014_v33 }
 0x4dd   : > { %1088 = vmatpush.bf16.msrb.mxu1 %v1076_v31  ;;  %855 = vrot.lane.b32.xlu0 %v850_v34, %s1851_s13 }
 0x4e4   : > { %v852_v37 = vpop.f32.mrf.mxu1 }
 0x4ec   : > { %1417 = vmatmul.msk.bf16.vlgmr.msrb.gmra.mxu1 %vm704_vm12, %v1074_v39 }
 0x503   : > { %v1131_v40 = vpop.xlane.xlu1 %1130 }
 0x504   : > { %1599 = vrcp.f32 %v1131_v40 }
 0x50a   : > { %v1600_v41 = vpop.eup %1599 }
 0x50b   : > { %v1133_v42 = vmul.f32 %v1600_v41, %v1588_v15 }
 0x50d   : > { %v1134_v43 = vpack.c.bf16 %v1133_v42, %v1133_v42 }
 0x50f   : > { %1419 = vmatmul.msk.bf16.vlgmr.msra.gmra.mxu2 %vm704_vm12, %v1134_v43 }
 0x528   : > { %v790_v44 = vpop.f32.mrf.mxu2 }
 0x529   : > { %795 = vrot.lane.b32.xlu1 %v790_v44, %s1852_s18 }
 0x530   : > { %v792_v45 = vpop.f32.mrf.mxu2 }
 0x54f   : > { %v910_v46 = vpop.f32.mrf.mxu2  ;;  %v856_v57 = vpop.permute.xlu0 %855 }
 0x550   : > { %915 = vrot.lane.b32.xlu2 %v910_v46, %s1848_s27 }
 0x557   : > { %v912_v47 = vpop.f32.mrf.mxu2 }
 0x559   : > { %v970_v48 = vpop.f32.mrf.mxu1 }
 0x55a   : > { %975 = vrot.lane.b32.xlu0 %v970_v48, %s1853_s17 }
 0x55f   : > { %v1030_v49 = vpop.f32.mrf.mxu2 }
 0x560   : > { %1035 = vrot.lane.b32.xlu2 %v1030_v49, %s1847_s4  ;;  %s1767_s4 = scalar_lea.hbm %s1766_s25, 8 }
 0x561   : > { %v972_v50 = vpop.f32.mrf.mxu1  ;;  %p1768_p1 = scmp.ne.s32.totalorder %s1766_s25, %s1767_s4  ;;  %p1773_p9 = scmp.lt.s32.totalorder %s1771_s15, %s1767_s4 }
 0x563   : > { %p1769_p3 = pnand %p1768_p1, %p1989_p0  ;;  %p1774_p8 = por %p1773_p9, %p1772_p7 }
 0x565   : > { %p1770_p13 = pneg %p1769_p3 }
 0x567   : > { %v1032_v51 = vpop.f32.mrf.mxu2  ;;  %p1775_p5 = pnand %p1774_p8, %p1770_p13 }
 0x569   : > { %v1090_v52 = vpop.f32.mrf.mxu1 }
 0x56a   : > { %1095 = vrot.lane.b32.xlu0 %v1090_v52, %s1849_s26 }
 0x571   : > { %v1092_v53 = vpop.f32.mrf.mxu1 }
 0x592   : > { %v1150_v54 = vpop.f32.mrf.mxu2 }
 0x593   : > { %1155 = vrot.lane.b32.xlu2 %v1150_v54, %s1850_s22 }
 0x59a   : > { %v1152_v55 = vpop.f32.mrf.mxu2 }
 0x59b   : > { %v796_v56 = vpop.permute.xlu1 %795 }
 0x59c   : > { %799 = vst.msk [vmem:[#allocation2] sm:$0xff] %vm798_vm13, %v796_v56 }
 0x59d   : > { %859 = vst.msk [vmem:[#allocation2] sm:$0xff] %vm858_vm14, %v856_v57 }
 0x5aa   : > { %v916_v58 = vpop.permute.xlu2 %915 }
 0x5ab   : > { %919 = vst.msk [vmem:[#allocation2] sm:$0xff] %vm918_vm15, %v916_v58 }
 0x5ba   : > { %v1036_v62 = vpop.permute.xlu2 %1035 }
 0x5cc   : > { %v976_v61 = vpop.permute.xlu0 %975 }
 0x5cd   : > { %979 = vst.msk [vmem:[#allocation2] sm:$0xff] %vm978_vm1, %v976_v61 }
 0x5ce   : > { %1039 = vst.msk [vmem:[#allocation2] sm:$0xff] %vm1038_vm2, %v1036_v62 }
 0x5dc   : > { %v1096_v3 = vpop.permute.xlu0 %1095 }
 0x5dd   : > { %1099 = vst.msk [vmem:[#allocation2] sm:$0xff] %vm1098_vm3, %v1096_v3 }
 0x5ed   : > { %v1156_v4 = vpop.permute.xlu2 %1155 }
 0x5ee   : > { %1159 = vst.msk [vmem:[#allocation2] sm:$0xff] %vm1158_vm4, %v1156_v4 }
 0x5f5   : > { %v1160_v6 = vld [vmem:[#allocation2] sm:$0xff] }
 0x5f6   : > { %v1161_v7 = vpack.c.bf16 %v1160_v6, %v1160_v6 }
 0x5f8   : > { %1436 = vmatmul.msk.bf16.vlgmr.msra.gmra.mxu0 %vm474_vm0, %v1161_v7 }
 0x675   : > { %v1210_v9 = vpop.f32.mrf.mxu0 }
 0x676   : > { %v1211_v10 = vadd.f32 %v1560_v8, %v1210_v9 }
 0x678   : > { %1214 = vst.msk [vmem:[%s467_s29] sm:$0xff] %vm474_vm0, %v1211_v10 }
 0x679   : > { %1778 = shalt.err (!%p1775_p5)
}
 0x67a   : > { %1470 = dma.vmem_to_hbm [thread:$0]  (%p1989_p0), %s1229_s21, 128, %s1231_s28, %s1216_s20  }
 0x67d   : > { %v1212_v11 = vpop.f32.mrf.mxu0 }
 0x67e PF: > { %s2281_s8 = sld [smem:[#allocation18_spill]]  ;;  %p2283_p10 = scmp.ge.s32.totalorder %s1829_s16, 2 }
 0x680   : > { %p1490_p11 = pnand %p2283_p10, %p1997_p6 }
 0x682   : > { %p1491_p12 = pneg %p1490_p11 }
 0x684   : > { %s1242_s17 = sand.u32 1, %s2281_s8  }
 0x685   : > { %s1243_s6 = scalar_lea.sflag [#allocation5], %s1242_s17 }
 0x686   : > { %1812 = dma.done.wait (%p1491_p12), %s1243_s6, 128  }
 0x687   : > { %1814 = vsyncadd (%p1491_p12), %s1243_s6, 4294967168  ;;  %s2284_s16 = sld [smem:[#allocation20_spill]]  ;;  %s2287_s13 = smov %s1821_s14 }
 0x688   : > { %s2285_s12 = sld [smem:[#allocation19_spill]] }
 0x689   : > { %s2286_s15 = sld [smem:[#allocation21_spill]] }
 0x68d   : > { %p27_p2 = scmp.ge.s32.totalorder %s2284_s16, 4  }
 0x68e   : > { %s2288_s14 = smov %s2285_s12 }
 0x68f   :  { %29 = sbr.rel (!%p27_p2) target bundleno = 12 (0xc), region = 130 }
 0x694   :  { %1249 = vsyncpa [#allocation4], 1 }
 0x695   :  { %1251 = vsyncpa [#allocation4 + $0x1], 1 }
 0x696   :  { %1252 = vsyncpa [#allocation7], 1 }
 0x697   :  { %1254 = vsyncpa [#allocation7 + $0x1], 1 }
 0x698   :  { %1255 = vsyncpa [#allocation10], 1 }
 0x699   :  { %1256 = vsyncpa [#allocation5], 1 }
 0x69a   :  { %1258 = vsyncpa [#allocation5 + $0x1], 1 }

// kernel: tpu_custom_call.1
= control target key start
LH: loop header
LB: loop body
LE: loop exit
PB: predicated region body
PF: predicated region fallthrough
CT: control target
= control target key end

     0   :  { %s2247_s0 = inlined_call_operand.hbm [shape: f32[2,8,64], index: 0, kind: input, shape index: {}]   ;;  %s2248_s1 = inlined_call_operand.hbm [shape: f32[2,16,64], index: 1, kind: input, shape index: {}]   ;;  %s2249_s2 = inlined_call_operand.vmem [shape: f32[1,64], index: 2, kind: input, shape index: {}]   ;;  %s2250_s3 = inlined_call_operand.vmem [shape: f32[1,64], index: 3, kind: input, shape index: {}]   ;;  %s2251_s4 = inlined_call_operand.hbm [shape: bf16[64,64], index: 4, kind: input, shape index: {}]   ;;  %s2252_s5 = inlined_call_operand.vmem [shape: f32[1,64], index: 5, kind: input, shape index: {}]   ;;  %s2253_s6 = inlined_call_operand.hbm [shape: bf16[64,128], index: 6, kind: input, shape index: {}]   ;;  %s2254_s7 = inlined_call_operand.vmem [shape: f32[1,128], index: 7, kind: input, shape index: {}]   ;;  %s2255_s8 = inlined_call_operand.hbm [shape: bf16[64,64], index: 8, kind: input, shape index: {}]   ;;  %s2256_s9 = inlined_call_operand.vmem [shape: f32[1,64], index: 9, kind: input, shape index: {}]   ;;  %s2257_s10 = inlined_call_operand.hbm [shape: f32[2,8,64], index: 10, kind: output, shape index: {}]  }
   0x1   :  { %2263 = sst [smem:[#allocation23_spill]] %s2251_s4 }
   0x2   :  { %2264 = sst [smem:[#allocation24_spill]] %s2253_s6 }
   0x3   :  { %2265 = sst [smem:[#allocation25_spill]] %s2255_s8 }
   0x4   :  { %15 = vsyncpa [#allocation4], 0 }
   0x5   :  { %17 = vsyncpa [#allocation4 + $0x1], 0 }
   0x6   :  { %18 = vsyncpa [#allocation7], 0 }
   0x7   :  { %20 = vsyncpa [#allocation7 + $0x1], 0 }
   0x8   :  { %21 = vsyncpa [#allocation10], 0 }
   0x9   :  { %22 = vsyncpa [#allocation5], 0 }
   0xa   :  { %24 = vsyncpa [#allocation5 + $0x1], 0  ;;  %s1909_s13 = smov 0   ;;  %s1911_s14 = smov 0  }
   0xb   :  { %s1913_s15 = smov 0   ;;  %s1915_s16 = smov 0  }
   0xc LB: > { %2266 = sst [smem:[#allocation18_spill]] %s1817_s13  ;;  %s1933_s20 = sadd.s32 4294967295, %s1829_s16   ;;  %s1829_s16 = sphi %s1915_s16, %s2284_s16   ;;  %s1825_s15 = sphi %s1913_s15, %s2286_s15   ;;  %s1821_s14 = sphi %s1911_s14, %s2288_s14   ;;  %s1817_s13 = sphi %s1909_s13, %s2287_s13  }
   0xd   : > { %2267 = sst [smem:[#allocation19_spill]] %s1825_s15  ;;  %p1353_p0 = scmp.ge.s32.totalorder %s1829_s16, 1 }
   0xe   : > { %s2268_s4 = sld [smem:[#allocation23_spill]]  ;;  %p51_p1 = scmp.eq.s32.totalorder %s1933_s20, 0 }
   0xf   : > { %p281_p2 = scmp.lt.s32.totalorder %s1829_s16, 3  ;;  %s1831_s22 = smov [#allocation8]  }
  0x10   : > { %s300_s23 = sshll.u32 %s1831_s22, 4  ;;  %s2270_s6 = sld [smem:[#allocation24_spill]]  ;;  %s301_s23 = int_to_ptr.vmem [resolvable:$true] %s300_s23 }
  0x11   : > { %p1938_p3 = pnand %p1353_p0, %p281_p2  ;;  %s2272_s8 = sld [smem:[#allocation25_spill]] }
  0x12   : > { %s1832_s11 = smov [#allocation9]   ;;  %s1833_s17 = smov 64  }
  0x13   : > { %p1472_p4 = pneg %p1938_p3  ;;  %s317_s12 = sshll.u32 %s1832_s11, 4  ;;  %s318_s12 = int_to_ptr.vmem [resolvable:$true] %s317_s12 }
  0x14   : > { %s298_s19 = sshll.u32 %s2268_s4, 4  ;;  %s1834_s18 = smov 4   ;;  %s299_s19 = int_to_ptr.hbm [resolvable:$true] %s298_s19 }
  0x15   : > { %p1950_p6 = pnand %p1472_p4, %p51_p1  ;;  %s1835_s22 = smov [#allocation11]  }
  0x16   : > { %s315_s26 = sshll.u32 %s2270_s6, 4  ;;  %s334_s24 = sshll.u32 %s1835_s22, 4  ;;  %s316_s26 = int_to_ptr.hbm [resolvable:$true] %s315_s26  ;;  %s335_s24 = int_to_ptr.vmem [resolvable:$true] %s334_s24 }
  0x17   : > { %s332_s30 = sshll.u32 %s2272_s8, 4  ;;  %s1352_s25 = sadd.s32 4294967294, %s1829_s16   ;;  %s333_s30 = int_to_ptr.hbm [resolvable:$true] %s332_s30 }
  0x18   : > { %1475 = dma.hbm_to_vmem [thread:$0]  (!%p1950_p6), %s299_s19, 512, %s301_s23, [#allocation7], %s1833_s17, %s1833_s17, %s1834_s18  }
  0x19   : > { %1478 = dma.hbm_to_vmem [thread:$0]  (!%p1950_p6), %s316_s26, 512, %s318_s12, [#allocation10], %s1833_s17, %s1833_s17, %s1834_s18  }
  0x1a   : > { %1481 = dma.hbm_to_vmem [thread:$0]  (!%p1950_p6), %s333_s30, 512, %s335_s24, [#allocation10], %s1833_s17, %s1833_s17, %s1834_s18  }
  0x1b   : > { %s1965_s28 = sadd.s32 1, %s1829_s16   ;;  %s37_s29 = sadd.s32 1, %s1825_s15 }
  0x1c   : > { %2273 = sst [smem:[#allocation20_spill]] %s1965_s28  ;;  %s34_s19 = ssub.s32 %s1829_s16, %s1965_s28 }
  0x1d   : > { %p44_p7 = scmp.ne.s32.totalorder %s1825_s15, %s1821_s14  ;;  %p35_p8 = scmp.eq.s32.totalorder %s34_s19, 0 }
  0x1e   : > { %p45_p9 = scmp.eq.s32.totalorder %s1829_s16, 0  ;;  %p50_p10 = scmp.ne.s32.totalorder %s1821_s14, %s1817_s13 }
  0x1f   : > { %p268_p11 = scmp.eq.s32.totalorder %s1933_s20, 1  ;;  %p274_p2 = scmp.eq.s32.totalorder %s1352_s25, 1 }
  0x20   : > { %s1977_s23 = scalar_select %p35_p8, %s1825_s15, %s37_s29  }
  0x21   : > { %p1979_p12 = por %p45_p9, %p44_p7  ;;  %p1985_p13 = por %p51_p1, %p50_p10 }
  0x22   : > { %2274 = sst [smem:[#allocation21_spill]] %s1977_s23  ;;  %p1989_p0 = por %p268_p11, %p44_p7 }
  0x23   : > { %p1496_p4 = scmp.lt.s32.totalorder %s1829_s16, 2  ;;  %s1995_s11 = sand.u32 1, %s1825_s15  }
  0x24   : > { %p1997_p6 = por %p274_p2, %p50_p10  ;;  %s1358_s17 = sshll.u32 %s1995_s11, 3 }
  0x25   : > { %s1359_s18 = sshll.u32 %s1829_s16, 3  ;;  %s355_s4 = scalar_lea.vmem [#allocation3], %s1358_s17 }
  0x26   : > { %s2278_s12 = scalar_select %p1997_p6, 1, 0 }
  0x27   : > { %s359_s29 = scalar_lea.hbm %s2247_s0, %s1359_s18  ;;  %s363_s6 = sshll.u32 %s355_s4, 4  ;;  %s364_s6 = int_to_ptr.vmem [resolvable:$true] %s363_s6 }
  0x28   : > { %2279 = sst [smem:[#allocation22_spill]] %s2278_s12  ;;  %s361_s19 = sshll.u32 %s359_s29, 4  ;;  %s362_s19 = int_to_ptr.hbm [resolvable:$true] %s361_s19 }
  0x29   : > { %p2008_p7 = pnand %p1496_p4, %p1979_p12  ;;  %s1360_s8 = sshll.u32 %s1995_s11, 4 }
  0x2a   : > { %s370_s23 = sand.u32 1, %s1829_s16   ;;  %s374_s15 = scalar_lea.vmem [#allocation6], %s1360_s8 }
  0x2b   : > { %s382_s28 = sshll.u32 %s374_s15, 4  ;;  %s352_s12 = scalar_lea.sflag [#allocation4], %s1995_s11  ;;  %s383_s28 = int_to_ptr.vmem [resolvable:$true] %s382_s28 }
  0x2c   : > { %s1691_s13 = sshra.s32 %s362_s19, 4  ;;  %p1695_p9 = pneg %p2008_p7  ;;  %s1692_s13 = int_to_ptr.hbm [resolvable:$true] %s1691_s13 }
  0x2d   : > { %s1693_s18 = scalar_lea.hbm %s1692_s13, 8  ;;  %s1698_s17 = scalar_lea.hbm %s2247_s0, 16 }
  0x2e   : > { %p1694_p8 = scmp.ne.s32.totalorder %s1692_s13, %s1693_s18  ;;  %p1699_p12 = scmp.lt.s32.totalorder %s1692_s13, %s2247_s0 }
  0x2f   : > { %p1700_p2 = scmp.lt.s32.totalorder %s1698_s17, %s1693_s18 }
  0x30   : > { %p1696_p10 = pnand %p1695_p9, %p1694_p8 }
  0x31   : > { %p1701_p4 = por %p1700_p2, %p1699_p12 }
  0x32   : > { %p1697_p11 = pneg %p1696_p10 }
  0x34   : > { %p1702_p5 = pnand %p1701_p4, %p1697_p11 }
  0x36   : > { %1705 = shalt.err (!%p1702_p5)
}
  0x37   : > { %1485 = dma.hbm_to_vmem [thread:$0]  (!%p2008_p7), %s362_s19, 128, %s364_s6, %s352_s12  }
  0x38   : > { %s1441_s8 = sshll.u32 %s1829_s16, 4  ;;  %s371_s26 = scalar_lea.sflag [#allocation7], %s370_s23 }
  0x39   : > { %s379_s29 = scalar_lea.hbm %s2248_s1, %s1441_s8  ;;  %s1728_s6 = scalar_lea.hbm %s2248_s1, 32 }
  0x3a   : > { %s380_s4 = sshll.u32 %s379_s29, 4  ;;  %s381_s4 = int_to_ptr.hbm [resolvable:$true] %s380_s4 }
  0x3b   : > { %s1721_s22 = sshra.s32 %s381_s4, 4  ;;  %s1722_s22 = int_to_ptr.hbm [resolvable:$true] %s1721_s22 }
  0x3c   : > { %s1723_s13 = scalar_lea.hbm %s1722_s22, 16  ;;  %p1729_p11 = scmp.lt.s32.totalorder %s1722_s22, %s2248_s1 }
  0x3d   : > { %p1724_p8 = scmp.ne.s32.totalorder %s1722_s22, %s1723_s13  ;;  %p1730_p12 = scmp.lt.s32.totalorder %s1728_s6, %s1723_s13 }
  0x3f   : > { %p1726_p5 = pnand %p1724_p8, %p1695_p9  ;;  %p1731_p2 = por %p1730_p12, %p1729_p11 }
  0x41   : > { %p1727_p10 = pneg %p1726_p5 }
  0x43   : > { %p1732_p4 = pnand %p1731_p2, %p1727_p10 }
  0x45   : > { %1735 = shalt.err (!%p1732_p4)
}
  0x46   : > { %s1836_s23 = smov 128   ;;  %s1837_s24 = smov 8  }
  0x47   : > { %1488 = dma.hbm_to_vmem [thread:$0]  (!%p2008_p7), %s381_s4, 256, %s383_s28, %s371_s26, %s1836_s23, %s1836_s23, %s1837_s24  }
  0x48   : > { %394 = sbr.rel (%p1938_p3) target bundleno = 1662 (0x67e), region = 60  ;;  %s2046_s8 = sand.u32 (!%p1938_p3), 1, %s1821_s14  }
  0x49   : > { %s1364_s15 = sshll.u32 (!%p1938_p3), %s2046_s8, 3  ;;  %s397_s11 = scalar_lea.sflag (!%p1938_p3), [#allocation4], %s2046_s8 }
  0x4a   : > { %s400_s29 = scalar_lea.vmem (!%p1938_p3), [#allocation3], %s1364_s15 }
  0x4d   : > { %1796 = dma.done.wait (%p1985_p13), %s397_s11, 128  }
  0x4e   : > { %1798 = vsyncadd (%p1985_p13), %s397_s11, 4294967168  ;;  %s406_s21 = sand.u32 1, %s1933_s20   ;;  %s1365_s28 = sshll.u32 %s2046_s8, 4 }
  0x4f   : > { %s407_s25 = scalar_lea.sflag [#allocation7], %s406_s21  ;;  %s410_s4 = scalar_lea.vmem [#allocation6], %s1365_s28 }
  0x50   : > { %1800 = dma.done.wait (%p1985_p13), %s407_s25, 256  }
  0x51   : > { %1802 = vsyncadd (%p1985_p13), %s407_s25, 4294967040 }
  0x52   : > { %1804 = dma.done.wait (%p51_p1), [#allocation7], 512  }
  0x53   : > { %1806 = vsyncadd (%p51_p1), [#allocation7], 4294966784 }
  0x54   : > { %1808 = dma.done.wait (%p51_p1), [#allocation10], 1024  }
  0x55   : > { %1810 = vsyncadd (%p51_p1), [#allocation10], 4294966272  ;;  %vm474_vm0 = vcmask 523264   ;;  %v2070_v0 = vld [vmem:[%s410_s4] sm:$0xff]  ;;  %v2072_v1 = vld [vmem:[%s400_s29] sm:$0xff]  ;;  %v1838_v12 = vmov 64.0  }
  0x56   : > { %v516_v2 = vsel %vm474_vm0, %v2070_v0, 0.0  ;;  %v475_v3 = vsel %vm474_vm0, %v2072_v1, 0.0  ;;  %v524_v4 = vmul.f32 %v2070_v0, %v2070_v0  ;;  %v2080_v5 = vld [vmem:[%s410_s4 + $0x8] sm:$0xff]  ;;  %v486_v7 = vmul.f32 %v2072_v1, %v2072_v1  ;;  %v1444_v21 = vld [vmem:[#allocation8 + $0x10] sm:$0xff]  ;;  %v1442_v32 = vld [vmem:[#allocation8] sm:$0xff]  ;;  %s1839_s19 = smov 64  }
  0x57   : > { %517 = vadd.xlane.f32.xlu0 %v516_v2  ;;  %476 = vadd.xlane.f32.xlu2 %v475_v3  ;;  %v525_v8 = vmul.f32 %v2080_v5, %v2080_v5  ;;  %v519_v9 = vsel %vm474_vm0, %v2080_v5, 0.0  ;;  %1561 = vrcp.f32 %v1838_v12  ;;  %v1445_v18 = vld [vmem:[#allocation8 + $0x18] sm:$0xff]  ;;  %v1448_v25 = vld [vmem:[#allocation9 + $0x10] sm:$0xff]  ;;  %v1443_v27 = vld [vmem:[#allocation8 + $0x8] sm:$0xff]  ;;  %vm684_vm11 = vcmask 64512   ;;  %s1840_s23 = smov 104  }
  0x58   : > { %v526_v6 = vsel %vm474_vm0, %v524_v4, 0.0  ;;  %v487_v10 = vsel %vm474_vm0, %v486_v7, 0.0  ;;  %614 = vmatpush.bf16.msra.mxu0 %v1445_v18  ;;  %v1449_v19 = vld [vmem:[#allocation9 + $0x18] sm:$0xff]  ;;  %v1447_v30 = vld [vmem:[#allocation9 + $0x8] sm:$0xff]  ;;  %v1446_v35 = vld [vmem:[#allocation9] sm:$0xff]  ;;  %s1841_s24 = smov 112  }
  0x59   : > { %527 = vadd.xlane.f32.xlu1 %v526_v6  ;;  %v529_v11 = vsel %vm474_vm0, %v525_v8, 0.0  ;;  %666 = vmatpush.bf16.msra.mxu1 %v1449_v19  ;;  %s1842_s11 = smov 88   ;;  %s1843_s29 = smov 96   ;;  %vm704_vm12 = vcmask 130048   ;;  %vm798_vm13 = vcmask 130112   ;;  %vm858_vm14 = vcmask 195712  }
  0x5a   : > { %s1844_s21 = smov 80   ;;  %s1845_s28 = smov 120   ;;  %vm918_vm15 = vcmask 261312  }
  0x5b   : > { %s1846_s25 = smov 72   ;;  %s1847_s4 = smov 40  }
  0x5c   : > { %615 = vmatpush.bf16.msra.mxu0 %v1444_v21  ;;  %s1848_s27 = smov 24   ;;  %s1849_s26 = smov 48  }
  0x5d   : > { %v1562_v13 = vpop.eup %1561  ;;  %667 = vmatpush.bf16.msra.mxu1 %v1448_v25  ;;  %s1850_s22 = smov 56   ;;  %s1851_s13 = smov 16  }
  0x5e   : > { %v479_v14 = vmul.f32 64.0, %v1562_v13  ;;  %vm483_vm1 = vweird.f32 %v1562_v13  ;;  %s1852_s18 = smov 8   ;;  %s1853_s17 = smov 32  }
  0x5f   : > { %520 = vadd.xlane.f32.xlu0 %v519_v9  ;;  %488 = vadd.xlane.f32.xlu2 %v487_v10  ;;  %v1556_v10 = vld [vmem:[%s2249_s2] ss:$0 sm:$0xff]  ;;  %s1438_s6 = sshll.u32 %s1933_s20, 3  ;;  %s1216_s20 = scalar_lea.sflag [#allocation5], %s2046_s8 }
  0x60   : > { %v480_v15 = vsub.f32 1.0, %v479_v14  ;;  %616 = vmatpush.bf16.msra.mxu0 %v1443_v27 }
  0x61   : > { %530 = vadd.xlane.f32.xlu1 %v529_v11  ;;  %668 = vmatpush.bf16.msra.mxu1 %v1447_v30 }
  0x62   : > { %v481_v16 = vmul.f32 %v1562_v13, %v480_v15 }
  0x64   : > { %v482_v17 = vadd.f32 %v1562_v13, %v481_v16  ;;  %617 = vmatpush.bf16.msra.mxu0 %v1442_v32 }
  0x65   : > { %669 = vmatpush.bf16.msra.mxu1 %v1446_v35  ;;  %v1558_v35 = vld [vmem:[%s2252_s5] ss:$0 sm:$0xff] }
  0x66   : > { %v484_v20 = vsel %vm483_vm1, %v1562_v13, %v482_v17  ;;  %v1557_v17 = vld [vmem:[%s2250_s3] ss:$0 sm:$0xff]  ;;  %vm978_vm1 = vcmask 326912  }
  0xca   : > { %v518_v22 = vpop.xlane.xlu0 %517  ;;  %v477_v23 = vpop.xlane.xlu2 %476 }
  0xcb   : > { %v2091_v24 = vmul.f32 %v518_v22, %v484_v20  ;;  %v2095_v29 = vmul.f32 %v484_v20, %v477_v23 }
  0xcc   : > { %v528_v26 = vpop.xlane.xlu1 %527 }
  0xcd   : > { %v534_v28 = vmul.f32 %v2091_v24, %v2091_v24  ;;  %v532_v31 = vmul.f32 %v528_v26, %v484_v20  ;;  %v491_v34 = vmul.f32 %v2095_v29, %v2095_v29  ;;  %v540_v6 = vsub.f32 %v2070_v0, %v2091_v24  ;;  %v1559_v26 = vld [vmem:[%s2254_s7] ss:$0 sm:$0xff] }
  0xce   : > { %v494_v9 = vsub.f32 %v2072_v1, %v2095_v29 }
  0xcf   : > { %v536_v33 = vsub.f32 %v532_v31, %v534_v28 }
  0xd1   : > { %v538_v36 = vmax.f32 %v536_v33, 0.0 }
  0xd2   : > { %v521_v37 = vpop.xlane.xlu0 %520  ;;  %v489_v38 = vpop.xlane.xlu2 %488 }
  0xd3   : > { %v523_v39 = vmul.f32 %v521_v37, %v484_v20  ;;  %v490_v40 = vmul.f32 %v489_v38, %v484_v20  ;;  %v542_v41 = vadd.f32 1e-06, %v538_v36 }
  0xd4   : > { %v531_v42 = vpop.xlane.xlu1 %530 }
  0xd5   : > { %v535_v43 = vmul.f32 %v523_v39, %v523_v39  ;;  %v492_v44 = vsub.f32 %v490_v40, %v491_v34  ;;  %v533_v45 = vmul.f32 %v531_v42, %v484_v20  ;;  %1563 = vrsqrt.f32 %v542_v41 }
  0xd6   : > { %vm550_vm3 = vweird.f32 %v542_v41  ;;  %v541_v14 = vsub.f32 %v2080_v5, %v523_v39 }
  0xd7   : > { %v493_v46 = vmax.f32 %v492_v44, 0.0  ;;  %v537_v47 = vsub.f32 %v533_v45, %v535_v43 }
  0xd9   : > { %v495_v48 = vadd.f32 1e-06, %v493_v46  ;;  %v539_v49 = vmax.f32 %v537_v47, 0.0 }
  0xdb   : > { %1565 = vrsqrt.f32 %v495_v48  ;;  %v543_v50 = vadd.f32 1e-06, %v539_v49  ;;  %v1564_v51 = vpop.eup %1563  ;;  %vm502_vm4 = vweird.f32 %v495_v48 }
  0xdc   : > { %v545_v52 = vmul.f32 %v1564_v51, %v542_v41  ;;  %vm551_vm2 = vweird.f32 %v1564_v51 }
  0xdd   : > { %1567 = vrsqrt.f32 %v543_v50  ;;  %vm552_vm6 = vmor %vm550_vm3, %vm551_vm2  ;;  %vm560_vm9 = vweird.f32 %v543_v50  ;;  %vm1038_vm2 = vcmask 392512   ;;  %vm1098_vm3 = vcmask 458112  }
  0xde   : > { %v546_v53 = vmul.f32 %v1564_v51, %v545_v52 }
  0xe0   : > { %v547_v55 = vmul.f32 0.5, %v546_v53 }
  0xe1   : > { %v1566_v54 = vpop.eup %1565 }
  0xe2   : > { %v497_v56 = vmul.f32 %v1566_v54, %v495_v48  ;;  %v548_v58 = vsub.f32 1.5, %v547_v55  ;;  %vm503_vm5 = vweird.f32 %v1566_v54 }
  0xe3   : > { %v1568_v57 = vpop.eup %1567  ;;  %vm504_vm7 = vmor %vm502_vm4, %vm503_vm5  ;;  %vm1158_vm4 = vcmask 523712  }
  0xe4   : > { %v498_v59 = vmul.f32 %v1566_v54, %v497_v56  ;;  %v555_v60 = vmul.f32 %v1568_v57, %v543_v50  ;;  %v549_v61 = vmul.f32 %v1564_v51, %v548_v58  ;;  %vm561_vm8 = vweird.f32 %v1568_v57 }
  0xe5   : > { %vm562_vm10 = vmor %vm560_vm9, %vm561_vm8 }
  0xe6   : > { %v499_v62 = vmul.f32 0.5, %v498_v59  ;;  %v556_v63 = vmul.f32 %v1568_v57, %v555_v60  ;;  %v553_v4 = vsel %vm552_vm6, %v1564_v51, %v549_v61 }
  0xe7   : > { %v564_v11 = vmul.f32 %v553_v4, %v540_v6 }
  0xe8   : > { %v500_v2 = vsub.f32 1.5, %v499_v62  ;;  %v557_v3 = vmul.f32 0.5, %v556_v63 }
  0xe9   : > { %v566_v1 = vmul.f32 %v1556_v10, %v564_v11 }
  0xea   : > { %v501_v7 = vmul.f32 %v1566_v54, %v500_v2  ;;  %v558_v8 = vsub.f32 1.5, %v557_v3 }
  0xeb   : > { %v568_v22 = vadd.f32 %v1557_v17, %v566_v1 }
  0xec   : > { %v559_v12 = vmul.f32 %v1568_v57, %v558_v8  ;;  %v505_v13 = vsel %vm504_vm7, %v1566_v54, %v501_v7 }
  0xed   : > { %v506_v15 = vmul.f32 %v505_v13, %v494_v9 }
  0xee   : > { %v563_v0 = vsel %vm562_vm10, %v1568_v57, %v559_v12 }
  0xef   : > { %v510_v16 = vmul.f32 %v1556_v10, %v506_v15  ;;  %v565_v18 = vmul.f32 %v563_v0, %v541_v14 }
  0xf1   : > { %v514_v19 = vadd.f32 %v1557_v17, %v510_v16  ;;  %v567_v20 = vmul.f32 %v1556_v10, %v565_v18 }
  0xf3   : > { %v515_v21 = vpack.c.bf16 %v514_v19, %v514_v19  ;;  %v569_v23 = vadd.f32 %v1557_v17, %v567_v20 }
  0xf5   : > { %1386 = vmatmul.msk.bf16.vlgmr.msra.gmra.mxu0 %vm474_vm0, %v515_v21  ;;  %v570_v24 = vpack.c.bf16 %v569_v23, %v568_v22 }
  0xf7   : > { %1403 = vmatmul.msk.bf16.vlgmr.msra.gmra.mxu1 %vm474_vm0, %v570_v24 }
 0x172   : > { %v619_v5 = vpop.f32.mrf.mxu0 }
 0x173   : > { %v620_v38 = vadd.f32 %v1558_v35, %v619_v5 }
 0x174   : > { %v671_v25 = vpop.f32.mrf.mxu1 }
 0x175   : > { %v672_v27 = vadd.f32 %v1559_v26, %v671_v25  ;;  %v676_v39 = vpack.c.bf16 %v620_v38, %v620_v38 }
 0x177   : > { %v677_v30 = vpack.c.bf16 %v672_v27, %v672_v27  ;;  %v738_v40 = vunpack.c.l.b16 %v676_v39 }
 0x179   : > { %v681_v33 = vunpack.c.l.b16 %v677_v30  ;;  %v739_v41 = vpack.c.b16 %v738_v40, %v738_v40 }
 0x17a   : > { %v621_v28 = vpop.f32.mrf.mxu0 }
 0x17c   : > { %v673_v29 = vpop.f32.mrf.mxu1 }
 0x17d   : > { %v674_v31 = vadd.f32 %v1559_v26, %v673_v29 }
 0x17f   : > { %v678_v32 = vpack.c.bf16 %v674_v31, %v674_v31 }
 0x181   : > { %v682_v34 = vunpack.c.l.b16 %v678_v32 }
 0x183   : > { %v2118_v36 = vpack.c.b16 %v682_v34, %v681_v33 }
 0x185   : > { %717 = vrot.lane.b32.xlu2 %v2118_v36, %s1839_s19  ;;  %v689_v37 = vsel %vm684_vm11, %v2118_v36, 0 }
 0x186   : > { %698 = vmatpush.bf16.xpose.msra.mxu2 %v689_v37 }
 0x18d   : > { %862 = vrot.lane.b32.xlu2 %v2118_v36, %s1840_s23  ;;  %1404 = vmatmul.msk.bf16.vlgmr.msra.gmra.mxu2 %vm684_vm11, %v676_v39 }
 0x195   : > { %802 = vrot.lane.b32.xlu2 %v2118_v36, %s1841_s24 }
 0x19d   : > { %980 = vrot.lane.b32.xlu2 %v739_v41, %s1842_s11 }
 0x1a5   : > { %920 = vrot.lane.b32.xlu2 %v739_v41, %s1843_s29 }
 0x1ad   : > { %1040 = vrot.lane.b32.xlu2 %v739_v41, %s1844_s21 }
 0x1df   : > { %v718_v42 = vpop.permute.xlu2 %717 }
 0x1e0   : > { %730 = vmatpush.bf16.msra.mxu3 %v718_v42 }
 0x1e7   : > { %v863_v43 = vpop.permute.xlu2 %862 }
 0x1e8   : > { %v868_v62 = vsel %vm684_vm11, %v863_v43, 0 }
 0x1ef   : > { %v803_v44 = vpop.permute.xlu2 %802 }
 0x1f0   : > { %v808_v45 = vsel %vm684_vm11, %v803_v44, 0 }
 0x1f1   : > { %817 = vmatpush.bf16.xpose.msrb.mxu0 %v808_v45 }
 0x1f7   : > { %v981_v8 = vpop.permute.xlu2 %980 }
 0x1ff   : > { %v921_v15 = vpop.permute.xlu2 %920 }
 0x207   : > { %v1041_v0 = vpop.permute.xlu2 %1040 }
 0x210   : > { %v700_v46 = vpop.f32.mrf.mxu2 }
 0x211   : > { %v705_v47 = vsel %vm704_vm12, %v700_v46, -inf }
 0x212   : > { %706 = vmax.xlane.f32.xlu0 %v705_v47 }
 0x218   : > { %v702_v48 = vpop.f32.mrf.mxu2 }
 0x226   : > { %742 = vrot.lane.b32.xlu0 %v2118_v36, %s1845_s28 }
 0x22e   : > { %860 = vrot.lane.b32.xlu0 %v739_v41, %s1840_s23  ;;  %s1226_s23 = scalar_lea.hbm %s2257_s10, %s1438_s6 }
 0x236   : > { %800 = vrot.lane.b32.xlu0 %v739_v41, %s1841_s24 }
 0x23e   : > { %1102 = vrot.lane.b32.xlu0 %v2118_v36, %s1846_s25 }
 0x246   : > { %1042 = vrot.lane.b32.xlu0 %v2118_v36, %s1844_s21 }
 0x285   : > { %v707_v49 = vpop.xlane.xlu0 %706 }
 0x286   : > { %v708_v50 = vsub.f32 %v700_v46, %v707_v49 }
 0x288   : > { %v709_v51 = vmul.f32 1.442695, %v708_v50 }
 0x28a   : > { %1569 = vpow2.f32 %v709_v51 }
 0x290   : > { %v1570_v52 = vpop.eup %1569 }
 0x291   : > { %v711_v53 = vsel %vm704_vm12, %v1570_v52, 0.0 }
 0x292   : > { %712 = vadd.xlane.f32.xlu1 %v711_v53 }
 0x298   : > { %v743_v54 = vpop.permute.xlu0 %742 }
 0x299   : > { %v748_v55 = vsel %vm684_vm11, %v743_v54, 0 }
 0x29a   : > { %757 = vmatpush.bf16.xpose.msrb.mxu3 %v748_v55 }
 0x2a0   : > { %v861_v56 = vpop.permute.xlu0 %860 }
 0x2a8   : > { %v801_v57 = vpop.permute.xlu0 %800 }
 0x2a9   : > { %1408 = vmatmul.msk.bf16.vlgmr.msrb.gmra.mxu0 %vm684_vm11, %v801_v57 }
 0x2ab   : > { %740 = vrot.lane.b32.xlu1 %v739_v41, %s1845_s28  ;;  %s1230_s28 = sshll.u32 %s1226_s23, 4  ;;  %s1231_s28 = int_to_ptr.hbm [resolvable:$true] %s1230_s28 }
 0x2b0   : > { %v1103_v2 = vpop.permute.xlu0 %1102 }
 0x2b1   : > { %v1108_v14 = vsel %vm684_vm11, %v1103_v2, 0 }
 0x2b3   : > { %982 = vrot.lane.b32.xlu1 %v2118_v36, %s1842_s11 }
 0x2b8   : > { %v1043_v9 = vpop.permute.xlu0 %1042 }
 0x2b9   : > { %v1048_v13 = vsel %vm684_vm11, %v1043_v9, 0 }
 0x2bb   : > { %922 = vrot.lane.b32.xlu1 %v2118_v36, %s1843_s29  ;;  %s467_s29 = scalar_lea.vmem [#allocation12], %s1364_s15  ;;  %s1771_s15 = scalar_lea.hbm %s2257_s10, 16 }
 0x2bc   : > { %s1228_s21 = sshll.u32 %s467_s29, 4  ;;  %s1229_s21 = int_to_ptr.vmem [resolvable:$true] %s1228_s21 }
 0x2c3   : > { %1100 = vrot.lane.b32.xlu1 %v739_v41, %s1846_s25  ;;  %s1765_s25 = sshra.s32 %s1231_s28, 4  ;;  %s1766_s25 = int_to_ptr.hbm [resolvable:$true] %s1765_s25 }
 0x2c4   : > { %p1772_p7 = scmp.lt.s32.totalorder %s1766_s25, %s2257_s10 }
 0x305   : > { %v713_v58 = vpop.xlane.xlu1 %712 }
 0x306   : > { %1571 = vrcp.f32 %v713_v58 }
 0x30c   : > { %v1572_v59 = vpop.eup %1571 }
 0x30d   : > { %v715_v60 = vmul.f32 %v1572_v59, %v1570_v52 }
 0x30f   : > { %v716_v61 = vpack.c.bf16 %v715_v60, %v715_v60 }
 0x311   : > { %1405 = vmatmul.msk.bf16.vlgmr.msra.gmra.mxu3 %vm704_vm12, %v716_v61 }
 0x312   : > { %877 = vmatpush.bf16.xpose.msra.mxu3 %v868_v62 }
 0x31d   : > { %v741_v63 = vpop.permute.xlu1 %740 }
 0x321   : > { %1406 = vmatmul.msk.bf16.vlgmr.msrb.gmra.mxu3 %vm684_vm11, %v741_v63 }
 0x325   : > { %v983_v3 = vpop.permute.xlu1 %982 }
 0x326   : > { %v988_v4 = vsel %vm684_vm11, %v983_v3, 0  ;;  %v819_v6 = vpop.f32.mrf.mxu0 }
 0x327   : > { %997 = vmatpush.bf16.xpose.msrb.mxu3 %v988_v4  ;;  %v823_v7 = vsel %vm704_vm12, %v819_v6, -inf }
 0x328   : > { %824 = vmax.xlane.f32.xlu2 %v823_v7 }
 0x32d   : > { %v923_v10 = vpop.permute.xlu1 %922 }
 0x32e   : > { %v928_v11 = vsel %vm684_vm11, %v923_v10, 0  ;;  %v821_v12 = vpop.f32.mrf.mxu0 }
 0x32f   : > { %937 = vmatpush.bf16.xpose.msra.mxu0 %v928_v11 }
 0x331   : > { %1410 = vmatmul.msk.bf16.vlgmr.msra.gmra.mxu3 %vm684_vm11, %v861_v56 }
 0x332   : > { %1117 = vmatpush.bf16.xpose.msra.mxu3 %v1108_v14 }
 0x335   : > { %v1101_v16 = vpop.permute.xlu1 %1100 }
 0x336   : > { %1412 = vmatmul.msk.bf16.vlgmr.msra.gmra.mxu0 %vm684_vm11, %v921_v15 }
 0x337   : > { %1057 = vmatpush.bf16.xpose.msrb.mxu0 %v1048_v13 }
 0x341   : > { %1414 = vmatmul.msk.bf16.vlgmr.msrb.gmra.mxu3 %vm684_vm11, %v981_v8 }
 0x346   : > { %1416 = vmatmul.msk.bf16.vlgmr.msrb.gmra.mxu0 %vm684_vm11, %v1041_v0 }
 0x351   : > { %1418 = vmatmul.msk.bf16.vlgmr.msra.gmra.mxu3 %vm684_vm11, %v1101_v16 }
 0x394   : > { %v732_v17 = vpop.f32.mrf.mxu3 }
 0x395   : > { %736 = vst.msk [vmem:[#allocation2] sm:$0xff] %vm684_vm11, %v732_v17 }
 0x39b   : > { %v825_v25 = vpop.xlane.xlu2 %824 }
 0x39c   : > { %v734_v18 = vpop.f32.mrf.mxu3  ;;  %v826_v26 = vsub.f32 %v819_v6, %v825_v25 }
 0x39e   : > { %v827_v31 = vmul.f32 1.442695, %v826_v26 }
 0x3a0   : > { %1573 = vpow2.f32 %v827_v31 }
 0x3a4   : > { %v759_v1 = vpop.f32.mrf.mxu3 }
 0x3a5   : > { %v763_v19 = vsel %vm704_vm12, %v759_v1, -inf }
 0x3a6   : > { %764 = vmax.xlane.f32.xlu1 %v763_v19  ;;  %v1574_v35 = vpop.eup %1573 }
 0x3a7   : > { %v829_v38 = vsel %vm704_vm12, %v1574_v35, 0.0 }
 0x3ac   : > { %v761_v20 = vpop.f32.mrf.mxu3 }
 0x3b3   : > { %v939_v21 = vpop.f32.mrf.mxu0 }
 0x3b4   : > { %v879_v22 = vpop.f32.mrf.mxu3  ;;  %v943_v23 = vsel %vm704_vm12, %v939_v21, -inf }
 0x3b5   : > { %944 = vmax.xlane.f32.xlu0 %v943_v23  ;;  %v883_v34 = vsel %vm704_vm12, %v879_v22, -inf }
 0x3bb   : > { %v941_v24 = vpop.f32.mrf.mxu0 }
 0x3bc   : > { %v881_v5 = vpop.f32.mrf.mxu3 }
 0x3c3   : > { %v1059_v27 = vpop.f32.mrf.mxu0 }
 0x3c4   : > { %v999_v28 = vpop.f32.mrf.mxu3  ;;  %v1063_v29 = vsel %vm704_vm12, %v1059_v27, -inf }
 0x3c5   : > { %1064 = vmax.xlane.f32.xlu0 %v1063_v29  ;;  %v1003_v30 = vsel %vm704_vm12, %v999_v28, -inf }
 0x3c6   : > { %1004 = vmax.xlane.f32.xlu1 %v1003_v30 }
 0x3cb   : > { %v1061_v32 = vpop.f32.mrf.mxu0 }
 0x3cc   : > { %v1001_v33 = vpop.f32.mrf.mxu3 }
 0x3cd   : > { %884 = vmax.xlane.f32.xlu0 %v883_v34 }
 0x3d4   : > { %v2159_v37 = vpop.f32.mrf.mxu3 }
 0x3d5   : > { %830 = vadd.xlane.f32.xlu0 %v829_v38  ;;  %v1123_v39 = vsel %vm704_vm12, %v2159_v37, -inf }
 0x3d6   : > { %1124 = vmax.xlane.f32.xlu2 %v1123_v39 }
 0x3dc   : > { %v1121_v40 = vpop.f32.mrf.mxu3 }
 0x3df   : > { %895 = vrot.lane.b32.xlu1 %v2118_v36, %s1847_s4 }
 0x3e7   : > { %1015 = vrot.lane.b32.xlu1 %v2118_v36, %s1848_s27 }
 0x3e9   : > { %835 = vrot.lane.b32.xlu0 %v2118_v36, %s1849_s26 }
 0x3ee   : > { %775 = vrot.lane.b32.xlu2 %v2118_v36, %s1850_s22 }
 0x419   : > { %v765_v41 = vpop.xlane.xlu1 %764 }
 0x41a   : > { %v766_v42 = vsub.f32 %v759_v1, %v765_v41 }
 0x41c   : > { %v767_v43 = vmul.f32 1.442695, %v766_v42 }
 0x41e   : > { %1575 = vpow2.f32 %v767_v43 }
 0x424   : > { %v1576_v44 = vpop.eup %1575 }
 0x425   : > { %v769_v45 = vsel %vm704_vm12, %v1576_v44, 0.0 }
 0x426   : > { %770 = vadd.xlane.f32.xlu1 %v769_v45 }
 0x428   : > { %v945_v46 = vpop.xlane.xlu0 %944 }
 0x429   : > { %v946_v47 = vsub.f32 %v939_v21, %v945_v46 }
 0x42b   : > { %v947_v48 = vmul.f32 1.442695, %v946_v47 }
 0x42d   : > { %1577 = vpow2.f32 %v947_v48 }
 0x433   : > { %v2173_v49 = vpop.eup %1577 }
 0x434   : > { %v949_v50 = vsel %vm704_vm12, %v2173_v49, 0.0 }
 0x435   : > { %950 = vadd.xlane.f32.xlu0 %v949_v50 }
 0x438   : > { %v1065_v51 = vpop.xlane.xlu0 %1064 }
 0x439   : > { %v1005_v52 = vpop.xlane.xlu1 %1004  ;;  %v1066_v54 = vsub.f32 %v1059_v27, %v1065_v51 }
 0x43a   : > { %v1006_v53 = vsub.f32 %v999_v28, %v1005_v52 }
 0x43b   : > { %v1067_v56 = vmul.f32 1.442695, %v1066_v54 }
 0x43c   : > { %v1007_v55 = vmul.f32 1.442695, %v1006_v53 }
 0x43e   : > { %1579 = vpow2.f32 %v1007_v55 }
 0x43f   : > { %1581 = vpow2.f32 %v1067_v56 }
 0x440   : > { %v885_v57 = vpop.xlane.xlu0 %884 }
 0x441   : > { %v886_v58 = vsub.f32 %v879_v22, %v885_v57 }
 0x443   : > { %v887_v59 = vmul.f32 1.442695, %v886_v58 }
 0x444   : > { %v1580_v60 = vpop.eup %1579 }
 0x445   : > { %1583 = vpow2.f32 %v887_v59  ;;  %v1009_v61 = vsel %vm704_vm12, %v1580_v60, 0.0  ;;  %v2180_v63 = vpop.eup %1581  ;;  %v1453_v59 = vld [vmem:[#allocation11 + $0x18] sm:$0xff] }
 0x446   : > { %1010 = vadd.xlane.f32.xlu2 %v1009_v61  ;;  %v1069_v6 = vsel %vm704_vm12, %v2180_v63, 0.0  ;;  %1205 = vmatpush.bf16.msra.mxu0 %v1453_v59 }
 0x448   : > { %v831_v4 = vpop.xlane.xlu0 %830 }
 0x449   : > { %v1125_v62 = vpop.xlane.xlu2 %1124  ;;  %1075 = vrot.lane.b32.xlu0 %v2118_v36, %s1851_s13  ;;  %1585 = vrcp.f32 %v831_v4 }
 0x44a   : > { %v1126_v13 = vsub.f32 %v2159_v37, %v1125_v62 }
 0x44b   : > { %v1584_v2 = vpop.eup %1583 }
 0x44c   : > { %v889_v3 = vsel %vm704_vm12, %v1584_v2, 0.0  ;;  %v1127_v14 = vmul.f32 1.442695, %v1126_v13 }
 0x44d   : > { %890 = vadd.xlane.f32.xlu1 %v889_v3 }
 0x44e   : > { %1070 = vadd.xlane.f32.xlu2 %v1069_v6  ;;  %1587 = vpow2.f32 %v1127_v14 }
 0x44f   : > { %v1586_v9 = vpop.eup %1585 }
 0x450   : > { %v833_v10 = vmul.f32 %v1586_v9, %v1574_v35 }
 0x451   : > { %v896_v7 = vpop.permute.xlu1 %895  ;;  %v776_v8 = vpop.permute.xlu2 %775 }
 0x452   : > { %788 = vmatpush.bf16.msrb.mxu2 %v776_v8  ;;  %v834_v12 = vpack.c.bf16 %v833_v10, %v833_v10  ;;  %v1560_v8 = vld [vmem:[%s2256_s9] ss:$0 sm:$0xff] }
 0x454   : > { %v1588_v15 = vpop.eup %1587 }
 0x455   : > { %v1129_v0 = vsel %vm704_vm12, %v1588_v15, 0.0 }
 0x456   : > { %908 = vmatpush.bf16.msra.mxu2 %v896_v7 }
 0x459   : > { %v1016_v16 = vpop.permute.xlu1 %1015 }
 0x45b   : > { %v836_v11 = vpop.permute.xlu0 %835 }
 0x45c   : > { %848 = vmatpush.bf16.msrb.mxu1 %v836_v11 }
 0x45f   : > { %1409 = vmatmul.msk.bf16.vlgmr.msrb.gmra.mxu1 %vm704_vm12, %v834_v12 }
 0x466   : > { %1135 = vrot.lane.b32.xlu2 %v2118_v36, %s1852_s18  ;;  %955 = vrot.lane.b32.xlu1 %v2118_v36, %s1853_s17 }
 0x490   : > { %1130 = vadd.xlane.f32.xlu1 %v1129_v0 }
 0x499   : > { %v771_v17 = vpop.xlane.xlu1 %770 }
 0x49a   : > { %1589 = vrcp.f32 %v771_v17 }
 0x4a0   : > { %v1590_v18 = vpop.eup %1589 }
 0x4a1   : > { %v773_v1 = vmul.f32 %v1590_v18, %v1576_v44 }
 0x4a3   : > { %v774_v19 = vpack.c.bf16 %v773_v1, %v773_v1 }
 0x4a5   : > { %1407 = vmatmul.msk.bf16.vlgmr.msrb.gmra.mxu2 %vm704_vm12, %v774_v19 }
 0x4a6   : > { %1028 = vmatpush.bf16.msrb.mxu2 %v1016_v16 }
 0x4a8   : > { %v951_v24 = vpop.xlane.xlu0 %950 }
 0x4b9   : > { %v1011_v20 = vpop.xlane.xlu2 %1010 }
 0x4bb   : > { %v1076_v31 = vpop.permute.xlu0 %1075 }
 0x4c0   : > { %v891_v21 = vpop.xlane.xlu1 %890 }
 0x4c1   : > { %1591 = vrcp.f32 %v891_v21  ;;  %v1071_v36 = vpop.xlane.xlu2 %1070 }
 0x4c2   : > { %1593 = vrcp.f32 %v951_v24 }
 0x4c3   : > { %1595 = vrcp.f32 %v1011_v20 }
 0x4c4   : > { %1597 = vrcp.f32 %v1071_v36 }
 0x4c7   : > { %v1592_v22 = vpop.eup %1591 }
 0x4c8   : > { %v893_v23 = vmul.f32 %v1592_v22, %v1584_v2  ;;  %v1594_v26 = vpop.eup %1593  ;;  %v1450_v2 = vld [vmem:[#allocation11] sm:$0xff] }
 0x4c9   : > { %v1136_v25 = vpop.permute.xlu2 %1135  ;;  %v1596_v27 = vpop.eup %1595  ;;  %v953_v28 = vmul.f32 %v1594_v26, %v2173_v49 }
 0x4ca   : > { %v894_v5 = vpack.c.bf16 %v893_v23, %v893_v23  ;;  %v1013_v29 = vmul.f32 %v1596_v27, %v1580_v60  ;;  %v1598_v35 = vpop.eup %1597  ;;  %v1452_v60 = vld [vmem:[#allocation11 + $0x10] sm:$0xff] }
 0x4cb   : > { %v954_v32 = vpack.c.bf16 %v953_v28, %v953_v28  ;;  %v1073_v38 = vmul.f32 %v1598_v35, %v2180_v63  ;;  %1206 = vmatpush.bf16.msra.mxu0 %v1452_v60  ;;  %v1451_v63 = vld [vmem:[#allocation11 + $0x8] sm:$0xff] }
 0x4cc   : > { %1411 = vmatmul.msk.bf16.vlgmr.msra.gmra.mxu2 %vm704_vm12, %v894_v5  ;;  %v1014_v33 = vpack.c.bf16 %v1013_v29, %v1013_v29 }
 0x4cd   : > { %1148 = vmatpush.bf16.msra.mxu2 %v1136_v25  ;;  %v1074_v39 = vpack.c.bf16 %v1073_v38, %v1073_v38 }
 0x4cf   : > { %1207 = vmatpush.bf16.msra.mxu0 %v1451_v63 }
 0x4d3   : > { %1208 = vmatpush.bf16.msra.mxu0 %v1450_v2 }
 0x4d8   : > { %v956_v30 = vpop.permute.xlu1 %955 }
 0x4d9   : > { %968 = vmatpush.bf16.msra.mxu1 %v956_v30 }
 0x4dc   : > { %v850_v34 = vpop.f32.mrf.mxu1  ;;  %1413 = vmatmul.msk.bf16.vlgmr.msra.gmra.mxu1 %vm704_vm12, %v954_v32  ;;  %1415 = vmatmul.msk.bf16.vlgmr.msrb.gmra.mxu2 %vm704_vm12, %v1014_v33 }
 0x4dd   : > { %1088 = vmatpush.bf16.msrb.mxu1 %v1076_v31  ;;  %855 = vrot.lane.b32.xlu0 %v850_v34, %s1851_s13 }
 0x4e4   : > { %v852_v37 = vpop.f32.mrf.mxu1 }
 0x4ec   : > { %1417 = vmatmul.msk.bf16.vlgmr.msrb.gmra.mxu1 %vm704_vm12, %v1074_v39 }
 0x503   : > { %v1131_v40 = vpop.xlane.xlu1 %1130 }
 0x504   : > { %1599 = vrcp.f32 %v1131_v40 }
 0x50a   : > { %v1600_v41 = vpop.eup %1599 }
 0x50b   : > { %v1133_v42 = vmul.f32 %v1600_v41, %v1588_v15 }
 0x50d   : > { %v1134_v43 = vpack.c.bf16 %v1133_v42, %v1133_v42 }
 0x50f   : > { %1419 = vmatmul.msk.bf16.vlgmr.msra.gmra.mxu2 %vm704_vm12, %v1134_v43 }
 0x528   : > { %v790_v44 = vpop.f32.mrf.mxu2 }
 0x529   : > { %795 = vrot.lane.b32.xlu1 %v790_v44, %s1852_s18 }
 0x530   : > { %v792_v45 = vpop.f32.mrf.mxu2 }
 0x54f   : > { %v910_v46 = vpop.f32.mrf.mxu2  ;;  %v856_v57 = vpop.permute.xlu0 %855 }
 0x550   : > { %915 = vrot.lane.b32.xlu2 %v910_v46, %s1848_s27 }
 0x557   : > { %v912_v47 = vpop.f32.mrf.mxu2 }
 0x559   : > { %v970_v48 = vpop.f32.mrf.mxu1 }
 0x55a   : > { %975 = vrot.lane.b32.xlu0 %v970_v48, %s1853_s17 }
 0x55f   : > { %v1030_v49 = vpop.f32.mrf.mxu2 }
 0x560   : > { %1035 = vrot.lane.b32.xlu2 %v1030_v49, %s1847_s4  ;;  %s1767_s4 = scalar_lea.hbm %s1766_s25, 8 }
 0x561   : > { %v972_v50 = vpop.f32.mrf.mxu1  ;;  %p1768_p1 = scmp.ne.s32.totalorder %s1766_s25, %s1767_s4  ;;  %p1773_p9 = scmp.lt.s32.totalorder %s1771_s15, %s1767_s4 }
 0x563   : > { %p1769_p3 = pnand %p1768_p1, %p1989_p0  ;;  %p1774_p8 = por %p1773_p9, %p1772_p7 }
 0x565   : > { %p1770_p13 = pneg %p1769_p3 }
 0x567   : > { %v1032_v51 = vpop.f32.mrf.mxu2  ;;  %p1775_p5 = pnand %p1774_p8, %p1770_p13 }
 0x569   : > { %v1090_v52 = vpop.f32.mrf.mxu1 }
 0x56a   : > { %1095 = vrot.lane.b32.xlu0 %v1090_v52, %s1849_s26 }
 0x571   : > { %v1092_v53 = vpop.f32.mrf.mxu1 }
 0x592   : > { %v1150_v54 = vpop.f32.mrf.mxu2 }
 0x593   : > { %1155 = vrot.lane.b32.xlu2 %v1150_v54, %s1850_s22 }
 0x59a   : > { %v1152_v55 = vpop.f32.mrf.mxu2 }
 0x59b   : > { %v796_v56 = vpop.permute.xlu1 %795 }
 0x59c   : > { %799 = vst.msk [vmem:[#allocation2] sm:$0xff] %vm798_vm13, %v796_v56 }
 0x59d   : > { %859 = vst.msk [vmem:[#allocation2] sm:$0xff] %vm858_vm14, %v856_v57 }
 0x5aa   : > { %v916_v58 = vpop.permute.xlu2 %915 }
 0x5ab   : > { %919 = vst.msk [vmem:[#allocation2] sm:$0xff] %vm918_vm15, %v916_v58 }
 0x5ba   : > { %v1036_v62 = vpop.permute.xlu2 %1035 }
 0x5cc   : > { %v976_v61 = vpop.permute.xlu0 %975 }
 0x5cd   : > { %979 = vst.msk [vmem:[#allocation2] sm:$0xff] %vm978_vm1, %v976_v61 }
 0x5ce   : > { %1039 = vst.msk [vmem:[#allocation2] sm:$0xff] %vm1038_vm2, %v1036_v62 }
 0x5dc   : > { %v1096_v3 = vpop.permute.xlu0 %1095 }
 0x5dd   : > { %1099 = vst.msk [vmem:[#allocation2] sm:$0xff] %vm1098_vm3, %v1096_v3 }
 0x5ed   : > { %v1156_v4 = vpop.permute.xlu2 %1155 }
 0x5ee   : > { %1159 = vst.msk [vmem:[#allocation2] sm:$0xff] %vm1158_vm4, %v1156_v4 }
 0x5f5   : > { %v1160_v6 = vld [vmem:[#allocation2] sm:$0xff] }
 0x5f6   : > { %v1161_v7 = vpack.c.bf16 %v1160_v6, %v1160_v6 }
 0x5f8   : > { %1436 = vmatmul.msk.bf16.vlgmr.msra.gmra.mxu0 %vm474_vm0, %v1161_v7 }
 0x675   : > { %v1210_v9 = vpop.f32.mrf.mxu0 }
 0x676   : > { %v1211_v10 = vadd.f32 %v1560_v8, %v1210_v9 }
 0x678   : > { %1214 = vst.msk [vmem:[%s467_s29] sm:$0xff] %vm474_vm0, %v1211_v10 }
 0x679   : > { %1778 = shalt.err (!%p1775_p5)
}
 0x67a   : > { %1470 = dma.vmem_to_hbm [thread:$0]  (%p1989_p0), %s1229_s21, 128, %s1231_s28, %s1216_s20  }
 0x67d   : > { %v1212_v11 = vpop.f32.mrf.mxu0 }
 0x67e PF: > { %s2281_s8 = sld [smem:[#allocation18_spill]]  ;;  %p2283_p10 = scmp.ge.s32.totalorder %s1829_s16, 2 }
 0x680   : > { %p1490_p11 = pnand %p2283_p10, %p1997_p6 }
 0x682   : > { %p1491_p12 = pneg %p1490_p11 }
 0x684   : > { %s1242_s17 = sand.u32 1, %s2281_s8  }
 0x685   : > { %s1243_s6 = scalar_lea.sflag [#allocation5], %s1242_s17 }
 0x686   : > { %1812 = dma.done.wait (%p1491_p12), %s1243_s6, 128  }
 0x687   : > { %1814 = vsyncadd (%p1491_p12), %s1243_s6, 4294967168  ;;  %s2284_s16 = sld [smem:[#allocation20_spill]]  ;;  %s2287_s13 = smov %s1821_s14 }
 0x688   : > { %s2285_s12 = sld [smem:[#allocation19_spill]] }
 0x689   : > { %s2286_s15 = sld [smem:[#allocation21_spill]] }
 0x68d   : > { %p27_p2 = scmp.ge.s32.totalorder %s2284_s16, 4  }
 0x68e   : > { %s2288_s14 = smov %s2285_s12 }
 0x68f   :  { %29 = sbr.rel (!%p27_p2) target bundleno = 12 (0xc), region = 130 }
 0x694   :  { %1249 = vsyncpa [#allocation4], 1 }
 0x695   :  { %1251 = vsyncpa [#allocation4 + $0x1], 1 }
 0x696   :  { %1252 = vsyncpa [#allocation7], 1 }
 0x697   :  { %1254 = vsyncpa [#allocation7 + $0x1], 1 }
 0x698   :  { %1255 = vsyncpa [#allocation10], 1 }
 0x699   :  { %1256 = vsyncpa [#allocation5], 1 }
 0x69a   :  { %1258 = vsyncpa [#allocation5 + $0x1], 1 }

</bundles_post_ra>
